<compile_context>
chip_gen: v6e
topology: v6e:2x2x1
jax: 0.10.0
libtpu: 0.0.40
codegen_flags: <defaults>
</compile_context>

<pallas_src>
import jax
import jax.numpy as jnp
from jax.experimental import pallas as pl
from jax.experimental.pallas import tpu as pltpu


def _round_up(x, m):
    return ((x + m - 1) // m) * m


# ----------------------------------------------------------------------------
# im2col restricted to pool-surviving rows, grouped by 2x2 pool offset.
# Output: (N, 4, P_pad, K_pad); group g = di*2+dj, row p = i*Wp + j.
# ----------------------------------------------------------------------------
def _im2col_pool_groups(x_nhwc, Hp, Wp, P_pad, K_pad):
    N, H, W, C = x_nhwc.shape
    P, K = Hp * Wp, 9 * C
    cols = []
    for kh in range(3):
        for kw in range(3):
            cols.append(x_nhwc[:, kh:kh + 2 * Hp, kw:kw + 2 * Wp, :])
    patches = jnp.concatenate(cols, axis=-1)               # (N, 2Hp, 2Wp, 9C)
    patches = patches.reshape(N, Hp, 2, Wp, 2, K)
    patches = jnp.transpose(patches, (0, 2, 4, 1, 3, 5))   # (N, 2, 2, Hp, Wp, K)
    imcol = patches.reshape(N, 4, P, K)
    if P_pad != P or K_pad != K:
        imcol = jnp.pad(imcol, ((0, 0), (0, 0), (0, P_pad - P), (0, K_pad - K)))
    return imcol


# ----------------------------------------------------------------------------
# Conv(3x3 valid, no bias) + ReLU + MaxPool(2x2), B samples per grid step.
# ----------------------------------------------------------------------------
def _conv_relu_pool_kernel(imcol_ref, w_ref, o_ref):
    # imcol_ref: (B, 4, P_pad, K)   pool-group rows, sublane-aligned
    # w_ref:     (K, Cout)
    # o_ref:     (B, P_pad, Cout)
    b, g, p_pad, k = imcol_ref.shape
    cout = w_ref.shape[1]
    z = jnp.dot(imcol_ref[...].reshape(b * g * p_pad, k), w_ref[...],
                preferred_element_type=jnp.float32)
    z = jnp.maximum(z, 0.0).reshape(b, g, p_pad, cout)      # ReLU commutes with max
    o_ref[...] = jnp.maximum(jnp.maximum(z[:, 0], z[:, 1]),
                             jnp.maximum(z[:, 2], z[:, 3])).astype(o_ref.dtype)


def conv_relu_pool(x_nhwc, w_hwio, *, k_pad=None, target_rows=1024):
    """x: (N,H,W,Cin) f32, w: (3,3,Cin,Cout) f32 -> (N,Hp,Wp,Cout) f32."""
    N, H, W, C = x_nhwc.shape
    Cout = w_hwio.shape[-1]
    Hp, Wp = (H - 2) // 2, (W - 2) // 2
    P = Hp * Wp
    P_pad = _round_up(P, 8)
    K = 9 * C
    K_pad = K if k_pad is None else k_pad

    imcol = _im2col_pool_groups(x_nhwc, Hp, Wp, P_pad, K_pad)   # (N,4,P_pad,K_pad)
    wmat = w_hwio.reshape(K, Cout)
    if K_pad != K:
        wmat = jnp.pad(wmat, ((0, K_pad - K), (0, 0)))

    # Batch block: amortize per-step overhead; per-step M = B * 4 * P_pad.
    rows_per_sample = 4 * P_pad
    B = max(1, min(N, target_rows // rows_per_sample))
    n_pad = _round_up(N, B)
    if n_pad != N:
        imcol = jnp.pad(imcol, ((0, n_pad - N), (0, 0), (0, 0), (0, 0)))

    out = pl.pallas_call(
        _conv_relu_pool_kernel,
        out_shape=jax.ShapeDtypeStruct((n_pad, P_pad, Cout), jnp.float32),
        grid=(n_pad // B,),
        in_specs=[
            pl.BlockSpec((B, 4, P_pad, K_pad), lambda i: (i, 0, 0, 0)),
            pl.BlockSpec((K_pad, Cout), lambda i: (0, 0)),
        ],
        out_specs=pl.BlockSpec((B, P_pad, Cout), lambda i: (i, 0, 0)),
        compiler_params=pltpu.CompilerParams(
            dimension_semantics=("parallel",)),
    )(imcol, wmat)
    return out[:N, :P, :].reshape(N, Hp, Wp, Cout)


# ----------------------------------------------------------------------------
# Fused conv3 + ReLU + pool + NCHW-flatten + fc1 -> fc2 -> fc3.
# Batch rides the sublane axis (pool-group-major imcol) so every slice used in
# the kernel is a cheap leading-dim slice; the NCHW flatten is absorbed into a
# precomputed permutation of the fc1 weight rows.
# ----------------------------------------------------------------------------
def _conv3_fc_kernel(imcol_ref, wc_ref, w1_ref, b1_ref, w2_ref, b2_ref,
                     w3_ref, b3_ref, exit_ref, logit_ref):
    # imcol_ref: (4, P_pad, B, K)     wc_ref: (K, C3)
    # w1_ref:    (P, C3, H1)          fc1 weight permuted to (hw, c, out)
    # exit_ref:  (P_pad, B, C3)       logit_ref: (B, OUT_PAD)
    g, p_pad, b, k = imcol_ref.shape
    c3 = wc_ref.shape[1]
    z = jnp.dot(imcol_ref[...].reshape(g * p_pad * b, k), wc_ref[...],
                preferred_element_type=jnp.float32)
    z = jnp.maximum(z, 0.0).reshape(g, p_pad, b, c3)
    pooled = jnp.maximum(jnp.maximum(z[0], z[1]), jnp.maximum(z[2], z[3]))
    exit_ref[...] = pooled.astype(exit_ref.dtype)            # (P_pad, B, C3)

    num_pos = w1_ref.shape[0]                                 # 4 spatial positions
    h1 = jnp.dot(pooled[0], w1_ref[0], preferred_element_type=jnp.float32)
    for p in range(1, num_pos):
        h1 = h1 + jnp.dot(pooled[p], w1_ref[p],
                          preferred_element_type=jnp.float32)
    h1 = h1 + b1_ref[...]
    h2 = jnp.dot(h1, w2_ref[...], preferred_element_type=jnp.float32) + b2_ref[...]
    h3 = jnp.dot(h2, w3_ref[...], preferred_element_type=jnp.float32) + b3_ref[...]
    logit_ref[...] = h3.astype(logit_ref.dtype)


def conv3_fc_fused(x_nhwc, w_conv3, w_fc1, b_fc1, w_fc2, b_fc2, w_fc3, b_fc3,
                   *, out_pad=128, max_batch_block=16):
    N, H, W, C = x_nhwc.shape                    # (N, 6, 6, 128)
    C3 = w_conv3.shape[-1]                       # 64
    Hp, Wp = (H - 2) // 2, (W - 2) // 2          # 2, 2
    P = Hp * Wp                                  # 4
    P_pad = _round_up(P, 8)                      # 8
    K = 9 * C                                    # 1152

    imcol = _im2col_pool_groups(x_nhwc, Hp, Wp, P_pad, K)     # (N, 4, P_pad, K)
    wc = w_conv3.reshape(K, C3)

    # Batch block must be a multiple of 8 (it becomes a sublane dim).
    n8 = _round_up(N, 8)
    B = min(n8, max_batch_block)
    n_pad = _round_up(N, B)
    if n_pad != N:
        imcol = jnp.pad(imcol, ((0, n_pad - N), (0, 0), (0, 0), (0, 0)))
    imcol_t = jnp.transpose(imcol, (1, 2, 0, 3))              # (4, P_pad, n_pad, K)

    H1, H2, OUT = w_fc1.shape[1], w_fc2.shape[1], w_fc3.shape[1]
    # nn.Flatten on NCHW: in-feature index = c*P + p.  The kernel produces
    # (p, c)-ordered activations, so pre-permute fc1 weight rows accordingly.
    w1r = jnp.transpose(w_fc1.reshape(C3, P, H1), (1, 0, 2))  # (P, C3, H1)
    w3p = jnp.pad(w_fc3, ((0, 0), (0, out_pad - OUT)))        # lane-dense logits
    b3p = jnp.pad(b_fc3, ((0, 0), (0, out_pad - OUT)))

    exit_t, logits = pl.pallas_call(
        _conv3_fc_kernel,
        out_shape=(
            jax.ShapeDtypeStruct((P_pad, n_pad, C3), jnp.float32),
            jax.ShapeDtypeStruct((n_pad, out_pad), jnp.float32),
        ),
        grid=(n_pad // B,),
        in_specs=[
            pl.BlockSpec((4, P_pad, B, K), lambda i: (0, 0, i, 0)),
            pl.BlockSpec((K, C3), lambda i: (0, 0)),
            pl.BlockSpec((P, C3, H1), lambda i: (0, 0, 0)),
            pl.BlockSpec((1, H1), lambda i: (0, 0)),
            pl.BlockSpec((H1, H2), lambda i: (0, 0)),
            pl.BlockSpec((1, H2), lambda i: (0, 0)),
            pl.BlockSpec((H2, out_pad), lambda i: (0, 0)),
            pl.BlockSpec((1, out_pad), lambda i: (0, 0)),
        ],
        out_specs=(
            pl.BlockSpec((P_pad, B, C3), lambda i: (0, i, 0)),
            pl.BlockSpec((B, out_pad), lambda i: (i, 0)),
        ),
        compiler_params=pltpu.CompilerParams(
            dimension_semantics=("parallel",)),
    )(imcol_t, wc, w1r, b_fc1, w_fc2, b_fc2, w3p, b3p)

    exit_nhwc = jnp.transpose(exit_t, (1, 0, 2))[:N, :P, :].reshape(N, Hp, Wp, C3)
    return logits[:N, :OUT], exit_nhwc


# ----------------------------------------------------------------------------
# Full forward pass (matches Baseline.forward semantics at width_mult = 1.0)
# ----------------------------------------------------------------------------
def baseline_forward(x_nchw, params):
    x = jnp.transpose(x_nchw, (0, 2, 3, 1))                  # NCHW -> NHWC
    exit_outputs = []

    a1 = conv_relu_pool(x, params['w_conv1'], k_pad=32)      # K: 27 -> 32
    exit_outputs.append(jnp.transpose(a1, (0, 3, 1, 2)))     # exits reported NCHW
    a2 = conv_relu_pool(a1, params['w_conv2'])
    exit_outputs.append(jnp.transpose(a2, (0, 3, 1, 2)))

    logits, a3 = conv3_fc_fused(a2, params['w_conv3'],
                                params['w_fc1'], params['b_fc1'],
                                params['w_fc2'], params['b_fc2'],
                                params['w_fc3'], params['b_fc3'])
    exit_outputs.append(jnp.transpose(a3, (0, 3, 1, 2)))
    return logits, exit_outputs


# ----------------------------------------------------------------------------
# Pure-JAX reference (for a correctness self-check) and param init.
# ----------------------------------------------------------------------------
def _reference_forward(x_nchw, params):
    hp = jax.lax.Precision.HIGHEST

    def crp(x, w):
        y = jax.lax.conv_general_dilated(
            x, w, window_strides=(1, 1), padding='VALID',
            dimension_numbers=('NHWC', 'HWIO', 'NHWC'), precision=hp)
        y = jnp.maximum(y, 0.0)
        return jax.lax.reduce_window(y, -jnp.inf, jax.lax.max,
                                     (1, 2, 2, 1), (1, 2, 2, 1), 'VALID')

    x = jnp.transpose(x_nchw, (0, 2, 3, 1))
    a1 = crp(x, params['w_conv1'])
    a2 = crp(a1, params['w_conv2'])
    a3 = crp(a2, params['w_conv3'])
    flat = jnp.transpose(a3, (0, 3, 1, 2)).reshape(a3.shape[0], -1)
    h1 = jnp.dot(flat, params['w_fc1'], precision=hp) + params['b_fc1']
    h2 = jnp.dot(h1, params['w_fc2'], precision=hp) + params['b_fc2']
    logits = jnp.dot(h2, params['w_fc3'], precision=hp) + params['b_fc3']
    exits = [jnp.transpose(a, (0, 3, 1, 2)) for a in (a1, a2, a3)]
    return logits, exits


def init_params(key):
    ks = jax.random.split(key, 9)

    def nrm(k, shape, scale):
        return jax.random.normal(k, shape, jnp.float32) * scale

    return {
        # conv weights in HWIO (3, 3, Cin, Cout); convs have no bias.
        'w_conv1': nrm(ks[0], (3, 3, 3, 64), 0.10),
        'w_conv2': nrm(ks[1], (3, 3, 64, 128), 0.05),
        'w_conv3': nrm(ks[2], (3, 3, 128, 64), 0.05),
        # linear weights stored as (in_features, out_features) = W_pytorch.T
        'w_fc1': nrm(ks[3], (256, 256), 0.05),
        'b_fc1': nrm(ks[4], (1, 256), 0.05),
        'w_fc2': nrm(ks[5], (256, 64), 0.05),
        'b_fc2': nrm(ks[6], (1, 64), 0.05),
        'w_fc3': nrm(ks[7], (64, 10), 0.05),
        'b_fc3': nrm(ks[8], (1, 10), 0.05),
    }


if __name__ == "__main__":
    key = jax.random.PRNGKey(0)
    kx, kp = jax.random.split(key)

    # NCHW input; 32x32 spatial is implied by fc1 (64 * 2 * 2 = 256 features).
    x = jax.random.normal(kx, (2, 3, 32, 32), jnp.float32)
    params = init_params(kp)

    fwd = jax.jit(baseline_forward)
    logits, exits = fwd(x, params)
    jax.block_until_ready(logits)
    for e in exits:
        jax.block_until_ready(e)

    assert logits.shape == (2, 10)
    assert exits[0].shape == (2, 64, 15, 15)
    assert exits[1].shape == (2, 128, 6, 6)
    assert exits[2].shape == (2, 64, 2, 2)
    assert bool(jnp.all(jnp.isfinite(logits)))

    # Numerical self-check vs. a pure-JAX reference of the PyTorch module.
    ref_logits, ref_exits = jax.jit(_reference_forward)(x, params)
    assert bool(jnp.allclose(logits, ref_logits, atol=2e-3, rtol=2e-3))
    for got, ref in zip(exits, ref_exits):
        assert bool(jnp.allclose(got, ref, atol=2e-3, rtol=2e-3))

    print("KERNEL_OK")
</pallas_src>

<mosaic_0001>
module attributes {stable_mosaic.version = 11 : i64} {
  func.func @_conv_relu_pool_kernel(%arg0: i32, %arg1: memref<1x4x232x32xf32, #tpu.memory_space<vmem>>, %arg2: memref<32x64xf32, #tpu.memory_space<vmem>>, %arg3: memref<1x232x64xf32, #tpu.memory_space<vmem>>) attributes {dimension_semantics = [#tpu.dimension_semantics<parallel>], iteration_bounds = array<i64: 2>, scalar_prefetch = 0 : i64, scratch_operands = 0 : i64, tpu.core_type = #tpu.core_type<tc>, window_params = [{transform_indices = @transform_0, window_bounds = array<i64: 1, 4, 232, 32>}, {pipeline_mode = #tpu.pipeline_mode<synchronous>, transform_indices = @transform_1, window_bounds = array<i64: 32, 64>}, {transform_indices = @transform_2, window_bounds = array<i64: 1, 232, 64>}]} {
    %c0 = arith.constant 0 : index
    %c0_0 = arith.constant 0 : index
    %c0_1 = arith.constant 0 : index
    %c0_2 = arith.constant 0 : index
    %0 = vector.load %arg1[%c0, %c0_0, %c0_1, %c0_2] : memref<1x4x232x32xf32, #tpu.memory_space<vmem>>, vector<1x4x232x32xf32>
    %1 = vector.shape_cast %0 : vector<1x4x232x32xf32> to vector<928x32xf32>
    %c0_3 = arith.constant 0 : index
    %c0_4 = arith.constant 0 : index
    %2 = vector.load %arg2[%c0_3, %c0_4] : memref<32x64xf32, #tpu.memory_space<vmem>>, vector<32x64xf32>
    %cst = arith.constant dense<0.000000e+00> : vector<928x64xf32>
    %3 = tpu.matmul %1, %2, %cst {dimension_numbers = #tpu.dot_dimension_numbers<[1], [0], [0], [1], [0, 0, 1, 1], [], []>} : vector<928x32xf32>, vector<32x64xf32>, vector<928x64xf32> -> vector<928x64xf32>
    %cst_5 = arith.constant 0.000000e+00 : f32
    %4 = vector.broadcast %cst_5 : f32 to vector<928x64xf32>
    %5 = arith.maximumf %3, %4 : vector<928x64xf32>
    %6 = vector.shape_cast %5 : vector<928x64xf32> to vector<1x4x232x64xf32>
    %7 = vector.extract_strided_slice %6 {offsets = [0, 0, 0, 0], sizes = [1, 1, 232, 64], strides = [1, 1, 1, 1]} : vector<1x4x232x64xf32> to vector<1x1x232x64xf32>
    %8 = vector.shape_cast %7 : vector<1x1x232x64xf32> to vector<1x232x64xf32>
    %9 = vector.extract_strided_slice %6 {offsets = [0, 1, 0, 0], sizes = [1, 1, 232, 64], strides = [1, 1, 1, 1]} : vector<1x4x232x64xf32> to vector<1x1x232x64xf32>
    %10 = vector.shape_cast %9 : vector<1x1x232x64xf32> to vector<1x232x64xf32>
    %11 = arith.maximumf %8, %10 : vector<1x232x64xf32>
    %12 = vector.extract_strided_slice %6 {offsets = [0, 2, 0, 0], sizes = [1, 1, 232, 64], strides = [1, 1, 1, 1]} : vector<1x4x232x64xf32> to vector<1x1x232x64xf32>
    %13 = vector.shape_cast %12 : vector<1x1x232x64xf32> to vector<1x232x64xf32>
    %14 = vector.extract_strided_slice %6 {offsets = [0, 3, 0, 0], sizes = [1, 1, 232, 64], strides = [1, 1, 1, 1]} : vector<1x4x232x64xf32> to vector<1x1x232x64xf32>
    %15 = vector.shape_cast %14 : vector<1x1x232x64xf32> to vector<1x232x64xf32>
    %16 = arith.maximumf %13, %15 : vector<1x232x64xf32>
    %17 = arith.maximumf %11, %16 : vector<1x232x64xf32>
    %c0_6 = arith.constant 0 : index
    %c0_7 = arith.constant 0 : index
    %c0_8 = arith.constant 0 : index
    %18 = vector.load %arg3[%c0_6, %c0_7, %c0_8] : memref<1x232x64xf32, #tpu.memory_space<vmem>>, vector<1x232x64xf32>
    tpu.vector_store %arg3[%c0_6, %c0_7, %c0_8], %17 {strides = array<i32>} : memref<1x232x64xf32, #tpu.memory_space<vmem>>, vector<1x232x64xf32>,
    return
  }
  func.func @transform_0(%arg0: i32) -> (i32, i32, i32, i32) {
    %c0_i32 = arith.constant 0 : i32
    %c0_i32_0 = arith.constant 0 : i32
    %c0_i32_1 = arith.constant 0 : i32
    %c0_i32_2 = arith.constant 0 : i32
    return %arg0, %c0_i32, %c0_i32_0, %c0_i32_1 : i32, i32, i32, i32
  }
  func.func @transform_1(%arg0: i32) -> (i32, i32) {
    %c0_i32 = arith.constant 0 : i32
    %c0_i32_0 = arith.constant 0 : i32
    %c0_i32_1 = arith.constant 0 : i32
    return %c0_i32, %c0_i32_0 : i32, i32
  }
  func.func @transform_2(%arg0: i32) -> (i32, i32, i32) {
    %c0_i32 = arith.constant 0 : i32
    %c0_i32_0 = arith.constant 0 : i32
    %c0_i32_1 = arith.constant 0 : i32
    return %arg0, %c0_i32, %c0_i32_0 : i32, i32, i32
  }
}

module attributes {stable_mosaic.version = 11 : i64} {
  func.func @_conv_relu_pool_kernel(%arg0: i32, %arg1: memref<2x4x40x576xf32, #tpu.memory_space<vmem>>, %arg2: memref<576x128xf32, #tpu.memory_space<vmem>>, %arg3: memref<2x40x128xf32, #tpu.memory_space<vmem>>) attributes {dimension_semantics = [#tpu.dimension_semantics<parallel>], iteration_bounds = array<i64: 1>, scalar_prefetch = 0 : i64, scratch_operands = 0 : i64, tpu.core_type = #tpu.core_type<tc>, window_params = [{transform_indices = @transform_0, window_bounds = array<i64: 2, 4, 40, 576>}, {pipeline_mode = #tpu.pipeline_mode<synchronous>, transform_indices = @transform_1, window_bounds = array<i64: 576, 128>}, {transform_indices = @transform_2, window_bounds = array<i64: 2, 40, 128>}]} {
    %c0 = arith.constant 0 : index
    %c0_0 = arith.constant 0 : index
    %c0_1 = arith.constant 0 : index
    %c0_2 = arith.constant 0 : index
    %0 = vector.load %arg1[%c0, %c0_0, %c0_1, %c0_2] : memref<2x4x40x576xf32, #tpu.memory_space<vmem>>, vector<2x4x40x576xf32>
    %1 = vector.shape_cast %0 : vector<2x4x40x576xf32> to vector<320x576xf32>
    %c0_3 = arith.constant 0 : index
    %c0_4 = arith.constant 0 : index
    %2 = vector.load %arg2[%c0_3, %c0_4] : memref<576x128xf32, #tpu.memory_space<vmem>>, vector<576x128xf32>
    %cst = arith.constant dense<0.000000e+00> : vector<320x128xf32>
    %3 = tpu.matmul %1, %2, %cst {dimension_numbers = #tpu.dot_dimension_numbers<[1], [0], [0], [1], [0, 0, 1, 1], [], []>} : vector<320x576xf32>, vector<576x128xf32>, vector<320x128xf32> -> vector<320x128xf32>
    %cst_5 = arith.constant 0.000000e+00 : f32
    %4 = vector.broadcast %cst_5 : f32 to vector<320x128xf32>
    %5 = arith.maximumf %3, %4 : vector<320x128xf32>
    %6 = vector.shape_cast %5 : vector<320x128xf32> to vector<2x4x40x128xf32>
    %7 = vector.extract_strided_slice %6 {offsets = [0, 0, 0, 0], sizes = [2, 1, 40, 128], strides = [1, 1, 1, 1]} : vector<2x4x40x128xf32> to vector<2x1x40x128xf32>
    %8 = vector.shape_cast %7 : vector<2x1x40x128xf32> to vector<2x40x128xf32>
    %9 = vector.extract_strided_slice %6 {offsets = [0, 1, 0, 0], sizes = [2, 1, 40, 128], strides = [1, 1, 1, 1]} : vector<2x4x40x128xf32> to vector<2x1x40x128xf32>
    %10 = vector.shape_cast %9 : vector<2x1x40x128xf32> to vector<2x40x128xf32>
    %11 = arith.maximumf %8, %10 : vector<2x40x128xf32>
    %12 = vector.extract_strided_slice %6 {offsets = [0, 2, 0, 0], sizes = [2, 1, 40, 128], strides = [1, 1, 1, 1]} : vector<2x4x40x128xf32> to vector<2x1x40x128xf32>
    %13 = vector.shape_cast %12 : vector<2x1x40x128xf32> to vector<2x40x128xf32>
    %14 = vector.extract_strided_slice %6 {offsets = [0, 3, 0, 0], sizes = [2, 1, 40, 128], strides = [1, 1, 1, 1]} : vector<2x4x40x128xf32> to vector<2x1x40x128xf32>
    %15 = vector.shape_cast %14 : vector<2x1x40x128xf32> to vector<2x40x128xf32>
    %16 = arith.maximumf %13, %15 : vector<2x40x128xf32>
    %17 = arith.maximumf %11, %16 : vector<2x40x128xf32>
    %c0_6 = arith.constant 0 : index
    %c0_7 = arith.constant 0 : index
    %c0_8 = arith.constant 0 : index
    %18 = vector.load %arg3[%c0_6, %c0_7, %c0_8] : memref<2x40x128xf32, #tpu.memory_space<vmem>>, vector<2x40x128xf32>
    tpu.vector_store %arg3[%c0_6, %c0_7, %c0_8], %17 {strides = array<i32>} : memref<2x40x128xf32, #tpu.memory_space<vmem>>, vector<2x40x128xf32>,
    return
  }
  func.func @transform_0(%arg0: i32) -> (i32, i32, i32, i32) {
    %c0_i32 = arith.constant 0 : i32
    %c0_i32_0 = arith.constant 0 : i32
    %c0_i32_1 = arith.constant 0 : i32
    %c0_i32_2 = arith.constant 0 : i32
    return %arg0, %c0_i32, %c0_i32_0, %c0_i32_1 : i32, i32, i32, i32
  }
  func.func @transform_1(%arg0: i32) -> (i32, i32) {
    %c0_i32 = arith.constant 0 : i32
    %c0_i32_0 = arith.constant 0 : i32
    %c0_i32_1 = arith.constant 0 : i32
    return %c0_i32, %c0_i32_0 : i32, i32
  }
  func.func @transform_2(%arg0: i32) -> (i32, i32, i32) {
    %c0_i32 = arith.constant 0 : i32
    %c0_i32_0 = arith.constant 0 : i32
    %c0_i32_1 = arith.constant 0 : i32
    return %arg0, %c0_i32, %c0_i32_0 : i32, i32, i32
  }
}

module attributes {stable_mosaic.version = 11 : i64} {
  func.func @_conv3_fc_kernel(%arg0: i32, %arg1: memref<4x8x8x1152xf32, #tpu.memory_space<vmem>>, %arg2: memref<1152x64xf32, #tpu.memory_space<vmem>>, %arg3: memref<4x64x256xf32, #tpu.memory_space<vmem>>, %arg4: memref<1x256xf32, #tpu.memory_space<vmem>>, %arg5: memref<256x64xf32, #tpu.memory_space<vmem>>, %arg6: memref<1x64xf32, #tpu.memory_space<vmem>>, %arg7: memref<64x128xf32, #tpu.memory_space<vmem>>, %arg8: memref<1x128xf32, #tpu.memory_space<vmem>>, %arg9: memref<8x8x64xf32, #tpu.memory_space<vmem>>, %arg10: memref<8x128xf32, #tpu.memory_space<vmem>>) attributes {dimension_semantics = [#tpu.dimension_semantics<parallel>], iteration_bounds = array<i64: 1>, scalar_prefetch = 0 : i64, scratch_operands = 0 : i64, tpu.core_type = #tpu.core_type<tc>, window_params = [{transform_indices = @transform_0, window_bounds = array<i64: 4, 8, 8, 1152>}, {pipeline_mode = #tpu.pipeline_mode<synchronous>, transform_indices = @transform_1, window_bounds = array<i64: 1152, 64>}, {pipeline_mode = #tpu.pipeline_mode<synchronous>, transform_indices = @transform_2, window_bounds = array<i64: 4, 64, 256>}, {pipeline_mode = #tpu.pipeline_mode<synchronous>, transform_indices = @transform_3, window_bounds = array<i64: 1, 256>}, {pipeline_mode = #tpu.pipeline_mode<synchronous>, transform_indices = @transform_4, window_bounds = array<i64: 256, 64>}, {pipeline_mode = #tpu.pipeline_mode<synchronous>, transform_indices = @transform_5, window_bounds = array<i64: 1, 64>}, {pipeline_mode = #tpu.pipeline_mode<synchronous>, transform_indices = @transform_6, window_bounds = array<i64: 64, 128>}, {pipeline_mode = #tpu.pipeline_mode<synchronous>, transform_indices = @transform_7, window_bounds = array<i64: 1, 128>}, {transform_indices = @transform_8, window_bounds = array<i64: 8, 8, 64>}, {transform_indices = @transform_9, window_bounds = array<i64: 8, 128>}]} {
    %c0 = arith.constant 0 : index
    %c0_0 = arith.constant 0 : index
    %c0_1 = arith.constant 0 : index
    %c0_2 = arith.constant 0 : index
    %0 = vector.load %arg1[%c0, %c0_0, %c0_1, %c0_2] : memref<4x8x8x1152xf32, #tpu.memory_space<vmem>>, vector<4x8x8x1152xf32>
    %1 = vector.shape_cast %0 : vector<4x8x8x1152xf32> to vector<256x1152xf32>
    %c0_3 = arith.constant 0 : index
    %c0_4 = arith.constant 0 : index
    %2 = vector.load %arg2[%c0_3, %c0_4] : memref<1152x64xf32, #tpu.memory_space<vmem>>, vector<1152x64xf32>
    %cst = arith.constant dense<0.000000e+00> : vector<256x64xf32>
    %3 = tpu.matmul %1, %2, %cst {dimension_numbers = #tpu.dot_dimension_numbers<[1], [0], [0], [1], [0, 0, 1, 1], [], []>} : vector<256x1152xf32>, vector<1152x64xf32>, vector<256x64xf32> -> vector<256x64xf32>
    %cst_5 = arith.constant 0.000000e+00 : f32
    %4 = vector.broadcast %cst_5 : f32 to vector<256x64xf32>
    %5 = arith.maximumf %3, %4 : vector<256x64xf32>
    %6 = vector.shape_cast %5 : vector<256x64xf32> to vector<4x8x8x64xf32>
    %7 = vector.extract_strided_slice %6 {offsets = [0, 0, 0, 0], sizes = [1, 8, 8, 64], strides = [1, 1, 1, 1]} : vector<4x8x8x64xf32> to vector<1x8x8x64xf32>
    %8 = vector.shape_cast %7 : vector<1x8x8x64xf32> to vector<8x8x64xf32>
    %9 = vector.extract_strided_slice %6 {offsets = [1, 0, 0, 0], sizes = [1, 8, 8, 64], strides = [1, 1, 1, 1]} : vector<4x8x8x64xf32> to vector<1x8x8x64xf32>
    %10 = vector.shape_cast %9 : vector<1x8x8x64xf32> to vector<8x8x64xf32>
    %11 = arith.maximumf %8, %10 : vector<8x8x64xf32>
    %12 = vector.extract_strided_slice %6 {offsets = [2, 0, 0, 0], sizes = [1, 8, 8, 64], strides = [1, 1, 1, 1]} : vector<4x8x8x64xf32> to vector<1x8x8x64xf32>
    %13 = vector.shape_cast %12 : vector<1x8x8x64xf32> to vector<8x8x64xf32>
    %14 = vector.extract_strided_slice %6 {offsets = [3, 0, 0, 0], sizes = [1, 8, 8, 64], strides = [1, 1, 1, 1]} : vector<4x8x8x64xf32> to vector<1x8x8x64xf32>
    %15 = vector.shape_cast %14 : vector<1x8x8x64xf32> to vector<8x8x64xf32>
    %16 = arith.maximumf %13, %15 : vector<8x8x64xf32>
    %17 = arith.maximumf %11, %16 : vector<8x8x64xf32>
    %c0_6 = arith.constant 0 : index
    %c0_7 = arith.constant 0 : index
    %c0_8 = arith.constant 0 : index
    %18 = vector.load %arg9[%c0_6, %c0_7, %c0_8] : memref<8x8x64xf32, #tpu.memory_space<vmem>>, vector<8x8x64xf32>
    tpu.vector_store %arg9[%c0_6, %c0_7, %c0_8], %17 {strides = array<i32>} : memref<8x8x64xf32, #tpu.memory_space<vmem>>, vector<8x8x64xf32>,
    %19 = vector.extract_strided_slice %17 {offsets = [0, 0, 0], sizes = [1, 8, 64], strides = [1, 1, 1]} : vector<8x8x64xf32> to vector<1x8x64xf32>
    %20 = vector.shape_cast %19 : vector<1x8x64xf32> to vector<8x64xf32>
    %c0_9 = arith.constant 0 : index
    %c0_10 = arith.constant 0 : index
    %c0_11 = arith.constant 0 : index
    %21 = vector.load %arg3[%c0_9, %c0_10, %c0_11] : memref<4x64x256xf32, #tpu.memory_space<vmem>>, vector<1x64x256xf32>
    %22 = vector.shape_cast %21 : vector<1x64x256xf32> to vector<64x256xf32>
    %cst_12 = arith.constant dense<0.000000e+00> : vector<8x256xf32>
    %23 = tpu.matmul %20, %22, %cst_12 {dimension_numbers = #tpu.dot_dimension_numbers<[1], [0], [0], [1], [0, 0, 1, 1], [], []>} : vector<8x64xf32>, vector<64x256xf32>, vector<8x256xf32> -> vector<8x256xf32>
    %24 = vector.extract_strided_slice %17 {offsets = [1, 0, 0], sizes = [1, 8, 64], strides = [1, 1, 1]} : vector<8x8x64xf32> to vector<1x8x64xf32>
    %25 = vector.shape_cast %24 : vector<1x8x64xf32> to vector<8x64xf32>
    %c1 = arith.constant 1 : index
    %c0_13 = arith.constant 0 : index
    %c0_14 = arith.constant 0 : index
    %26 = vector.load %arg3[%c1, %c0_13, %c0_14] : memref<4x64x256xf32, #tpu.memory_space<vmem>>, vector<1x64x256xf32>
    %27 = vector.shape_cast %26 : vector<1x64x256xf32> to vector<64x256xf32>
    %cst_15 = arith.constant dense<0.000000e+00> : vector<8x256xf32>
    %28 = tpu.matmul %25, %27, %cst_15 {dimension_numbers = #tpu.dot_dimension_numbers<[1], [0], [0], [1], [0, 0, 1, 1], [], []>} : vector<8x64xf32>, vector<64x256xf32>, vector<8x256xf32> -> vector<8x256xf32>
    %29 = arith.addf %23, %28 : vector<8x256xf32>
    %30 = vector.extract_strided_slice %17 {offsets = [2, 0, 0], sizes = [1, 8, 64], strides = [1, 1, 1]} : vector<8x8x64xf32> to vector<1x8x64xf32>
    %31 = vector.shape_cast %30 : vector<1x8x64xf32> to vector<8x64xf32>
    %c2 = arith.constant 2 : index
    %c0_16 = arith.constant 0 : index
    %c0_17 = arith.constant 0 : index
    %32 = vector.load %arg3[%c2, %c0_16, %c0_17] : memref<4x64x256xf32, #tpu.memory_space<vmem>>, vector<1x64x256xf32>
    %33 = vector.shape_cast %32 : vector<1x64x256xf32> to vector<64x256xf32>
    %cst_18 = arith.constant dense<0.000000e+00> : vector<8x256xf32>
    %34 = tpu.matmul %31, %33, %cst_18 {dimension_numbers = #tpu.dot_dimension_numbers<[1], [0], [0], [1], [0, 0, 1, 1], [], []>} : vector<8x64xf32>, vector<64x256xf32>, vector<8x256xf32> -> vector<8x256xf32>
    %35 = arith.addf %29, %34 : vector<8x256xf32>
    %36 = vector.extract_strided_slice %17 {offsets = [3, 0, 0], sizes = [1, 8, 64], strides = [1, 1, 1]} : vector<8x8x64xf32> to vector<1x8x64xf32>
    %37 = vector.shape_cast %36 : vector<1x8x64xf32> to vector<8x64xf32>
    %c3 = arith.constant 3 : index
    %c0_19 = arith.constant 0 : index
    %c0_20 = arith.constant 0 : index
    %38 = vector.load %arg3[%c3, %c0_19, %c0_20] : memref<4x64x256xf32, #tpu.memory_space<vmem>>, vector<1x64x256xf32>
    %39 = vector.shape_cast %38 : vector<1x64x256xf32> to vector<64x256xf32>
    %cst_21 = arith.constant dense<0.000000e+00> : vector<8x256xf32>
    %40 = tpu.matmul %37, %39, %cst_21 {dimension_numbers = #tpu.dot_dimension_numbers<[1], [0], [0], [1], [0, 0, 1, 1], [], []>} : vector<8x64xf32>, vector<64x256xf32>, vector<8x256xf32> -> vector<8x256xf32>
    %41 = arith.addf %35, %40 : vector<8x256xf32>
    %c0_22 = arith.constant 0 : index
    %c0_23 = arith.constant 0 : index
    %42 = vector.load %arg4[%c0_22, %c0_23] : memref<1x256xf32, #tpu.memory_space<vmem>>, vector<1x256xf32>
    %43 = vector.broadcast %42 : vector<1x256xf32> to vector<8x256xf32>
    %44 = arith.addf %41, %43 : vector<8x256xf32>
    %c0_24 = arith.constant 0 : index
    %c0_25 = arith.constant 0 : index
    %45 = vector.load %arg5[%c0_24, %c0_25] : memref<256x64xf32, #tpu.memory_space<vmem>>, vector<256x64xf32>
    %cst_26 = arith.constant dense<0.000000e+00> : vector<8x64xf32>
    %46 = tpu.matmul %44, %45, %cst_26 {dimension_numbers = #tpu.dot_dimension_numbers<[1], [0], [0], [1], [0, 0, 1, 1], [], []>} : vector<8x256xf32>, vector<256x64xf32>, vector<8x64xf32> -> vector<8x64xf32>
    %c0_27 = arith.constant 0 : index
    %c0_28 = arith.constant 0 : index
    %47 = vector.load %arg6[%c0_27, %c0_28] : memref<1x64xf32, #tpu.memory_space<vmem>>, vector<1x64xf32>
    %48 = vector.broadcast %47 : vector<1x64xf32> to vector<8x64xf32>
    %49 = arith.addf %46, %48 : vector<8x64xf32>
    %c0_29 = arith.constant 0 : index
    %c0_30 = arith.constant 0 : index
    %50 = vector.load %arg7[%c0_29, %c0_30] : memref<64x128xf32, #tpu.memory_space<vmem>>, vector<64x128xf32>
    %cst_31 = arith.constant dense<0.000000e+00> : vector<8x128xf32>
    %51 = tpu.matmul %49, %50, %cst_31 {dimension_numbers = #tpu.dot_dimension_numbers<[1], [0], [0], [1], [0, 0, 1, 1], [], []>} : vector<8x64xf32>, vector<64x128xf32>, vector<8x128xf32> -> vector<8x128xf32>
    %c0_32 = arith.constant 0 : index
    %c0_33 = arith.constant 0 : index
    %52 = vector.load %arg8[%c0_32, %c0_33] : memref<1x128xf32, #tpu.memory_space<vmem>>, vector<1x128xf32>
    %53 = vector.broadcast %52 : vector<1x128xf32> to vector<8x128xf32>
    %54 = arith.addf %51, %53 : vector<8x128xf32>
    %c0_34 = arith.constant 0 : index
    %c0_35 = arith.constant 0 : index
    %55 = vector.load %arg10[%c0_34, %c0_35] : memref<8x128xf32, #tpu.memory_space<vmem>>, vector<8x128xf32>
    tpu.vector_store %arg10[%c0_34, %c0_35], %54 {strides = array<i32>} : memref<8x128xf32, #tpu.memory_space<vmem>>, vector<8x128xf32>,
    return
  }
  func.func @transform_0(%arg0: i32) -> (i32, i32, i32, i32) {
    %c0_i32 = arith.constant 0 : i32
    %c0_i32_0 = arith.constant 0 : i32
    %c0_i32_1 = arith.constant 0 : i32
    %c0_i32_2 = arith.constant 0 : i32
    return %c0_i32, %c0_i32_0, %arg0, %c0_i32_1 : i32, i32, i32, i32
  }
  func.func @transform_1(%arg0: i32) -> (i32, i32) {
    %c0_i32 = arith.constant 0 : i32
    %c0_i32_0 = arith.constant 0 : i32
    %c0_i32_1 = arith.constant 0 : i32
    return %c0_i32, %c0_i32_0 : i32, i32
  }
  func.func @transform_2(%arg0: i32) -> (i32, i32, i32) {
    %c0_i32 = arith.constant 0 : i32
    %c0_i32_0 = arith.constant 0 : i32
    %c0_i32_1 = arith.constant 0 : i32
    %c0_i32_2 = arith.constant 0 : i32
    return %c0_i32, %c0_i32_0, %c0_i32_1 : i32, i32, i32
  }
  func.func @transform_3(%arg0: i32) -> (i32, i32) {
    %c0_i32 = arith.constant 0 : i32
    %c0_i32_0 = arith.constant 0 : i32
    %c0_i32_1 = arith.constant 0 : i32
    return %c0_i32, %c0_i32_0 : i32, i32
  }
  func.func @transform_4(%arg0: i32) -> (i32, i32) {
    %c0_i32 = arith.constant 0 : i32
    %c0_i32_0 = arith.constant 0 : i32
    %c0_i32_1 = arith.constant 0 : i32
    return %c0_i32, %c0_i32_0 : i32, i32
  }
  func.func @transform_5(%arg0: i32) -> (i32, i32) {
    %c0_i32 = arith.constant 0 : i32
    %c0_i32_0 = arith.constant 0 : i32
    %c0_i32_1 = arith.constant 0 : i32
    return %c0_i32, %c0_i32_0 : i32, i32
  }
  func.func @transform_6(%arg0: i32) -> (i32, i32) {
    %c0_i32 = arith.constant 0 : i32
    %c0_i32_0 = arith.constant 0 : i32
    %c0_i32_1 = arith.constant 0 : i32
    return %c0_i32, %c0_i32_0 : i32, i32
  }
  func.func @transform_7(%arg0: i32) -> (i32, i32) {
    %c0_i32 = arith.constant 0 : i32
    %c0_i32_0 = arith.constant 0 : i32
    %c0_i32_1 = arith.constant 0 : i32
    return %c0_i32, %c0_i32_0 : i32, i32
  }
  func.func @transform_8(%arg0: i32) -> (i32, i32, i32) {
    %c0_i32 = arith.constant 0 : i32
    %c0_i32_0 = arith.constant 0 : i32
    %c0_i32_1 = arith.constant 0 : i32
    return %c0_i32, %arg0, %c0_i32_0 : i32, i32, i32
  }
  func.func @transform_9(%arg0: i32) -> (i32, i32) {
    %c0_i32 = arith.constant 0 : i32
    %c0_i32_0 = arith.constant 0 : i32
    return %arg0, %c0_i32 : i32, i32
  }
}

</mosaic_0001>

<bundles_post_ra>
// kernel: baseline_forward.3
= control target key start
LH: loop header
LB: loop body
LE: loop exit
PB: predicated region body
PF: predicated region fallthrough
CT: control target
= control target key end

     0   :  { %s2014_s9 = smov 0   ;;  %s2515_s0 = inlined_call_operand.vmem [shape: f32[2,4,232,32], index: 0, kind: input, shape index: {}]   ;;  %s2516_s1 = inlined_call_operand.vmem [shape: f32[32,64], index: 1, kind: input, shape index: {}]   ;;  %s2517_s2 = inlined_call_operand.vmem [shape: f32[2,232,64], index: 2, kind: output, shape index: {}]  }
   0x1 LB: > { %s1546_s10 = sadd.s32 4294967295, %s1997_s9   ;;  %p1550_p0 = scmp.ge.s32.totalorder %s1997_s9, 1  ;;  %s1997_s9 = sphi %s2014_s9, %s12_s9  }
   0x2   : > { %p112_p1 = scmp.lt.s32.totalorder %s1997_s9, 3 }
   0x4   : > { %p113_p2 = pnand %p1550_p0, %p112_p1 }
   0x6   : > { %116 = sbr.rel (%p113_p2) target bundleno = 335 (0x14f), region = 28 }
   0xb   : > { %v263_v0 = vld [vmem:[%s2516_s1 + $0x18] sm:$0xff]  ;;  %v262_v1 = vld [vmem:[%s2516_s1 + $0x10] sm:$0xff]  ;;  %p134_p3 = scmp.lt.s32.totalorder %s1546_s10, 1  ;;  %v261_v2 = vld [vmem:[%s2516_s1 + $0x8] sm:$0xff]  ;;  %vm264_vm0 = vcmask 261120   ;;  %vm1461_vm1 = vcmask 523264  }
   0xc   : > { %1791 = vmatprep.subr.mxu0 %v263_v0  ;;  %1973 = vmatprep.subr.mxu1 %v263_v0  ;;  %v260_v3 = vld [vmem:[%s2516_s1] sm:$0xff] }
   0xd   : > { %1792 = vmatpush3.msra.mxu0 %v263_v0  ;;  %1977 = vmatpush3.msra.mxu1 %v263_v0  ;;  %s2539_s10 = smov (!%p134_p3, %s1546_s10), 1 }
   0xe   : > { %1793 = vmatprep.subr.mxu0 %v262_v1  ;;  %1974 = vmatprep.subr.mxu1 %v262_v1  ;;  %s1981_s19 = smul.u32 928, %s2539_s10 }
   0xf   : > { %1794 = vmatpush3.msra.mxu0 %v262_v1  ;;  %1978 = vmatpush3.msra.mxu1 %v262_v1  ;;  %s1982_s23 = smul.u32 232, %s2539_s10 }
  0x10   : > { %1795 = vmatprep.subr.mxu0 %v261_v2  ;;  %1975 = vmatprep.subr.mxu1 %v261_v2  ;;  %s2040_s22 = scalar_lea.vmem %s2515_s0, %s1981_s19 }
  0x11   : > { %1796 = vmatpush3.msra.mxu0 %v261_v2  ;;  %1979 = vmatpush3.msra.mxu1 %v261_v2  ;;  %v144_v4 = vld [vmem:[%s2040_s22] sm:$0xff]  ;;  %v202_v5 = vld [vmem:[%s2040_s22 + $0x1d0] sm:$0xff]  ;;  %v145_v6 = vld [vmem:[%s2040_s22 + $0x8] sm:$0xff]  ;;  %s2397_s26 = scalar_lea.vmem %s2517_s2, %s1982_s23 }
  0x12   : > { %1797 = vmatprep.subr.mxu0 %v260_v3  ;;  %1976 = vmatprep.subr.mxu1 %v260_v3  ;;  %v203_v7 = vld [vmem:[%s2040_s22 + $0x1d8] sm:$0xff]  ;;  %v146_v8 = vld [vmem:[%s2040_s22 + $0x10] sm:$0xff]  ;;  %v204_v9 = vld [vmem:[%s2040_s22 + $0x1e0] sm:$0xff] }
  0x13   : > { %1798 = vmatpush3.msra.mxu0 %v260_v3  ;;  %1980 = vmatpush3.msra.mxu1 %v260_v3  ;;  %v147_v10 = vld [vmem:[%s2040_s22 + $0x18] sm:$0xff]  ;;  %v205_v11 = vld [vmem:[%s2040_s22 + $0x1e8] sm:$0xff]  ;;  %v148_v12 = vld [vmem:[%s2040_s22 + $0x20] sm:$0xff] }
  0x14   : > { %1799 = vmatprep.mubr.msk.f32.mxu0 %vm264_vm0, %v144_v4  ;;  %1886 = vmatprep.mubr.msk.f32.mxu1 %vm264_vm0, %v202_v5  ;;  %v206_v13 = vld [vmem:[%s2040_s22 + $0x1f0] sm:$0xff]  ;;  %v149_v14 = vld [vmem:[%s2040_s22 + $0x28] sm:$0xff]  ;;  %v207_v15 = vld [vmem:[%s2040_s22 + $0x1f8] sm:$0xff] }
  0x15   : > { %1800 = vmatmul.mubr.msk.f32.vlgmr.msra.gmra.mxu0 %vm264_vm0, %v145_v6  ;;  %1887 = vmatmul.mubr.msk.f32.vlgmr.msra.gmra.mxu1 %vm264_vm0, %v203_v7  ;;  %v150_v16 = vld [vmem:[%s2040_s22 + $0x30] sm:$0xff]  ;;  %v208_v17 = vld [vmem:[%s2040_s22 + $0x200] sm:$0xff]  ;;  %v151_v18 = vld [vmem:[%s2040_s22 + $0x38] sm:$0xff] }
  0x16   : > { %1802 = vmatprep.mubr.msk.f32.mxu0 %vm264_vm0, %v146_v8  ;;  %1889 = vmatprep.mubr.msk.f32.mxu1 %vm264_vm0, %v204_v9  ;;  %v209_v19 = vld [vmem:[%s2040_s22 + $0x208] sm:$0xff]  ;;  %v152_v20 = vld [vmem:[%s2040_s22 + $0x40] sm:$0xff]  ;;  %v210_v21 = vld [vmem:[%s2040_s22 + $0x210] sm:$0xff] }
  0x17   : > { %v153_v22 = vld [vmem:[%s2040_s22 + $0x48] sm:$0xff]  ;;  %v211_v23 = vld [vmem:[%s2040_s22 + $0x218] sm:$0xff]  ;;  %v154_v24 = vld [vmem:[%s2040_s22 + $0x50] sm:$0xff] }
  0x18   : > { %v212_v25 = vld [vmem:[%s2040_s22 + $0x220] sm:$0xff]  ;;  %v155_v26 = vld [vmem:[%s2040_s22 + $0x58] sm:$0xff]  ;;  %v213_v27 = vld [vmem:[%s2040_s22 + $0x228] sm:$0xff] }
  0x19   : > { %1803 = vmatmul.mubr.msk.f32.gmra.mxu0 %vm264_vm0, %v147_v10  ;;  %1890 = vmatmul.mubr.msk.f32.gmra.mxu1 %vm264_vm0, %v205_v11  ;;  %v156_v28 = vld [vmem:[%s2040_s22 + $0x60] sm:$0xff]  ;;  %v214_v29 = vld [vmem:[%s2040_s22 + $0x230] sm:$0xff]  ;;  %v157_v30 = vld [vmem:[%s2040_s22 + $0x68] sm:$0xff] }
  0x1a   : > { %1805 = vmatprep.mubr.msk.f32.mxu0 %vm264_vm0, %v148_v12  ;;  %1892 = vmatprep.mubr.msk.f32.mxu1 %vm264_vm0, %v206_v13  ;;  %v215_v31 = vld [vmem:[%s2040_s22 + $0x238] sm:$0xff]  ;;  %v158_v32 = vld [vmem:[%s2040_s22 + $0x70] sm:$0xff]  ;;  %v216_v33 = vld [vmem:[%s2040_s22 + $0x240] sm:$0xff] }
  0x1b   : > { %v159_v34 = vld [vmem:[%s2040_s22 + $0x78] sm:$0xff]  ;;  %v217_v35 = vld [vmem:[%s2040_s22 + $0x248] sm:$0xff]  ;;  %v160_v36 = vld [vmem:[%s2040_s22 + $0x80] sm:$0xff] }
  0x1c   : > { %v218_v37 = vld [vmem:[%s2040_s22 + $0x250] sm:$0xff]  ;;  %v161_v38 = vld [vmem:[%s2040_s22 + $0x88] sm:$0xff]  ;;  %v219_v39 = vld [vmem:[%s2040_s22 + $0x258] sm:$0xff] }
  0x1d   : > { %1806 = vmatmul.mubr.msk.f32.gmra.mxu0 %vm264_vm0, %v149_v14  ;;  %1893 = vmatmul.mubr.msk.f32.gmra.mxu1 %vm264_vm0, %v207_v15  ;;  %v162_v40 = vld [vmem:[%s2040_s22 + $0x90] sm:$0xff]  ;;  %v220_v41 = vld [vmem:[%s2040_s22 + $0x260] sm:$0xff]  ;;  %v163_v42 = vld [vmem:[%s2040_s22 + $0x98] sm:$0xff] }
  0x1e   : > { %1808 = vmatprep.mubr.msk.f32.mxu0 %vm264_vm0, %v150_v16  ;;  %1895 = vmatprep.mubr.msk.f32.mxu1 %vm264_vm0, %v208_v17  ;;  %v221_v43 = vld [vmem:[%s2040_s22 + $0x268] sm:$0xff]  ;;  %v164_v44 = vld [vmem:[%s2040_s22 + $0xa0] sm:$0xff]  ;;  %v222_v45 = vld [vmem:[%s2040_s22 + $0x270] sm:$0xff] }
  0x1f   : > { %v165_v46 = vld [vmem:[%s2040_s22 + $0xa8] sm:$0xff]  ;;  %v223_v47 = vld [vmem:[%s2040_s22 + $0x278] sm:$0xff]  ;;  %v166_v48 = vld [vmem:[%s2040_s22 + $0xb0] sm:$0xff] }
  0x20   : > { %v224_v49 = vld [vmem:[%s2040_s22 + $0x280] sm:$0xff]  ;;  %v167_v50 = vld [vmem:[%s2040_s22 + $0xb8] sm:$0xff]  ;;  %v225_v51 = vld [vmem:[%s2040_s22 + $0x288] sm:$0xff] }
  0x21   : > { %1809 = vmatmul.mubr.msk.f32.gmra.mxu0 %vm264_vm0, %v151_v18  ;;  %1896 = vmatmul.mubr.msk.f32.gmra.mxu1 %vm264_vm0, %v209_v19  ;;  %v168_v52 = vld [vmem:[%s2040_s22 + $0xc0] sm:$0xff]  ;;  %v226_v53 = vld [vmem:[%s2040_s22 + $0x290] sm:$0xff]  ;;  %v169_v54 = vld [vmem:[%s2040_s22 + $0xc8] sm:$0xff] }
  0x22   : > { %1811 = vmatprep.mubr.msk.f32.mxu0 %vm264_vm0, %v152_v20  ;;  %1898 = vmatprep.mubr.msk.f32.mxu1 %vm264_vm0, %v210_v21  ;;  %v227_v55 = vld [vmem:[%s2040_s22 + $0x298] sm:$0xff]  ;;  %v170_v56 = vld [vmem:[%s2040_s22 + $0xd0] sm:$0xff]  ;;  %v228_v57 = vld [vmem:[%s2040_s22 + $0x2a0] sm:$0xff] }
  0x23   : > { %v171_v58 = vld [vmem:[%s2040_s22 + $0xd8] sm:$0xff]  ;;  %v229_v59 = vld [vmem:[%s2040_s22 + $0x2a8] sm:$0xff]  ;;  %v172_v60 = vld [vmem:[%s2040_s22 + $0xe0] sm:$0xff] }
  0x24   : > { %v230_v61 = vld [vmem:[%s2040_s22 + $0x2b0] sm:$0xff]  ;;  %v173_v62 = vld [vmem:[%s2040_s22 + $0xe8] sm:$0xff]  ;;  %v231_v63 = vld [vmem:[%s2040_s22 + $0x2b8] sm:$0xff] }
  0x25   : > { %1812 = vmatmul.mubr.msk.f32.gmra.mxu0 %vm264_vm0, %v153_v22  ;;  %1899 = vmatmul.mubr.msk.f32.gmra.mxu1 %vm264_vm0, %v211_v23  ;;  %v174_v0 = vld [vmem:[%s2040_s22 + $0xf0] sm:$0xff]  ;;  %v232_v1 = vld [vmem:[%s2040_s22 + $0x2c0] sm:$0xff]  ;;  %v175_v2 = vld [vmem:[%s2040_s22 + $0xf8] sm:$0xff] }
  0x26   : > { %1814 = vmatprep.mubr.msk.f32.mxu0 %vm264_vm0, %v154_v24  ;;  %1901 = vmatprep.mubr.msk.f32.mxu1 %vm264_vm0, %v212_v25  ;;  %v233_v3 = vld [vmem:[%s2040_s22 + $0x2c8] sm:$0xff]  ;;  %v176_v4 = vld [vmem:[%s2040_s22 + $0x100] sm:$0xff]  ;;  %v234_v5 = vld [vmem:[%s2040_s22 + $0x2d0] sm:$0xff] }
  0x27   : > { %v177_v6 = vld [vmem:[%s2040_s22 + $0x108] sm:$0xff]  ;;  %v235_v7 = vld [vmem:[%s2040_s22 + $0x2d8] sm:$0xff]  ;;  %v178_v8 = vld [vmem:[%s2040_s22 + $0x110] sm:$0xff] }
  0x28   : > { %v236_v9 = vld [vmem:[%s2040_s22 + $0x2e0] sm:$0xff]  ;;  %v179_v10 = vld [vmem:[%s2040_s22 + $0x118] sm:$0xff]  ;;  %v237_v11 = vld [vmem:[%s2040_s22 + $0x2e8] sm:$0xff] }
  0x29   : > { %1815 = vmatmul.mubr.msk.f32.gmra.mxu0 %vm264_vm0, %v155_v26  ;;  %1902 = vmatmul.mubr.msk.f32.gmra.mxu1 %vm264_vm0, %v213_v27  ;;  %v180_v12 = vld [vmem:[%s2040_s22 + $0x120] sm:$0xff]  ;;  %v238_v13 = vld [vmem:[%s2040_s22 + $0x2f0] sm:$0xff]  ;;  %v181_v14 = vld [vmem:[%s2040_s22 + $0x128] sm:$0xff] }
  0x2a   : > { %1817 = vmatprep.mubr.msk.f32.mxu0 %vm264_vm0, %v156_v28  ;;  %1904 = vmatprep.mubr.msk.f32.mxu1 %vm264_vm0, %v214_v29  ;;  %v239_v15 = vld [vmem:[%s2040_s22 + $0x2f8] sm:$0xff]  ;;  %v182_v16 = vld [vmem:[%s2040_s22 + $0x130] sm:$0xff]  ;;  %v240_v17 = vld [vmem:[%s2040_s22 + $0x300] sm:$0xff] }
  0x2b   : > { %v183_v18 = vld [vmem:[%s2040_s22 + $0x138] sm:$0xff]  ;;  %v241_v19 = vld [vmem:[%s2040_s22 + $0x308] sm:$0xff]  ;;  %v184_v20 = vld [vmem:[%s2040_s22 + $0x140] sm:$0xff] }
  0x2c   : > { %v242_v21 = vld [vmem:[%s2040_s22 + $0x310] sm:$0xff]  ;;  %v185_v22 = vld [vmem:[%s2040_s22 + $0x148] sm:$0xff]  ;;  %v243_v23 = vld [vmem:[%s2040_s22 + $0x318] sm:$0xff] }
  0x2d   : > { %1818 = vmatmul.mubr.msk.f32.gmra.mxu0 %vm264_vm0, %v157_v30  ;;  %1905 = vmatmul.mubr.msk.f32.gmra.mxu1 %vm264_vm0, %v215_v31  ;;  %v186_v24 = vld [vmem:[%s2040_s22 + $0x150] sm:$0xff]  ;;  %v244_v25 = vld [vmem:[%s2040_s22 + $0x320] sm:$0xff]  ;;  %v187_v26 = vld [vmem:[%s2040_s22 + $0x158] sm:$0xff] }
  0x2e   : > { %1820 = vmatprep.mubr.msk.f32.mxu0 %vm264_vm0, %v158_v32  ;;  %1907 = vmatprep.mubr.msk.f32.mxu1 %vm264_vm0, %v216_v33  ;;  %v245_v27 = vld [vmem:[%s2040_s22 + $0x328] sm:$0xff]  ;;  %v188_v28 = vld [vmem:[%s2040_s22 + $0x160] sm:$0xff]  ;;  %v246_v29 = vld [vmem:[%s2040_s22 + $0x330] sm:$0xff] }
  0x2f   : > { %v189_v30 = vld [vmem:[%s2040_s22 + $0x168] sm:$0xff]  ;;  %v247_v31 = vld [vmem:[%s2040_s22 + $0x338] sm:$0xff]  ;;  %v190_v32 = vld [vmem:[%s2040_s22 + $0x170] sm:$0xff] }
  0x30   : > { %v248_v33 = vld [vmem:[%s2040_s22 + $0x340] sm:$0xff] }
  0x31   : > { %1821 = vmatmul.mubr.msk.f32.gmra.mxu0 %vm264_vm0, %v159_v34  ;;  %1908 = vmatmul.mubr.msk.f32.gmra.mxu1 %vm264_vm0, %v217_v35  ;;  %v191_v34 = vld [vmem:[%s2040_s22 + $0x178] sm:$0xff]  ;;  %v249_v35 = vld [vmem:[%s2040_s22 + $0x348] sm:$0xff] }
  0x32   : > { %1823 = vmatprep.mubr.msk.f32.mxu0 %vm264_vm0, %v160_v36  ;;  %1910 = vmatprep.mubr.msk.f32.mxu1 %vm264_vm0, %v218_v37  ;;  %v192_v36 = vld [vmem:[%s2040_s22 + $0x180] sm:$0xff]  ;;  %v250_v37 = vld [vmem:[%s2040_s22 + $0x350] sm:$0xff] }
  0x35   : > { %1824 = vmatmul.mubr.msk.f32.gmra.mxu0 %vm264_vm0, %v161_v38  ;;  %1911 = vmatmul.mubr.msk.f32.gmra.mxu1 %vm264_vm0, %v219_v39  ;;  %v193_v38 = vld [vmem:[%s2040_s22 + $0x188] sm:$0xff]  ;;  %v251_v39 = vld [vmem:[%s2040_s22 + $0x358] sm:$0xff] }
  0x36   : > { %1826 = vmatprep.mubr.msk.f32.mxu0 %vm264_vm0, %v162_v40  ;;  %1913 = vmatprep.mubr.msk.f32.mxu1 %vm264_vm0, %v220_v41  ;;  %v194_v40 = vld [vmem:[%s2040_s22 + $0x190] sm:$0xff]  ;;  %v252_v41 = vld [vmem:[%s2040_s22 + $0x360] sm:$0xff] }
  0x39   : > { %1827 = vmatmul.mubr.msk.f32.gmra.mxu0 %vm264_vm0, %v163_v42  ;;  %1914 = vmatmul.mubr.msk.f32.gmra.mxu1 %vm264_vm0, %v221_v43  ;;  %v195_v42 = vld [vmem:[%s2040_s22 + $0x198] sm:$0xff]  ;;  %v253_v43 = vld [vmem:[%s2040_s22 + $0x368] sm:$0xff] }
  0x3a   : > { %1829 = vmatprep.mubr.msk.f32.mxu0 %vm264_vm0, %v164_v44  ;;  %1916 = vmatprep.mubr.msk.f32.mxu1 %vm264_vm0, %v222_v45  ;;  %v196_v44 = vld [vmem:[%s2040_s22 + $0x1a0] sm:$0xff]  ;;  %v254_v45 = vld [vmem:[%s2040_s22 + $0x370] sm:$0xff] }
  0x3d   : > { %1830 = vmatmul.mubr.msk.f32.gmra.mxu0 %vm264_vm0, %v165_v46  ;;  %1917 = vmatmul.mubr.msk.f32.gmra.mxu1 %vm264_vm0, %v223_v47  ;;  %v197_v46 = vld [vmem:[%s2040_s22 + $0x1a8] sm:$0xff]  ;;  %v255_v47 = vld [vmem:[%s2040_s22 + $0x378] sm:$0xff] }
  0x3e   : > { %1832 = vmatprep.mubr.msk.f32.mxu0 %vm264_vm0, %v166_v48  ;;  %1919 = vmatprep.mubr.msk.f32.mxu1 %vm264_vm0, %v224_v49  ;;  %v198_v48 = vld [vmem:[%s2040_s22 + $0x1b0] sm:$0xff]  ;;  %v256_v49 = vld [vmem:[%s2040_s22 + $0x380] sm:$0xff] }
  0x41   : > { %1833 = vmatmul.mubr.msk.f32.gmra.mxu0 %vm264_vm0, %v167_v50  ;;  %1920 = vmatmul.mubr.msk.f32.gmra.mxu1 %vm264_vm0, %v225_v51  ;;  %v199_v50 = vld [vmem:[%s2040_s22 + $0x1b8] sm:$0xff]  ;;  %v257_v51 = vld [vmem:[%s2040_s22 + $0x388] sm:$0xff] }
  0x42   : > { %1835 = vmatprep.mubr.msk.f32.mxu0 %vm264_vm0, %v168_v52  ;;  %1922 = vmatprep.mubr.msk.f32.mxu1 %vm264_vm0, %v226_v53  ;;  %v200_v52 = vld [vmem:[%s2040_s22 + $0x1c0] sm:$0xff]  ;;  %v258_v53 = vld [vmem:[%s2040_s22 + $0x390] sm:$0xff] }
  0x45   : > { %1836 = vmatmul.mubr.msk.f32.gmra.mxu0 %vm264_vm0, %v169_v54  ;;  %1923 = vmatmul.mubr.msk.f32.gmra.mxu1 %vm264_vm0, %v227_v55  ;;  %v201_v54 = vld [vmem:[%s2040_s22 + $0x1c8] sm:$0xff]  ;;  %v259_v55 = vld [vmem:[%s2040_s22 + $0x398] sm:$0xff] }
  0x46   : > { %1838 = vmatprep.mubr.msk.f32.mxu0 %vm264_vm0, %v170_v56  ;;  %1925 = vmatprep.mubr.msk.f32.mxu1 %vm264_vm0, %v228_v57 }
  0x49   : > { %1839 = vmatmul.mubr.msk.f32.gmra.mxu0 %vm264_vm0, %v171_v58  ;;  %1926 = vmatmul.mubr.msk.f32.gmra.mxu1 %vm264_vm0, %v229_v59 }
  0x4a   : > { %1841 = vmatprep.mubr.msk.f32.mxu0 %vm264_vm0, %v172_v60  ;;  %1928 = vmatprep.mubr.msk.f32.mxu1 %vm264_vm0, %v230_v61 }
  0x4d   : > { %1842 = vmatmul.mubr.msk.f32.gmra.mxu0 %vm264_vm0, %v173_v62  ;;  %1929 = vmatmul.mubr.msk.f32.gmra.mxu1 %vm264_vm0, %v231_v63 }
  0x4e   : > { %1844 = vmatprep.mubr.msk.f32.mxu0 %vm264_vm0, %v174_v0  ;;  %1931 = vmatprep.mubr.msk.f32.mxu1 %vm264_vm0, %v232_v1 }
  0x51   : > { %1845 = vmatmul.mubr.msk.f32.gmra.mxu0 %vm264_vm0, %v175_v2  ;;  %1932 = vmatmul.mubr.msk.f32.gmra.mxu1 %vm264_vm0, %v233_v3 }
  0x52   : > { %1847 = vmatprep.mubr.msk.f32.mxu0 %vm264_vm0, %v176_v4  ;;  %1934 = vmatprep.mubr.msk.f32.mxu1 %vm264_vm0, %v234_v5 }
  0x55   : > { %1848 = vmatmul.mubr.msk.f32.gmra.mxu0 %vm264_vm0, %v177_v6  ;;  %1935 = vmatmul.mubr.msk.f32.gmra.mxu1 %vm264_vm0, %v235_v7 }
  0x56   : > { %1850 = vmatprep.mubr.msk.f32.mxu0 %vm264_vm0, %v178_v8  ;;  %1937 = vmatprep.mubr.msk.f32.mxu1 %vm264_vm0, %v236_v9 }
  0x59   : > { %1851 = vmatmul.mubr.msk.f32.gmra.mxu0 %vm264_vm0, %v179_v10  ;;  %1938 = vmatmul.mubr.msk.f32.gmra.mxu1 %vm264_vm0, %v237_v11 }
  0x5a   : > { %1853 = vmatprep.mubr.msk.f32.mxu0 %vm264_vm0, %v180_v12  ;;  %1940 = vmatprep.mubr.msk.f32.mxu1 %vm264_vm0, %v238_v13 }
  0x5d   : > { %1854 = vmatmul.mubr.msk.f32.gmra.mxu0 %vm264_vm0, %v181_v14  ;;  %1941 = vmatmul.mubr.msk.f32.gmra.mxu1 %vm264_vm0, %v239_v15 }
  0x5e   : > { %1856 = vmatprep.mubr.msk.f32.mxu0 %vm264_vm0, %v182_v16  ;;  %1943 = vmatprep.mubr.msk.f32.mxu1 %vm264_vm0, %v240_v17 }
  0x61   : > { %1857 = vmatmul.mubr.msk.f32.gmra.mxu0 %vm264_vm0, %v183_v18  ;;  %1944 = vmatmul.mubr.msk.f32.gmra.mxu1 %vm264_vm0, %v241_v19 }
  0x62   : > { %1859 = vmatprep.mubr.msk.f32.mxu0 %vm264_vm0, %v184_v20  ;;  %1946 = vmatprep.mubr.msk.f32.mxu1 %vm264_vm0, %v242_v21 }
  0x65   : > { %1860 = vmatmul.mubr.msk.f32.gmra.mxu0 %vm264_vm0, %v185_v22  ;;  %1947 = vmatmul.mubr.msk.f32.gmra.mxu1 %vm264_vm0, %v243_v23 }
  0x66   : > { %1862 = vmatprep.mubr.msk.f32.mxu0 %vm264_vm0, %v186_v24  ;;  %1949 = vmatprep.mubr.msk.f32.mxu1 %vm264_vm0, %v244_v25 }
  0x69   : > { %1863 = vmatmul.mubr.msk.f32.gmra.mxu0 %vm264_vm0, %v187_v26  ;;  %1950 = vmatmul.mubr.msk.f32.gmra.mxu1 %vm264_vm0, %v245_v27 }
  0x6a   : > { %1865 = vmatprep.mubr.msk.f32.mxu0 %vm264_vm0, %v188_v28  ;;  %1952 = vmatprep.mubr.msk.f32.mxu1 %vm264_vm0, %v246_v29 }
  0x6d   : > { %1866 = vmatmul.mubr.msk.f32.gmra.mxu0 %vm264_vm0, %v189_v30  ;;  %1953 = vmatmul.mubr.msk.f32.gmra.mxu1 %vm264_vm0, %v247_v31 }
  0x6e   : > { %1868 = vmatprep.mubr.msk.f32.mxu0 %vm264_vm0, %v190_v32  ;;  %1955 = vmatprep.mubr.msk.f32.mxu1 %vm264_vm0, %v248_v33 }
  0x71   : > { %1869 = vmatmul.mubr.msk.f32.gmra.mxu0 %vm264_vm0, %v191_v34  ;;  %1956 = vmatmul.mubr.msk.f32.gmra.mxu1 %vm264_vm0, %v249_v35 }
  0x72   : > { %1871 = vmatprep.mubr.msk.f32.mxu0 %vm264_vm0, %v192_v36  ;;  %1958 = vmatprep.mubr.msk.f32.mxu1 %vm264_vm0, %v250_v37 }
  0x75   : > { %1872 = vmatmul.mubr.msk.f32.gmra.mxu0 %vm264_vm0, %v193_v38  ;;  %1959 = vmatmul.mubr.msk.f32.gmra.mxu1 %vm264_vm0, %v251_v39 }
  0x76   : > { %1874 = vmatprep.mubr.msk.f32.mxu0 %vm264_vm0, %v194_v40  ;;  %1961 = vmatprep.mubr.msk.f32.mxu1 %vm264_vm0, %v252_v41 }
  0x79   : > { %1875 = vmatmul.mubr.msk.f32.gmra.mxu0 %vm264_vm0, %v195_v42  ;;  %1962 = vmatmul.mubr.msk.f32.gmra.mxu1 %vm264_vm0, %v253_v43 }
  0x7a   : > { %1877 = vmatprep.mubr.msk.f32.mxu0 %vm264_vm0, %v196_v44  ;;  %1964 = vmatprep.mubr.msk.f32.mxu1 %vm264_vm0, %v254_v45 }
  0x7d   : > { %1878 = vmatmul.mubr.msk.f32.gmra.mxu0 %vm264_vm0, %v197_v46  ;;  %1965 = vmatmul.mubr.msk.f32.gmra.mxu1 %vm264_vm0, %v255_v47 }
  0x7e   : > { %1880 = vmatprep.mubr.msk.f32.mxu0 %vm264_vm0, %v198_v48  ;;  %1967 = vmatprep.mubr.msk.f32.mxu1 %vm264_vm0, %v256_v49 }
  0x81   : > { %1881 = vmatmul.mubr.msk.f32.gmra.mxu0 %vm264_vm0, %v199_v50  ;;  %1968 = vmatmul.mubr.msk.f32.gmra.mxu1 %vm264_vm0, %v257_v51 }
  0x82   : > { %1883 = vmatprep.mubr.msk.f32.mxu0 %vm264_vm0, %v200_v52  ;;  %1970 = vmatprep.mubr.msk.f32.mxu1 %vm264_vm0, %v258_v53 }
  0x85   : > { %1884 = vmatmul.mubr.msk.f32.gmra.mxu0 %vm264_vm0, %v201_v54  ;;  %1971 = vmatmul.mubr.msk.f32.gmra.mxu1 %vm264_vm0, %v259_v55 }
  0xd5   : > { %v2274_v56 = vpop.f32.mrf.mxu0  ;;  %v2276_v57 = vpop.f32.mrf.mxu1 }
  0xd7   : > { %v2278_v58 = vpop.f32.mrf.mxu0  ;;  %v2280_v59 = vpop.f32.mrf.mxu1 }
  0xd8   : > { %v1258_v50 = vmax.f32 %v2278_v58, 0.0  ;;  %v1316_v51 = vmax.f32 %v2280_v59, 0.0 }
  0xd9   : > { %v2282_v60 = vpop.f32.mrf.mxu0  ;;  %v2284_v61 = vpop.f32.mrf.mxu1 }
  0xdb   : > { %v2286_v62 = vpop.f32.mrf.mxu0  ;;  %v2288_v63 = vpop.f32.mrf.mxu1 }
  0xdc   : > { %v1318_v59 = vmax.f32 %v2288_v63, 0.0 }
  0xdd   : > { %v2290_v0 = vpop.f32.mrf.mxu0  ;;  %v2292_v1 = vpop.f32.mrf.mxu1 }
  0xdf   : > { %v2294_v2 = vpop.f32.mrf.mxu0  ;;  %v2296_v3 = vpop.f32.mrf.mxu1 }
  0xe1   : > { %v2298_v4 = vpop.f32.mrf.mxu0  ;;  %v2300_v5 = vpop.f32.mrf.mxu1 }
  0xe3   : > { %v2302_v6 = vpop.f32.mrf.mxu0  ;;  %v2304_v7 = vpop.f32.mrf.mxu1 }
  0xe5   : > { %v2306_v8 = vpop.f32.mrf.mxu0  ;;  %v2308_v9 = vpop.f32.mrf.mxu1 }
  0xe7   : > { %v2310_v10 = vpop.f32.mrf.mxu0  ;;  %v2312_v11 = vpop.f32.mrf.mxu1 }
  0xe9   : > { %v2314_v12 = vpop.f32.mrf.mxu0  ;;  %v2316_v13 = vpop.f32.mrf.mxu1 }
  0xeb   : > { %v2318_v14 = vpop.f32.mrf.mxu0  ;;  %v2320_v15 = vpop.f32.mrf.mxu1 }
  0xed   : > { %v2322_v16 = vpop.f32.mrf.mxu0  ;;  %v2324_v17 = vpop.f32.mrf.mxu1 }
  0xef   : > { %v2326_v18 = vpop.f32.mrf.mxu0  ;;  %v2328_v19 = vpop.f32.mrf.mxu1 }
  0xf1   : > { %v2330_v20 = vpop.f32.mrf.mxu0  ;;  %v2332_v21 = vpop.f32.mrf.mxu1 }
  0xf3   : > { %v2334_v22 = vpop.f32.mrf.mxu0  ;;  %v2336_v23 = vpop.f32.mrf.mxu1 }
  0xf5   : > { %v2338_v24 = vpop.f32.mrf.mxu0  ;;  %v2340_v25 = vpop.f32.mrf.mxu1 }
  0xf7   : > { %v2342_v26 = vpop.f32.mrf.mxu0  ;;  %v2344_v27 = vpop.f32.mrf.mxu1 }
  0xf9   : > { %v2346_v28 = vpop.f32.mrf.mxu0  ;;  %v2348_v29 = vpop.f32.mrf.mxu1 }
  0xfb   : > { %v2350_v30 = vpop.f32.mrf.mxu0  ;;  %v2352_v31 = vpop.f32.mrf.mxu1 }
  0xfd   : > { %v2354_v32 = vpop.f32.mrf.mxu0  ;;  %v2356_v33 = vpop.f32.mrf.mxu1 }
  0xff   : > { %v2358_v34 = vpop.f32.mrf.mxu0  ;;  %v2360_v35 = vpop.f32.mrf.mxu1 }
 0x101   : > { %v2362_v36 = vpop.f32.mrf.mxu0  ;;  %v2364_v37 = vpop.f32.mrf.mxu1 }
 0x102   : > { %2518 = vst [vmem:[#allocation2_spill] sm:$0xff] %v2362_v36  ;;  %2519 = vst [vmem:[#allocation3_spill] sm:$0xff] %v2364_v37  ;;  %v1262_v37 = vmax.f32 %v2294_v2, 0.0 }
 0x103   : > { %v2366_v38 = vpop.f32.mrf.mxu0  ;;  %v2368_v39 = vpop.f32.mrf.mxu1 }
 0x105   : > { %v2370_v40 = vpop.f32.mrf.mxu0  ;;  %v2372_v41 = vpop.f32.mrf.mxu1 }
 0x106   : > { %2520 = vst [vmem:[#allocation4_spill] sm:$0xff] %v2370_v40  ;;  %2521 = vst [vmem:[#allocation5_spill] sm:$0xff] %v2372_v41 }
 0x107   : > { %v2374_v42 = vpop.f32.mrf.mxu0  ;;  %v2376_v43 = vpop.f32.mrf.mxu1 }
 0x109   : > { %v2378_v44 = vpop.f32.mrf.mxu0  ;;  %v2380_v45 = vpop.f32.mrf.mxu1 }
 0x10a   : > { %2522 = vst [vmem:[#allocation6_spill] sm:$0xff] %v2378_v44  ;;  %2523 = vst [vmem:[#allocation7_spill] sm:$0xff] %v2380_v45  ;;  %v1260_v45 = vmax.f32 %v2286_v62, 0.0 }
 0x10b   : > { %v2382_v46 = vpop.f32.mrf.mxu0  ;;  %v2384_v47 = vpop.f32.mrf.mxu1 }
 0x10c   : > { %2524 = vst [vmem:[#allocation8_spill] sm:$0xff] %v2382_v46  ;;  %2525 = vst [vmem:[#allocation9_spill] sm:$0xff] %v2384_v47 }
 0x10d   : > { %v1843_v48 = vpop.f32.mrf.mxu0  ;;  %v1930_v49 = vpop.f32.mrf.mxu1 }
 0x10e   : > { %v1287_v52 = vmax.f32 %v1843_v48, 0.0  ;;  %v1345_v53 = vmax.f32 %v1930_v49, 0.0 }
 0x10f   : > { %v2389_v54 = vpop.f32.mrf.mxu0  ;;  %v2391_v55 = vpop.f32.mrf.mxu1 }
 0x110   : > { %2526 = vst [vmem:[#allocation10_spill] sm:$0xff] %v2389_v54  ;;  %2527 = vst [vmem:[#allocation11_spill] sm:$0xff] %v2391_v55  ;;  %v1374_v44 = vmax.f32 %v1258_v50, %v1287_v52  ;;  %v1403_v41 = vmax.f32 %v1316_v51, %v1345_v53  ;;  %v1259_v55 = vmax.f32 %v2274_v56, 0.0  ;;  %v1317_v50 = vmax.f32 %v2276_v57, 0.0 }
 0x111   : > { %v1846_v58 = vpop.f32.mrf.mxu0  ;;  %v1933_v40 = vpop.f32.mrf.mxu1  ;;  %v1261_v56 = vmax.f32 %v2282_v60, 0.0  ;;  %v1319_v57 = vmax.f32 %v2284_v61, 0.0 }
 0x112   : > { %v1432_v48 = vmax.f32 %v1374_v44, %v1403_v41  ;;  %v1289_v49 = vmax.f32 %v1846_v58, 0.0  ;;  %v1347_v54 = vmax.f32 %v1933_v40, 0.0 }
 0x113   : > { %v829_v51 = vpop.f32.mrf.mxu0  ;;  %v1119_v62 = vpop.f32.mrf.mxu1 }
 0x114   : > { %1462 = vst.msk [vmem:[%s2397_s26] sm:$0xff] %vm1461_vm1, %v1432_v48  ;;  %v1376_v52 = vmax.f32 %v1260_v45, %v1289_v49  ;;  %v1405_v53 = vmax.f32 %v1318_v59, %v1347_v54  ;;  %v1288_v47 = vmax.f32 %v829_v51, 0.0  ;;  %v1346_v46 = vmax.f32 %v1119_v62, 0.0 }
 0x115   : > { %v1849_v36 = vpop.f32.mrf.mxu0  ;;  %v1936_v63 = vpop.f32.mrf.mxu1  ;;  %v1320_v48 = vmax.f32 %v2296_v3, 0.0 }
 0x116   : > { %v1434_v41 = vmax.f32 %v1376_v52, %v1405_v53  ;;  %v1375_v44 = vmax.f32 %v1259_v55, %v1288_v47  ;;  %v1404_v40 = vmax.f32 %v1317_v50, %v1346_v46  ;;  %v1291_v58 = vmax.f32 %v1849_v36, 0.0 }
 0x117   : > { %v1349_v45 = vmax.f32 %v1936_v63, 0.0  ;;  %v839_v54 = vpop.f32.mrf.mxu0  ;;  %v1129_v59 = vpop.f32.mrf.mxu1  ;;  %v1264_v47 = vmax.f32 %v2302_v6, 0.0  ;;  %v1322_v36 = vmax.f32 %v2304_v7, 0.0  ;;  %v1263_v53 = vmax.f32 %v2290_v0, 0.0 }
 0x118   : > { %1464 = vst.msk [vmem:[%s2397_s26 + $0x10] sm:$0xff] %vm1461_vm1, %v1434_v41  ;;  %v1433_v49 = vmax.f32 %v1375_v44, %v1404_v40  ;;  %v1378_v2 = vmax.f32 %v1262_v37, %v1291_v58  ;;  %v1290_v51 = vmax.f32 %v839_v54, 0.0  ;;  %v1348_v62 = vmax.f32 %v1129_v59, 0.0 }
 0x119   : > { %v1407_v46 = vmax.f32 %v1320_v48, %v1349_v45  ;;  %v1852_v60 = vpop.f32.mrf.mxu0  ;;  %v1939_v55 = vpop.f32.mrf.mxu1  ;;  %v1321_v58 = vmax.f32 %v2292_v1, 0.0  ;;  %v1266_v48 = vmax.f32 %v2310_v10, 0.0  ;;  %v1323_v1 = vmax.f32 %v2300_v5, 0.0 }
 0x11a   : > { %1463 = vst.msk [vmem:[%s2397_s26 + $0x8] sm:$0xff] %vm1461_vm1, %v1433_v49  ;;  %v1377_v61 = vmax.f32 %v1261_v56, %v1290_v51  ;;  %v1406_v3 = vmax.f32 %v1319_v57, %v1348_v62  ;;  %v1293_v50 = vmax.f32 %v1852_v60, 0.0  ;;  %v1351_v52 = vmax.f32 %v1939_v55, 0.0 }
 0x11b   : > { %v1436_v37 = vmax.f32 %v1378_v2, %v1407_v46  ;;  %v849_v63 = vpop.f32.mrf.mxu0  ;;  %v1139_v41 = vpop.f32.mrf.mxu1  ;;  %v1324_v56 = vmax.f32 %v2312_v11, 0.0  ;;  %v1265_v51 = vmax.f32 %v2298_v4, 0.0  ;;  %v1268_v55 = vmax.f32 %v2318_v14, 0.0 }
 0x11c   : > { %v1435_v44 = vmax.f32 %v1377_v61, %v1406_v3  ;;  %v1380_v6 = vmax.f32 %v1264_v47, %v1293_v50  ;;  %v1409_v40 = vmax.f32 %v1322_v36, %v1351_v52  ;;  %v1292_v7 = vmax.f32 %v849_v63, 0.0 }
 0x11d   : > { %1466 = vst.msk [vmem:[%s2397_s26 + $0x20] sm:$0xff] %vm1461_vm1, %v1436_v37  ;;  %v1350_v57 = vmax.f32 %v1139_v41, 0.0  ;;  %v1855_v45 = vpop.f32.mrf.mxu0  ;;  %v1942_v54 = vpop.f32.mrf.mxu1  ;;  %v1267_v37 = vmax.f32 %v2306_v8, 0.0  ;;  %v1325_v63 = vmax.f32 %v2308_v9, 0.0  ;;  %v1326_v41 = vmax.f32 %v2320_v15, 0.0 }
 0x11e   : > { %1465 = vst.msk [vmem:[%s2397_s26 + $0x18] sm:$0xff] %vm1461_vm1, %v1435_v44  ;;  %v1438_v0 = vmax.f32 %v1380_v6, %v1409_v40  ;;  %v1379_v59 = vmax.f32 %v1263_v53, %v1292_v7  ;;  %v1295_v49 = vmax.f32 %v1855_v45, 0.0  ;;  %v1353_v2 = vmax.f32 %v1942_v54, 0.0 }
 0x11f   : > { %v1408_v62 = vmax.f32 %v1321_v58, %v1350_v57  ;;  %v859_v10 = vpop.f32.mrf.mxu0  ;;  %v1149_v47 = vpop.f32.mrf.mxu1  ;;  %v1328_v8 = vmax.f32 %v2328_v19, 0.0 }
 0x120   : > { %1468 = vst.msk [vmem:[%s2397_s26 + $0x30] sm:$0xff] %vm1461_vm1, %v1438_v0  ;;  %v1382_v11 = vmax.f32 %v1266_v48, %v1295_v49  ;;  %v1411_v36 = vmax.f32 %v1324_v56, %v1353_v2  ;;  %v1294_v46 = vmax.f32 %v859_v10, 0.0  ;;  %v1352_v60 = vmax.f32 %v1149_v47, 0.0 }
 0x121   : > { %v1437_v61 = vmax.f32 %v1379_v59, %v1408_v62  ;;  %v1858_v3 = vpop.f32.mrf.mxu0  ;;  %v1945_v50 = vpop.f32.mrf.mxu1  ;;  %v1270_v56 = vmax.f32 %v2326_v18, 0.0  ;;  %v1269_v49 = vmax.f32 %v2314_v12, 0.0  ;;  %v1327_v47 = vmax.f32 %v2316_v13, 0.0 }
 0x122   : > { %v1440_v52 = vmax.f32 %v1382_v11, %v1411_v36  ;;  %v1381_v4 = vmax.f32 %v1265_v51, %v1294_v46  ;;  %v1410_v53 = vmax.f32 %v1323_v1, %v1352_v60  ;;  %v1297_v5 = vmax.f32 %v1858_v3, 0.0 }
 0x123   : > { %1467 = vst.msk [vmem:[%s2397_s26 + $0x28] sm:$0xff] %vm1461_vm1, %v1437_v61  ;;  %v1355_v44 = vmax.f32 %v1945_v50, 0.0  ;;  %v869_v6 = vpop.f32.mrf.mxu0  ;;  %v1159_v40 = vpop.f32.mrf.mxu1  ;;  %v1272_v11 = vmax.f32 %v2334_v22, 0.0  ;;  %v1330_v36 = vmax.f32 %v2336_v23, 0.0  ;;  %v1329_v13 = vmax.f32 %v2324_v17, 0.0 }
 0x124   : > { %1470 = vst.msk [vmem:[%s2397_s26 + $0x40] sm:$0xff] %vm1461_vm1, %v1440_v52  ;;  %v1439_v14 = vmax.f32 %v1381_v4, %v1410_v53  ;;  %v1384_v7 = vmax.f32 %v1268_v55, %v1297_v5  ;;  %v1296_v58 = vmax.f32 %v869_v6, 0.0  ;;  %v1354_v48 = vmax.f32 %v1159_v40, 0.0 }
 0x125   : > { %v1413_v57 = vmax.f32 %v1326_v41, %v1355_v44  ;;  %v1861_v9 = vpop.f32.mrf.mxu0  ;;  %v1948_v45 = vpop.f32.mrf.mxu1  ;;  %v1271_v52 = vmax.f32 %v2322_v16, 0.0  ;;  %v1274_v41 = vmax.f32 %v2342_v26, 0.0 }
 0x126   : > { %1469 = vst.msk [vmem:[%s2397_s26 + $0x38] sm:$0xff] %vm1461_vm1, %v1439_v14  ;;  %v1383_v15 = vmax.f32 %v1267_v37, %v1296_v58  ;;  %v1412_v54 = vmax.f32 %v1325_v63, %v1354_v48  ;;  %v1299_v0 = vmax.f32 %v1861_v9, 0.0  ;;  %v1357_v59 = vmax.f32 %v1948_v45, 0.0 }
 0x127   : > { %v1442_v2 = vmax.f32 %v1384_v7, %v1413_v57  ;;  %v879_v51 = vpop.f32.mrf.mxu0  ;;  %v1169_v1 = vpop.f32.mrf.mxu1  ;;  %v1273_v58 = vmax.f32 %v2330_v20, 0.0  ;;  %v1331_v48 = vmax.f32 %v2332_v21, 0.0  ;;  %v1334_v20 = vmax.f32 %v2352_v31, 0.0 }
 0x128   : > { %v1441_v62 = vmax.f32 %v1383_v15, %v1412_v54  ;;  %v1386_v18 = vmax.f32 %v1270_v56, %v1299_v0  ;;  %v1415_v10 = vmax.f32 %v1328_v8, %v1357_v59  ;;  %v1298_v19 = vmax.f32 %v879_v51, 0.0 }
 0x129   : > { %1472 = vst.msk [vmem:[%s2397_s26 + $0x50] sm:$0xff] %vm1461_vm1, %v1442_v2  ;;  %v1356_v46 = vmax.f32 %v1169_v1, 0.0  ;;  %v1864_v60 = vpop.f32.mrf.mxu0  ;;  %v1951_v55 = vpop.f32.mrf.mxu1  ;;  %v1332_v56 = vmax.f32 %v2344_v27, 0.0  ;;  %v1276_v0 = vmax.f32 %v2350_v30, 0.0 }
 0x12a   : > { %1471 = vst.msk [vmem:[%s2397_s26 + $0x48] sm:$0xff] %vm1461_vm1, %v1441_v62  ;;  %v1444_v12 = vmax.f32 %v1386_v18, %v1415_v10  ;;  %v1385_v61 = vmax.f32 %v1269_v49, %v1298_v19  ;;  %v1301_v3 = vmax.f32 %v1864_v60, 0.0  ;;  %v1359_v50 = vmax.f32 %v1951_v55, 0.0 }
 0x12b   : > { %v1414_v4 = vmax.f32 %v1327_v47, %v1356_v46  ;;  %v889_v22 = vpop.f32.mrf.mxu0  ;;  %v1179_v53 = vpop.f32.mrf.mxu1  ;;  %v1275_v62 = vmax.f32 %v2338_v24, 0.0  ;;  %v1278_v46 = vmax.f32 %v2358_v34, 0.0  ;;  %v1336_v60 = vmax.f32 %v2360_v35, 0.0 }
 0x12c   : > { %1474 = vst.msk [vmem:[%s2397_s26 + $0x60] sm:$0xff] %vm1461_vm1, %v1444_v12  ;;  %v1388_v23 = vmax.f32 %v1272_v11, %v1301_v3  ;;  %v1417_v5 = vmax.f32 %v1330_v36, %v1359_v50  ;;  %v1300_v37 = vmax.f32 %v889_v22, 0.0  ;;  %v1358_v63 = vmax.f32 %v1179_v53, 0.0 }
 0x12d   : > { %v1443_v44 = vmax.f32 %v1385_v61, %v1414_v4  ;;  %v1867_v6 = vpop.f32.mrf.mxu0  ;;  %v1954_v40 = vpop.f32.mrf.mxu1  ;;  %v1333_v36 = vmax.f32 %v2340_v25, 0.0  ;;  %v1335_v25 = vmax.f32 %v2348_v29, 0.0 }
 0x12e   : > { %v1446_v14 = vmax.f32 %v1388_v23, %v1417_v5  ;;  %v1387_v16 = vmax.f32 %v1271_v52, %v1300_v37  ;;  %v1416_v7 = vmax.f32 %v1329_v13, %v1358_v63  ;;  %v1303_v17 = vmax.f32 %v1867_v6, 0.0 }
 0x12f   : > { %1473 = vst.msk [vmem:[%s2397_s26 + $0x58] sm:$0xff] %vm1461_vm1, %v1443_v44  ;;  %v1361_v8 = vmax.f32 %v1954_v40, 0.0  ;;  %v899_v57 = vpop.f32.mrf.mxu0  ;;  %v1189_v9 = vpop.f32.mrf.mxu1  ;;  %v1277_v13 = vmax.f32 %v2346_v28, 0.0  ;;  %v1280_v37 = vmax.f32 %v2366_v38, 0.0 }
 0x130   : > { %1476 = vst.msk [vmem:[%s2397_s26 + $0x70] sm:$0xff] %vm1461_vm1, %v1446_v14  ;;  %v1445_v26 = vmax.f32 %v1387_v16, %v1416_v7  ;;  %v1390_v45 = vmax.f32 %v1274_v41, %v1303_v17  ;;  %v1302_v15 = vmax.f32 %v899_v57, 0.0  ;;  %v1360_v54 = vmax.f32 %v1189_v9, 0.0 }
 0x131   : > { %v1419_v59 = vmax.f32 %v1332_v56, %v1361_v8  ;;  %v1870_v21 = vpop.f32.mrf.mxu0  ;;  %v1957_v49 = vpop.f32.mrf.mxu1  ;;  %v1279_v14 = vmax.f32 %v2354_v32, 0.0  ;;  %v1337_v16 = vmax.f32 %v2356_v33, 0.0  ;;  %v1338_v7 = vmax.f32 %v2368_v39, 0.0 }
 0x132   : > { %1475 = vst.msk [vmem:[%s2397_s26 + $0x68] sm:$0xff] %vm1461_vm1, %v1445_v26  ;;  %v1389_v27 = vmax.f32 %v1273_v58, %v1302_v15  ;;  %v1418_v2 = vmax.f32 %v1331_v48, %v1360_v54  ;;  %v1305_v51 = vmax.f32 %v1870_v21, 0.0  ;;  %v1363_v1 = vmax.f32 %v1957_v49, 0.0 }
 0x133   : > { %v1448_v18 = vmax.f32 %v1390_v45, %v1419_v59  ;;  %v909_v10 = vpop.f32.mrf.mxu0  ;;  %v1199_v19 = vpop.f32.mrf.mxu1  ;;  %v1282_v9 = vmax.f32 %v2374_v42, 0.0  ;;  %v1340_v32 = vmax.f32 %v2376_v43, 0.0 }
 0x134   : > { %v1447_v47 = vmax.f32 %v1389_v27, %v1418_v2  ;;  %v1392_v30 = vmax.f32 %v1276_v0, %v1305_v51  ;;  %v1421_v11 = vmax.f32 %v1334_v20, %v1363_v1  ;;  %v1304_v31 = vmax.f32 %v909_v10, 0.0  ;;  %v2528_v20 = vld [vmem:[#allocation2_spill] sm:$0xff]  ;;  %v2529_v1 = vld [vmem:[#allocation3_spill] sm:$0xff] }
 0x135   : > { %1478 = vst.msk [vmem:[%s2397_s26 + $0x80] sm:$0xff] %vm1461_vm1, %v1448_v18  ;;  %v1362_v55 = vmax.f32 %v1199_v19, 0.0  ;;  %v1873_v12 = vpop.f32.mrf.mxu0  ;;  %v1960_v61 = vpop.f32.mrf.mxu1  ;;  %v1281_v59 = vmax.f32 %v2528_v20, 0.0  ;;  %v2530_v18 = vld [vmem:[#allocation8_spill] sm:$0xff]  ;;  %v2531_v19 = vld [vmem:[#allocation9_spill] sm:$0xff] }
 0x136   : > { %1477 = vst.msk [vmem:[%s2397_s26 + $0x78] sm:$0xff] %vm1461_vm1, %v1447_v47  ;;  %v1450_v24 = vmax.f32 %v1392_v30, %v1421_v11  ;;  %v1391_v3 = vmax.f32 %v1275_v62, %v1304_v31  ;;  %v1307_v50 = vmax.f32 %v1873_v12, 0.0  ;;  %v1365_v52 = vmax.f32 %v1960_v61, 0.0  ;;  %v2532_v12 = vld [vmem:[#allocation4_spill] sm:$0xff] }
 0x137   : > { %v1420_v4 = vmax.f32 %v1333_v36, %v1362_v55  ;;  %v919_v34 = vpop.f32.mrf.mxu0  ;;  %v1209_v22 = vpop.f32.mrf.mxu1  ;;  %v1339_v62 = vmax.f32 %v2529_v1, 0.0  ;;  %v1284_v10 = vmax.f32 %v2530_v18, 0.0  ;;  %v1342_v47 = vmax.f32 %v2531_v19, 0.0 }
 0x138   : > { %1480 = vst.msk [vmem:[%s2397_s26 + $0x90] sm:$0xff] %vm1461_vm1, %v1450_v24  ;;  %v1394_v35 = vmax.f32 %v1278_v46, %v1307_v50  ;;  %v1423_v53 = vmax.f32 %v1336_v60, %v1365_v52  ;;  %v1306_v23 = vmax.f32 %v919_v34, 0.0  ;;  %v1364_v5 = vmax.f32 %v1209_v22, 0.0  ;;  %v2533_v24 = vld [vmem:[#allocation5_spill] sm:$0xff] }
 0x139   : > { %v1449_v63 = vmax.f32 %v1391_v3, %v1420_v4  ;;  %v1876_v41 = vpop.f32.mrf.mxu0  ;;  %v1963_v44 = vpop.f32.mrf.mxu1  ;;  %v1283_v61 = vmax.f32 %v2532_v12, 0.0  ;;  %v1341_v3 = vmax.f32 %v2533_v24, 0.0 }
 0x13a   : > { %v1452_v6 = vmax.f32 %v1394_v35, %v1423_v53  ;;  %v1393_v28 = vmax.f32 %v1277_v13, %v1306_v23  ;;  %v1422_v40 = vmax.f32 %v1335_v25, %v1364_v5  ;;  %v1309_v29 = vmax.f32 %v1876_v41, 0.0  ;;  %v2534_v35 = vld [vmem:[#allocation10_spill] sm:$0xff] }
 0x13b   : > { %1479 = vst.msk [vmem:[%s2397_s26 + $0x88] sm:$0xff] %vm1461_vm1, %v1449_v63  ;;  %v1367_v17 = vmax.f32 %v1963_v44, 0.0  ;;  %v929_v58 = vpop.f32.mrf.mxu0  ;;  %v1219_v48 = vpop.f32.mrf.mxu1  ;;  %v1286_v53 = vmax.f32 %v2534_v35, 0.0 }
 0x13c   : > { %1482 = vst.msk [vmem:[%s2397_s26 + $0xa0] sm:$0xff] %vm1461_vm1, %v1452_v6  ;;  %v1451_v38 = vmax.f32 %v1393_v28, %v1422_v40  ;;  %v1396_v56 = vmax.f32 %v1280_v37, %v1309_v29  ;;  %v1308_v8 = vmax.f32 %v929_v58, 0.0  ;;  %v1366_v57 = vmax.f32 %v1219_v48, 0.0  ;;  %v2535_v28 = vld [vmem:[#allocation6_spill] sm:$0xff]  ;;  %v2536_v29 = vld [vmem:[#allocation7_spill] sm:$0xff] }
 0x13d   : > { %v1425_v26 = vmax.f32 %v1338_v7, %v1367_v17  ;;  %v1879_v33 = vpop.f32.mrf.mxu0  ;;  %v1966_v45 = vpop.f32.mrf.mxu1  ;;  %v1285_v40 = vmax.f32 %v2535_v28, 0.0 }
 0x13e   : > { %1481 = vst.msk [vmem:[%s2397_s26 + $0x98] sm:$0xff] %vm1461_vm1, %v1451_v38  ;;  %v1395_v39 = vmax.f32 %v1279_v14, %v1308_v8  ;;  %v1424_v15 = vmax.f32 %v1337_v16, %v1366_v57  ;;  %v1311_v54 = vmax.f32 %v1879_v33, 0.0  ;;  %v1369_v0 = vmax.f32 %v1966_v45, 0.0  ;;  %v2537_v16 = vld [vmem:[#allocation11_spill] sm:$0xff] }
 0x13f   : > { %v1454_v21 = vmax.f32 %v1396_v56, %v1425_v26  ;;  %v939_v49 = vpop.f32.mrf.mxu0  ;;  %v1229_v27 = vpop.f32.mrf.mxu1  ;;  %v1343_v14 = vmax.f32 %v2536_v29, 0.0  ;;  %v1344_v7 = vmax.f32 %v2537_v16, 0.0 }
 0x140   : > { %v1453_v2 = vmax.f32 %v1395_v39, %v1424_v15  ;;  %v1398_v42 = vmax.f32 %v1282_v9, %v1311_v54  ;;  %v1427_v51 = vmax.f32 %v1340_v32, %v1369_v0  ;;  %v1310_v43 = vmax.f32 %v939_v49, 0.0 }
 0x141   : > { %1484 = vst.msk [vmem:[%s2397_s26 + $0xb0] sm:$0xff] %vm1461_vm1, %v1454_v21  ;;  %v1368_v30 = vmax.f32 %v1229_v27, 0.0  ;;  %v1882_v11 = vpop.f32.mrf.mxu0  ;;  %v1969_v31 = vpop.f32.mrf.mxu1 }
 0x142   : > { %1483 = vst.msk [vmem:[%s2397_s26 + $0xa8] sm:$0xff] %vm1461_vm1, %v1453_v2  ;;  %v1456_v36 = vmax.f32 %v1398_v42, %v1427_v51  ;;  %v1397_v46 = vmax.f32 %v1281_v59, %v1310_v43  ;;  %v1313_v60 = vmax.f32 %v1882_v11, 0.0  ;;  %v1371_v55 = vmax.f32 %v1969_v31, 0.0 }
 0x143   : > { %v1426_v50 = vmax.f32 %v1339_v62, %v1368_v30  ;;  %v949_v52 = vpop.f32.mrf.mxu0  ;;  %v1239_v13 = vpop.f32.mrf.mxu1 }
 0x144   : > { %1486 = vst.msk [vmem:[%s2397_s26 + $0xc0] sm:$0xff] %vm1461_vm1, %v1456_v36  ;;  %v1400_v25 = vmax.f32 %v1284_v10, %v1313_v60  ;;  %v1429_v4 = vmax.f32 %v1342_v47, %v1371_v55  ;;  %v1312_v34 = vmax.f32 %v949_v52, 0.0  ;;  %v1370_v22 = vmax.f32 %v1239_v13, 0.0 }
 0x145   : > { %v1455_v23 = vmax.f32 %v1397_v46, %v1426_v50  ;;  %v1885_v5 = vpop.f32.mrf.mxu0  ;;  %v1972_v37 = vpop.f32.mrf.mxu1 }
 0x146   : > { %v1458_v63 = vmax.f32 %v1400_v25, %v1429_v4  ;;  %v1399_v41 = vmax.f32 %v1283_v61, %v1312_v34  ;;  %v1428_v44 = vmax.f32 %v1341_v3, %v1370_v22  ;;  %v1315_v6 = vmax.f32 %v1885_v5, 0.0 }
 0x147   : > { %1485 = vst.msk [vmem:[%s2397_s26 + $0xb8] sm:$0xff] %vm1461_vm1, %v1455_v23  ;;  %v1373_v17 = vmax.f32 %v1972_v37, 0.0  ;;  %v959_v58 = vpop.f32.mrf.mxu0  ;;  %v1249_v48 = vpop.f32.mrf.mxu1 }
 0x148   : > { %1488 = vst.msk [vmem:[%s2397_s26 + $0xd0] sm:$0xff] %vm1461_vm1, %v1458_v63  ;;  %v1457_v38 = vmax.f32 %v1399_v41, %v1428_v44  ;;  %v1402_v56 = vmax.f32 %v1286_v53, %v1315_v6  ;;  %v1314_v8 = vmax.f32 %v959_v58, 0.0  ;;  %v1372_v57 = vmax.f32 %v1249_v48, 0.0 }
 0x149   : > { %v1431_v9 = vmax.f32 %v1344_v7, %v1373_v17 }
 0x14a   : > { %1487 = vst.msk [vmem:[%s2397_s26 + $0xc8] sm:$0xff] %vm1461_vm1, %v1457_v38  ;;  %v1401_v32 = vmax.f32 %v1285_v40, %v1314_v8  ;;  %v1430_v26 = vmax.f32 %v1343_v14, %v1372_v57 }
 0x14b   : > { %v1460_v33 = vmax.f32 %v1402_v56, %v1431_v9 }
 0x14c   : > { %v1459_v45 = vmax.f32 %v1401_v32, %v1430_v26 }
 0x14d   : > { %1490 = vst.msk [vmem:[%s2397_s26 + $0xe0] sm:$0xff] %vm1461_vm1, %v1460_v33 }
 0x14e   : > { %1489 = vst.msk [vmem:[%s2397_s26 + $0xd8] sm:$0xff] %vm1461_vm1, %v1459_v45 }
 0x14f PF: > { %s12_s9 = sadd.s32 1, %s1997_s9  }
 0x150   : > { %p9_p4 = scmp.ge.s32.totalorder %s12_s9, 4  }
 0x152   :  { %11 = sbr.rel (!%p9_p4) target bundleno = 1 (0x1), region = 58 }

// kernel: baseline_forward.4
= control target key start
LH: loop header
LB: loop body
LE: loop exit
PB: predicated region body
PF: predicated region fallthrough
CT: control target
= control target key end

     0   :  { %v1464_v0 = vmov 0.0   ;;  %vm283_vm0 = vcmask 523264   ;;  %s2601_s1 = inlined_call_operand.vmem [shape: f32[576,128], index: 1, kind: input, shape index: {}]   ;;  %s2602_s0 = inlined_call_operand.vmem [shape: f32[2,4,40,576], index: 0, kind: input, shape index: {}]   ;;  %s2603_s2 = inlined_call_operand.vmem [shape: f32[2,40,128], index: 2, kind: output, shape index: {}]  }
   0x1   :  { %404 = vmatprep.subr.mxu0 %v1464_v0  ;;  %669 = vmatprep.subr.mxu1 %v1464_v0  ;;  %v226_v1 = vld [vmem:[%s2601_s1 + $0x78] sm:$0xff]  ;;  %v225_v3 = vld [vmem:[%s2601_s1 + $0x70] sm:$0xff]  ;;  %v224_v5 = vld [vmem:[%s2601_s1 + $0x68] sm:$0xff] }
   0x2   :  { %v258_v2 = vld [vmem:[%s2601_s1 + $0x178] sm:$0xff]  ;;  %405 = vmatpush1.msra.mxu0 %v226_v1  ;;  %v257_v4 = vld [vmem:[%s2601_s1 + $0x170] sm:$0xff]  ;;  %v256_v6 = vld [vmem:[%s2601_s1 + $0x168] sm:$0xff] }
   0x3   :  { %670 = vmatpush1.msra.mxu1 %v258_v2  ;;  %406 = vmatprep.subr.mxu0 %v1464_v0  ;;  %v223_v7 = vld [vmem:[%s2601_s1 + $0x60] sm:$0xff]  ;;  %v222_v9 = vld [vmem:[%s2601_s1 + $0x58] sm:$0xff]  ;;  %v221_v11 = vld [vmem:[%s2601_s1 + $0x50] sm:$0xff] }
   0x4   :  { %671 = vmatprep.subr.mxu1 %v1464_v0  ;;  %407 = vmatpush1.msra.mxu0 %v225_v3  ;;  %v255_v8 = vld [vmem:[%s2601_s1 + $0x160] sm:$0xff]  ;;  %v254_v10 = vld [vmem:[%s2601_s1 + $0x158] sm:$0xff]  ;;  %v253_v12 = vld [vmem:[%s2601_s1 + $0x150] sm:$0xff] }
   0x5   :  { %672 = vmatpush1.msra.mxu1 %v257_v4  ;;  %408 = vmatprep.subr.mxu0 %v1464_v0  ;;  %v220_v13 = vld [vmem:[%s2601_s1 + $0x48] sm:$0xff]  ;;  %v219_v15 = vld [vmem:[%s2601_s1 + $0x40] sm:$0xff]  ;;  %v218_v17 = vld [vmem:[%s2601_s1 + $0x38] sm:$0xff] }
   0x6   :  { %673 = vmatprep.subr.mxu1 %v1464_v0  ;;  %409 = vmatpush1.msra.mxu0 %v224_v5  ;;  %v252_v14 = vld [vmem:[%s2601_s1 + $0x148] sm:$0xff]  ;;  %v251_v16 = vld [vmem:[%s2601_s1 + $0x140] sm:$0xff]  ;;  %v250_v18 = vld [vmem:[%s2601_s1 + $0x138] sm:$0xff] }
   0x7   :  { %674 = vmatpush1.msra.mxu1 %v256_v6  ;;  %410 = vmatprep.subr.mxu0 %v1464_v0  ;;  %v217_v19 = vld [vmem:[%s2601_s1 + $0x30] sm:$0xff]  ;;  %v216_v21 = vld [vmem:[%s2601_s1 + $0x28] sm:$0xff]  ;;  %v215_v23 = vld [vmem:[%s2601_s1 + $0x20] sm:$0xff] }
   0x8   :  { %675 = vmatprep.subr.mxu1 %v1464_v0  ;;  %411 = vmatpush1.msra.mxu0 %v223_v7  ;;  %v249_v20 = vld [vmem:[%s2601_s1 + $0x130] sm:$0xff]  ;;  %v248_v22 = vld [vmem:[%s2601_s1 + $0x128] sm:$0xff]  ;;  %v247_v24 = vld [vmem:[%s2601_s1 + $0x120] sm:$0xff] }
   0x9   :  { %676 = vmatpush1.msra.mxu1 %v255_v8  ;;  %412 = vmatprep.subr.mxu0 %v1464_v0  ;;  %v214_v25 = vld [vmem:[%s2601_s1 + $0x18] sm:$0xff]  ;;  %v213_v27 = vld [vmem:[%s2601_s1 + $0x10] sm:$0xff]  ;;  %v212_v29 = vld [vmem:[%s2601_s1 + $0x8] sm:$0xff] }
   0xa   :  { %677 = vmatprep.subr.mxu1 %v1464_v0  ;;  %413 = vmatpush1.msra.mxu0 %v222_v9  ;;  %v246_v26 = vld [vmem:[%s2601_s1 + $0x118] sm:$0xff]  ;;  %v245_v28 = vld [vmem:[%s2601_s1 + $0x110] sm:$0xff]  ;;  %v244_v30 = vld [vmem:[%s2601_s1 + $0x108] sm:$0xff] }
   0xb   :  { %678 = vmatpush1.msra.mxu1 %v254_v10  ;;  %414 = vmatprep.subr.mxu0 %v1464_v0  ;;  %v211_v31 = vld [vmem:[%s2601_s1] sm:$0xff]  ;;  %v242_v33 = vld [vmem:[%s2601_s1 + $0xf8] sm:$0xff]  ;;  %v241_v35 = vld [vmem:[%s2601_s1 + $0xf0] sm:$0xff] }
   0xc   :  { %679 = vmatprep.subr.mxu1 %v1464_v0  ;;  %415 = vmatpush1.msra.mxu0 %v221_v11  ;;  %v243_v32 = vld [vmem:[%s2601_s1 + $0x100] sm:$0xff]  ;;  %v274_v34 = vld [vmem:[%s2601_s1 + $0x1f8] sm:$0xff]  ;;  %v273_v36 = vld [vmem:[%s2601_s1 + $0x1f0] sm:$0xff] }
   0xd   :  { %680 = vmatpush1.msra.mxu1 %v253_v12  ;;  %416 = vmatprep.subr.mxu0 %v1464_v0  ;;  %v240_v37 = vld [vmem:[%s2601_s1 + $0xe8] sm:$0xff]  ;;  %v239_v39 = vld [vmem:[%s2601_s1 + $0xe0] sm:$0xff]  ;;  %v238_v41 = vld [vmem:[%s2601_s1 + $0xd8] sm:$0xff] }
   0xe   :  { %681 = vmatprep.subr.mxu1 %v1464_v0  ;;  %417 = vmatpush1.msra.mxu0 %v220_v13  ;;  %v272_v38 = vld [vmem:[%s2601_s1 + $0x1e8] sm:$0xff]  ;;  %v271_v40 = vld [vmem:[%s2601_s1 + $0x1e0] sm:$0xff]  ;;  %v270_v42 = vld [vmem:[%s2601_s1 + $0x1d8] sm:$0xff] }
   0xf   :  { %682 = vmatpush1.msra.mxu1 %v252_v14  ;;  %418 = vmatprep.subr.mxu0 %v1464_v0  ;;  %v237_v43 = vld [vmem:[%s2601_s1 + $0xd0] sm:$0xff]  ;;  %v236_v45 = vld [vmem:[%s2601_s1 + $0xc8] sm:$0xff]  ;;  %v235_v47 = vld [vmem:[%s2601_s1 + $0xc0] sm:$0xff] }
  0x10   :  { %683 = vmatprep.subr.mxu1 %v1464_v0  ;;  %419 = vmatpush1.msra.mxu0 %v219_v15  ;;  %v269_v44 = vld [vmem:[%s2601_s1 + $0x1d0] sm:$0xff]  ;;  %v268_v46 = vld [vmem:[%s2601_s1 + $0x1c8] sm:$0xff]  ;;  %v267_v48 = vld [vmem:[%s2601_s1 + $0x1c0] sm:$0xff] }
  0x11   :  { %684 = vmatpush1.msra.mxu1 %v251_v16  ;;  %420 = vmatprep.subr.mxu0 %v1464_v0  ;;  %v234_v49 = vld [vmem:[%s2601_s1 + $0xb8] sm:$0xff]  ;;  %v233_v51 = vld [vmem:[%s2601_s1 + $0xb0] sm:$0xff]  ;;  %v232_v53 = vld [vmem:[%s2601_s1 + $0xa8] sm:$0xff] }
  0x12   :  { %685 = vmatprep.subr.mxu1 %v1464_v0  ;;  %421 = vmatpush1.msra.mxu0 %v218_v17  ;;  %v266_v50 = vld [vmem:[%s2601_s1 + $0x1b8] sm:$0xff]  ;;  %v265_v52 = vld [vmem:[%s2601_s1 + $0x1b0] sm:$0xff]  ;;  %v264_v54 = vld [vmem:[%s2601_s1 + $0x1a8] sm:$0xff] }
  0x13   :  { %686 = vmatpush1.msra.mxu1 %v250_v18  ;;  %422 = vmatprep.subr.mxu0 %v1464_v0  ;;  %v231_v55 = vld [vmem:[%s2601_s1 + $0xa0] sm:$0xff]  ;;  %v230_v57 = vld [vmem:[%s2601_s1 + $0x98] sm:$0xff]  ;;  %v229_v59 = vld [vmem:[%s2601_s1 + $0x90] sm:$0xff] }
  0x14   :  { %687 = vmatprep.subr.mxu1 %v1464_v0  ;;  %423 = vmatpush1.msra.mxu0 %v217_v19  ;;  %v263_v56 = vld [vmem:[%s2601_s1 + $0x1a0] sm:$0xff]  ;;  %v262_v58 = vld [vmem:[%s2601_s1 + $0x198] sm:$0xff]  ;;  %v261_v60 = vld [vmem:[%s2601_s1 + $0x190] sm:$0xff] }
  0x15   :  { %688 = vmatpush1.msra.mxu1 %v249_v20  ;;  %424 = vmatprep.subr.mxu0 %v1464_v0  ;;  %v228_v61 = vld [vmem:[%s2601_s1 + $0x88] sm:$0xff]  ;;  %v227_v63 = vld [vmem:[%s2601_s1 + $0x80] sm:$0xff]  ;;  %v14_v3 = vld [vmem:[%s2602_s0 + $0x18] sm:$0xff] }
  0x16   :  { %689 = vmatprep.subr.mxu1 %v1464_v0  ;;  %425 = vmatpush1.msra.mxu0 %v216_v21  ;;  %v260_v62 = vld [vmem:[%s2601_s1 + $0x188] sm:$0xff]  ;;  %v259_v2 = vld [vmem:[%s2601_s1 + $0x180] sm:$0xff]  ;;  %v13_v5 = vld [vmem:[%s2602_s0 + $0x10] sm:$0xff] }
  0x17   :  { %690 = vmatpush1.msra.mxu1 %v248_v22  ;;  %426 = vmatprep.subr.mxu0 %v1464_v0  ;;  %v12_v1 = vld [vmem:[%s2602_s0 + $0x8] sm:$0xff]  ;;  %v11_v4 = vld [vmem:[%s2602_s0] sm:$0xff]  ;;  %v282_v6 = vld [vmem:[%s2601_s1 + $0x238] sm:$0xff] }
  0x18   :  { %691 = vmatprep.subr.mxu1 %v1464_v0  ;;  %427 = vmatpush1.msra.mxu0 %v215_v23  ;;  %v19_v7 = vld [vmem:[%s2602_s0 + $0x40] sm:$0xff]  ;;  %v16_v8 = vld [vmem:[%s2602_s0 + $0x28] sm:$0xff]  ;;  %v18_v9 = vld [vmem:[%s2602_s0 + $0x38] sm:$0xff] }
  0x19   :  { %692 = vmatpush1.msra.mxu1 %v247_v24  ;;  %428 = vmatprep.subr.mxu0 %v1464_v0  ;;  %v22_v10 = vld [vmem:[%s2602_s0 + $0x58] sm:$0xff]  ;;  %v24_v11 = vld [vmem:[%s2602_s0 + $0x68] sm:$0xff]  ;;  %v281_v12 = vld [vmem:[%s2601_s1 + $0x230] sm:$0xff] }
  0x1a   :  { %693 = vmatprep.subr.mxu1 %v1464_v0  ;;  %429 = vmatpush1.msra.mxu0 %v214_v25  ;;  %v21_v13 = vld [vmem:[%s2602_s0 + $0x50] sm:$0xff]  ;;  %v23_v14 = vld [vmem:[%s2602_s0 + $0x60] sm:$0xff]  ;;  %v280_v17 = vld [vmem:[%s2601_s1 + $0x228] sm:$0xff] }
  0x1b   :  { %694 = vmatpush1.msra.mxu1 %v246_v26  ;;  %430 = vmatprep.subr.mxu0 %v1464_v0  ;;  %v27_v15 = vld [vmem:[%s2602_s0 + $0x80] sm:$0xff]  ;;  %v29_v16 = vld [vmem:[%s2602_s0 + $0x90] sm:$0xff]  ;;  %v26_v18 = vld [vmem:[%s2602_s0 + $0x78] sm:$0xff] }
  0x1c   :  { %695 = vmatprep.subr.mxu1 %v1464_v0  ;;  %431 = vmatpush1.msra.mxu0 %v213_v27  ;;  %v28_v19 = vld [vmem:[%s2602_s0 + $0x88] sm:$0xff]  ;;  %v34_v21 = vld [vmem:[%s2602_s0 + $0xb8] sm:$0xff]  ;;  %v279_v22 = vld [vmem:[%s2601_s1 + $0x220] sm:$0xff] }
  0x1d   :  { %696 = vmatpush1.msra.mxu1 %v245_v28  ;;  %432 = vmatprep.subr.mxu0 %v1464_v0  ;;  %v32_v20 = vld [vmem:[%s2602_s0 + $0xa8] sm:$0xff]  ;;  %v31_v23 = vld [vmem:[%s2602_s0 + $0xa0] sm:$0xff]  ;;  %v33_v24 = vld [vmem:[%s2602_s0 + $0xb0] sm:$0xff] }
  0x1e   :  { %697 = vmatprep.subr.mxu1 %v1464_v0  ;;  %433 = vmatpush1.msra.mxu0 %v212_v29  ;;  %v37_v25 = vld [vmem:[%s2602_s0 + $0xd0] sm:$0xff]  ;;  %v39_v26 = vld [vmem:[%s2602_s0 + $0xe0] sm:$0xff]  ;;  %v278_v27 = vld [vmem:[%s2601_s1 + $0x218] sm:$0xff] }
  0x1f   :  { %698 = vmatpush1.msra.mxu1 %v244_v30  ;;  %434 = vmatprep.subr.mxu0 %v1464_v0  ;;  %v36_v28 = vld [vmem:[%s2602_s0 + $0xc8] sm:$0xff]  ;;  %v38_v29 = vld [vmem:[%s2602_s0 + $0xd8] sm:$0xff] }
  0x20   :  { %699 = vmatprep.subr.mxu1 %v1464_v0  ;;  %435 = vmatpush1.msra.mxu0 %v211_v31  ;;  %v42_v30 = vld [vmem:[%s2602_s0 + $0xf8] sm:$0xff]  ;;  %v44_v31 = vld [vmem:[%s2602_s0 + $0x108] sm:$0xff] }
  0x21   :  { %700 = vmatpush1.msra.mxu1 %v243_v32  ;;  %436 = vmatprep.subr.mxu0 %v1464_v0  ;;  %v277_v32 = vld [vmem:[%s2601_s1 + $0x210] sm:$0xff] }
  0x22   :  { %701 = vmatprep.subr.mxu1 %v1464_v0  ;;  %437 = vmatpush2.msra.mxu0 %v242_v33  ;;  %v41_v33 = vld [vmem:[%s2602_s0 + $0xf0] sm:$0xff] }
  0x23   :  { %702 = vmatpush2.msra.mxu1 %v274_v34  ;;  %438 = vmatprep.subr.mxu0 %v1464_v0  ;;  %v43_v34 = vld [vmem:[%s2602_s0 + $0x100] sm:$0xff] }
  0x24   :  { %703 = vmatprep.subr.mxu1 %v1464_v0  ;;  %439 = vmatpush2.msra.mxu0 %v241_v35  ;;  %v47_v35 = vld [vmem:[%s2602_s0 + $0x120] sm:$0xff] }
  0x25   :  { %704 = vmatpush2.msra.mxu1 %v273_v36  ;;  %440 = vmatprep.subr.mxu0 %v1464_v0  ;;  %v49_v36 = vld [vmem:[%s2602_s0 + $0x130] sm:$0xff] }
  0x26   :  { %705 = vmatprep.subr.mxu1 %v1464_v0  ;;  %441 = vmatpush2.msra.mxu0 %v240_v37  ;;  %v276_v37 = vld [vmem:[%s2601_s1 + $0x208] sm:$0xff] }
  0x27   :  { %706 = vmatpush2.msra.mxu1 %v272_v38  ;;  %442 = vmatprep.subr.mxu0 %v1464_v0  ;;  %v46_v38 = vld [vmem:[%s2602_s0 + $0x118] sm:$0xff] }
  0x28   :  { %707 = vmatprep.subr.mxu1 %v1464_v0  ;;  %443 = vmatpush2.msra.mxu0 %v239_v39  ;;  %v48_v39 = vld [vmem:[%s2602_s0 + $0x128] sm:$0xff] }
  0x29   :  { %708 = vmatpush2.msra.mxu1 %v271_v40  ;;  %444 = vmatprep.subr.mxu0 %v1464_v0  ;;  %v52_v40 = vld [vmem:[%s2602_s0 + $0x148] sm:$0xff] }
  0x2a   :  { %709 = vmatprep.subr.mxu1 %v1464_v0  ;;  %445 = vmatpush2.msra.mxu0 %v238_v41  ;;  %v54_v41 = vld [vmem:[%s2602_s0 + $0x158] sm:$0xff] }
  0x2b   :  { %710 = vmatpush2.msra.mxu1 %v270_v42  ;;  %446 = vmatprep.subr.mxu0 %v1464_v0  ;;  %v275_v42 = vld [vmem:[%s2601_s1 + $0x200] sm:$0xff] }
  0x2c   :  { %711 = vmatprep.subr.mxu1 %v1464_v0  ;;  %447 = vmatpush2.msra.mxu0 %v237_v43  ;;  %v51_v43 = vld [vmem:[%s2602_s0 + $0x140] sm:$0xff] }
  0x2d   :  { %712 = vmatpush2.msra.mxu1 %v269_v44  ;;  %448 = vmatprep.subr.mxu0 %v1464_v0  ;;  %v53_v44 = vld [vmem:[%s2602_s0 + $0x150] sm:$0xff] }
  0x2e   :  { %713 = vmatprep.subr.mxu1 %v1464_v0  ;;  %449 = vmatpush2.msra.mxu0 %v236_v45  ;;  %v57_v45 = vld [vmem:[%s2602_s0 + $0x170] sm:$0xff] }
  0x2f   :  { %714 = vmatpush2.msra.mxu1 %v268_v46  ;;  %450 = vmatprep.subr.mxu0 %v1464_v0  ;;  %v59_v46 = vld [vmem:[%s2602_s0 + $0x180] sm:$0xff] }
  0x30   :  { %715 = vmatprep.subr.mxu1 %v1464_v0  ;;  %451 = vmatpush2.msra.mxu0 %v235_v47  ;;  %v56_v47 = vld [vmem:[%s2602_s0 + $0x168] sm:$0xff] }
  0x31   :  { %716 = vmatpush2.msra.mxu1 %v267_v48  ;;  %452 = vmatprep.subr.mxu0 %v1464_v0  ;;  %v58_v48 = vld [vmem:[%s2602_s0 + $0x178] sm:$0xff] }
  0x32   :  { %717 = vmatprep.subr.mxu1 %v1464_v0  ;;  %453 = vmatpush2.msra.mxu0 %v234_v49  ;;  %v62_v49 = vld [vmem:[%s2602_s0 + $0x198] sm:$0xff] }
  0x33   :  { %718 = vmatpush2.msra.mxu1 %v266_v50  ;;  %454 = vmatprep.subr.mxu0 %v1464_v0  ;;  %v64_v50 = vld [vmem:[%s2602_s0 + $0x1a8] sm:$0xff] }
  0x34   :  { %719 = vmatprep.subr.mxu1 %v1464_v0  ;;  %455 = vmatpush2.msra.mxu0 %v233_v51  ;;  %v61_v51 = vld [vmem:[%s2602_s0 + $0x190] sm:$0xff] }
  0x35   :  { %720 = vmatpush2.msra.mxu1 %v265_v52  ;;  %456 = vmatprep.subr.mxu0 %v1464_v0  ;;  %v63_v52 = vld [vmem:[%s2602_s0 + $0x1a0] sm:$0xff] }
  0x36   :  { %721 = vmatprep.subr.mxu1 %v1464_v0  ;;  %457 = vmatpush2.msra.mxu0 %v232_v53  ;;  %v67_v53 = vld [vmem:[%s2602_s0 + $0x1c0] sm:$0xff] }
  0x37   :  { %722 = vmatpush2.msra.mxu1 %v264_v54  ;;  %458 = vmatprep.subr.mxu0 %v1464_v0  ;;  %v69_v54 = vld [vmem:[%s2602_s0 + $0x1d0] sm:$0xff] }
  0x38   :  { %723 = vmatprep.subr.mxu1 %v1464_v0  ;;  %459 = vmatpush2.msra.mxu0 %v231_v55  ;;  %v66_v55 = vld [vmem:[%s2602_s0 + $0x1b8] sm:$0xff] }
  0x39   :  { %724 = vmatpush2.msra.mxu1 %v263_v56  ;;  %460 = vmatprep.subr.mxu0 %v1464_v0  ;;  %v68_v56 = vld [vmem:[%s2602_s0 + $0x1c8] sm:$0xff] }
  0x3a   :  { %725 = vmatprep.subr.mxu1 %v1464_v0  ;;  %461 = vmatpush2.msra.mxu0 %v230_v57  ;;  %v72_v57 = vld [vmem:[%s2602_s0 + $0x1e8] sm:$0xff] }
  0x3b   :  { %726 = vmatpush2.msra.mxu1 %v262_v58  ;;  %462 = vmatprep.subr.mxu0 %v1464_v0  ;;  %v74_v58 = vld [vmem:[%s2602_s0 + $0x1f8] sm:$0xff] }
  0x3c   :  { %727 = vmatprep.subr.mxu1 %v1464_v0  ;;  %463 = vmatpush2.msra.mxu0 %v229_v59  ;;  %v71_v59 = vld [vmem:[%s2602_s0 + $0x1e0] sm:$0xff] }
  0x3d   :  { %728 = vmatpush2.msra.mxu1 %v261_v60  ;;  %464 = vmatprep.subr.mxu0 %v1464_v0  ;;  %v73_v60 = vld [vmem:[%s2602_s0 + $0x1f0] sm:$0xff] }
  0x3e   :  { %729 = vmatprep.subr.mxu1 %v1464_v0  ;;  %465 = vmatpush2.msra.mxu0 %v228_v61  ;;  %v77_v61 = vld [vmem:[%s2602_s0 + $0x210] sm:$0xff] }
  0x3f   :  { %730 = vmatpush2.msra.mxu1 %v260_v62  ;;  %466 = vmatprep.subr.mxu0 %v1464_v0  ;;  %v79_v62 = vld [vmem:[%s2602_s0 + $0x220] sm:$0xff] }
  0x40   :  { %731 = vmatprep.subr.mxu1 %v1464_v0  ;;  %467 = vmatpush2.msra.mxu0 %v227_v63  ;;  %v17_v0 = vld [vmem:[%s2602_s0 + $0x30] sm:$0xff]  ;;  %v76_v63 = vld [vmem:[%s2602_s0 + $0x208] sm:$0xff] }
  0x41   :  { %468 = vmatprep.mubr.f32.mxu0 %v12_v1  ;;  %732 = vmatpush2.msra.mxu1 %v259_v2  ;;  %v78_v1 = vld [vmem:[%s2602_s0 + $0x218] sm:$0xff] }
  0x42   :  { %733 = vmatprep.mubr.f32.mxu1 %v14_v3  ;;  %469 = vmatmul.mubr.f32.vlgmr.msra.gmra.mxu0 %v11_v4  ;;  %v82_v2 = vld [vmem:[%s2602_s0 + $0x238] sm:$0xff]  ;;  %v84_v3 = vld [vmem:[%s2602_s0 + $0x248] sm:$0xff]  ;;  %v81_v4 = vld [vmem:[%s2602_s0 + $0x230] sm:$0xff] }
  0x43   :  { %734 = vmatmul.mubr.f32.vlgmr.msra.gmra.mxu1 %v13_v5  ;;  %1371 = vmatprep.subr.mxu0 %v282_v6  ;;  %v83_v5 = vld [vmem:[%s2602_s0 + $0x240] sm:$0xff] }
  0x44   :  { %1447 = vmatprep.subr.mxu1 %v282_v6  ;;  %1372 = vmatpush3.msra.mxu0 %v282_v6 }
  0x45   :  { %1455 = vmatpush3.msra.mxu1 %v282_v6  ;;  %473 = vmatprep.mubr.f32.mxu0 %v17_v0  ;;  %v87_v6 = vld [vmem:[%s2602_s0 + $0x260] sm:$0xff]  ;;  %v89_v0 = vld [vmem:[%s2602_s0 + $0x270] sm:$0xff] }
  0x46   :  { %738 = vmatprep.mubr.f32.mxu1 %v19_v7  ;;  %474 = vmatmul.mubr.f32.gmra.mxu0 %v16_v8  ;;  %v86_v7 = vld [vmem:[%s2602_s0 + $0x258] sm:$0xff]  ;;  %v88_v8 = vld [vmem:[%s2602_s0 + $0x268] sm:$0xff] }
  0x47   :  { %739 = vmatmul.mubr.f32.gmra.mxu1 %v18_v9  ;;  %478 = vmatprep.mubr.f32.mxu0 %v22_v10  ;;  %v92_v9 = vld [vmem:[%s2602_s0 + $0x288] sm:$0xff]  ;;  %v94_v10 = vld [vmem:[%s2602_s0 + $0x298] sm:$0xff] }
  0x48   :  { %743 = vmatprep.mubr.f32.mxu1 %v24_v11  ;;  %1373 = vmatprep.subr.mxu0 %v281_v12  ;;  %v91_v11 = vld [vmem:[%s2602_s0 + $0x280] sm:$0xff] }
  0x49   :  { %1448 = vmatprep.subr.mxu1 %v281_v12  ;;  %1374 = vmatpush3.msra.mxu0 %v281_v12 }
  0x4a   :  { %1456 = vmatpush3.msra.mxu1 %v281_v12  ;;  %479 = vmatmul.mubr.f32.gmra.mxu0 %v21_v13  ;;  %v93_v12 = vld [vmem:[%s2602_s0 + $0x290] sm:$0xff] }
  0x4b   :  { %744 = vmatmul.mubr.f32.gmra.mxu1 %v23_v14  ;;  %483 = vmatprep.mubr.f32.mxu0 %v27_v15  ;;  %v97_v13 = vld [vmem:[%s2602_s0 + $0x2b0] sm:$0xff]  ;;  %v99_v14 = vld [vmem:[%s2602_s0 + $0x2c0] sm:$0xff]  ;;  %v96_v15 = vld [vmem:[%s2602_s0 + $0x2a8] sm:$0xff] }
  0x4c   :  { %748 = vmatprep.mubr.f32.mxu1 %v29_v16  ;;  %1375 = vmatprep.subr.mxu0 %v280_v17  ;;  %v98_v16 = vld [vmem:[%s2602_s0 + $0x2b8] sm:$0xff] }
  0x4d   :  { %1449 = vmatprep.subr.mxu1 %v280_v17  ;;  %1376 = vmatpush3.msra.mxu0 %v280_v17 }
  0x4e   :  { %1457 = vmatpush3.msra.mxu1 %v280_v17  ;;  %484 = vmatmul.mubr.f32.gmra.mxu0 %v26_v18  ;;  %v102_v17 = vld [vmem:[%s2602_s0 + $0x2d8] sm:$0xff]  ;;  %v104_v18 = vld [vmem:[%s2602_s0 + $0x2e8] sm:$0xff] }
  0x4f   :  { %749 = vmatmul.mubr.f32.gmra.mxu1 %v28_v19  ;;  %488 = vmatprep.mubr.f32.mxu0 %v32_v20  ;;  %v101_v19 = vld [vmem:[%s2602_s0 + $0x2d0] sm:$0xff]  ;;  %v103_v20 = vld [vmem:[%s2602_s0 + $0x2e0] sm:$0xff] }
  0x50   :  { %753 = vmatprep.mubr.f32.mxu1 %v34_v21  ;;  %1377 = vmatprep.subr.mxu0 %v279_v22  ;;  %v107_v21 = vld [vmem:[%s2602_s0 + $0x300] sm:$0xff] }
  0x51   :  { %1450 = vmatprep.subr.mxu1 %v279_v22  ;;  %1378 = vmatpush3.msra.mxu0 %v279_v22 }
  0x52   :  { %1458 = vmatpush3.msra.mxu1 %v279_v22  ;;  %489 = vmatmul.mubr.f32.gmra.mxu0 %v31_v23  ;;  %v109_v22 = vld [vmem:[%s2602_s0 + $0x310] sm:$0xff]  ;;  %v106_v23 = vld [vmem:[%s2602_s0 + $0x2f8] sm:$0xff] }
  0x53   :  { %754 = vmatmul.mubr.f32.gmra.mxu1 %v33_v24  ;;  %493 = vmatprep.mubr.f32.mxu0 %v37_v25  ;;  %v108_v24 = vld [vmem:[%s2602_s0 + $0x308] sm:$0xff] }
  0x54   :  { %758 = vmatprep.mubr.f32.mxu1 %v39_v26  ;;  %1379 = vmatprep.subr.mxu0 %v278_v27  ;;  %v112_v25 = vld [vmem:[%s2602_s0 + $0x328] sm:$0xff]  ;;  %v114_v26 = vld [vmem:[%s2602_s0 + $0x338] sm:$0xff] }
  0x55   :  { %1451 = vmatprep.subr.mxu1 %v278_v27  ;;  %1380 = vmatpush3.msra.mxu0 %v278_v27 }
  0x56   :  { %1459 = vmatpush3.msra.mxu1 %v278_v27  ;;  %494 = vmatmul.mubr.f32.gmra.mxu0 %v36_v28  ;;  %v111_v27 = vld [vmem:[%s2602_s0 + $0x320] sm:$0xff]  ;;  %v113_v28 = vld [vmem:[%s2602_s0 + $0x330] sm:$0xff] }
  0x57   :  { %759 = vmatmul.mubr.f32.gmra.mxu1 %v38_v29  ;;  %498 = vmatprep.mubr.f32.mxu0 %v42_v30  ;;  %v117_v29 = vld [vmem:[%s2602_s0 + $0x350] sm:$0xff]  ;;  %v119_v30 = vld [vmem:[%s2602_s0 + $0x360] sm:$0xff] }
  0x58   :  { %763 = vmatprep.mubr.f32.mxu1 %v44_v31  ;;  %1381 = vmatprep.subr.mxu0 %v277_v32  ;;  %v116_v31 = vld [vmem:[%s2602_s0 + $0x348] sm:$0xff] }
  0x59   :  { %1452 = vmatprep.subr.mxu1 %v277_v32  ;;  %1382 = vmatpush3.msra.mxu0 %v277_v32 }
  0x5a   :  { %1460 = vmatpush3.msra.mxu1 %v277_v32  ;;  %499 = vmatmul.mubr.f32.gmra.mxu0 %v41_v33  ;;  %v118_v32 = vld [vmem:[%s2602_s0 + $0x358] sm:$0xff] }
  0x5b   :  { %764 = vmatmul.mubr.f32.gmra.mxu1 %v43_v34  ;;  %503 = vmatprep.mubr.f32.mxu0 %v47_v35  ;;  %v122_v33 = vld [vmem:[%s2602_s0 + $0x378] sm:$0xff]  ;;  %v124_v34 = vld [vmem:[%s2602_s0 + $0x388] sm:$0xff]  ;;  %v121_v35 = vld [vmem:[%s2602_s0 + $0x370] sm:$0xff] }
  0x5c   :  { %768 = vmatprep.mubr.f32.mxu1 %v49_v36  ;;  %1383 = vmatprep.subr.mxu0 %v276_v37  ;;  %v123_v36 = vld [vmem:[%s2602_s0 + $0x380] sm:$0xff] }
  0x5d   :  { %1453 = vmatprep.subr.mxu1 %v276_v37  ;;  %1384 = vmatpush3.msra.mxu0 %v276_v37 }
  0x5e   :  { %1461 = vmatpush3.msra.mxu1 %v276_v37  ;;  %504 = vmatmul.mubr.f32.gmra.mxu0 %v46_v38  ;;  %v127_v37 = vld [vmem:[%s2602_s0 + $0x3a0] sm:$0xff]  ;;  %v129_v38 = vld [vmem:[%s2602_s0 + $0x3b0] sm:$0xff] }
  0x5f   :  { %769 = vmatmul.mubr.f32.gmra.mxu1 %v48_v39  ;;  %508 = vmatprep.mubr.f32.mxu0 %v52_v40  ;;  %v126_v39 = vld [vmem:[%s2602_s0 + $0x398] sm:$0xff]  ;;  %v128_v40 = vld [vmem:[%s2602_s0 + $0x3a8] sm:$0xff] }
  0x60   :  { %773 = vmatprep.mubr.f32.mxu1 %v54_v41  ;;  %1385 = vmatprep.subr.mxu0 %v275_v42  ;;  %v132_v41 = vld [vmem:[%s2602_s0 + $0x3c8] sm:$0xff] }
  0x61   :  { %1454 = vmatprep.subr.mxu1 %v275_v42  ;;  %1386 = vmatpush3.msra.mxu0 %v275_v42 }
  0x62   :  { %1462 = vmatpush3.msra.mxu1 %v275_v42  ;;  %509 = vmatmul.mubr.f32.gmra.mxu0 %v51_v43  ;;  %v134_v42 = vld [vmem:[%s2602_s0 + $0x3d8] sm:$0xff]  ;;  %v131_v43 = vld [vmem:[%s2602_s0 + $0x3c0] sm:$0xff] }
  0x63   :  { %774 = vmatmul.mubr.f32.gmra.mxu1 %v53_v44  ;;  %513 = vmatprep.mubr.f32.mxu0 %v57_v45  ;;  %v133_v44 = vld [vmem:[%s2602_s0 + $0x3d0] sm:$0xff] }
  0x64   :  { %778 = vmatprep.mubr.f32.mxu1 %v59_v46  ;;  %v137_v45 = vld [vmem:[%s2602_s0 + $0x3f0] sm:$0xff]  ;;  %v139_v46 = vld [vmem:[%s2602_s0 + $0x400] sm:$0xff] }
  0x66   :  { %514 = vmatmul.mubr.f32.gmra.mxu0 %v56_v47  ;;  %v136_v47 = vld [vmem:[%s2602_s0 + $0x3e8] sm:$0xff] }
  0x67   :  { %779 = vmatmul.mubr.f32.gmra.mxu1 %v58_v48  ;;  %518 = vmatprep.mubr.f32.mxu0 %v62_v49  ;;  %v138_v48 = vld [vmem:[%s2602_s0 + $0x3f8] sm:$0xff] }
  0x68   :  { %783 = vmatprep.mubr.f32.mxu1 %v64_v50  ;;  %v142_v49 = vld [vmem:[%s2602_s0 + $0x418] sm:$0xff]  ;;  %v144_v50 = vld [vmem:[%s2602_s0 + $0x428] sm:$0xff] }
  0x6a   :  { %519 = vmatmul.mubr.f32.gmra.mxu0 %v61_v51  ;;  %v141_v51 = vld [vmem:[%s2602_s0 + $0x410] sm:$0xff] }
  0x6b   :  { %784 = vmatmul.mubr.f32.gmra.mxu1 %v63_v52  ;;  %523 = vmatprep.mubr.f32.mxu0 %v67_v53  ;;  %v143_v52 = vld [vmem:[%s2602_s0 + $0x420] sm:$0xff] }
  0x6c   :  { %788 = vmatprep.mubr.f32.mxu1 %v69_v54  ;;  %v147_v53 = vld [vmem:[%s2602_s0 + $0x440] sm:$0xff]  ;;  %v149_v54 = vld [vmem:[%s2602_s0 + $0x450] sm:$0xff] }
  0x6e   :  { %524 = vmatmul.mubr.f32.gmra.mxu0 %v66_v55  ;;  %v146_v55 = vld [vmem:[%s2602_s0 + $0x438] sm:$0xff] }
  0x6f   :  { %789 = vmatmul.mubr.f32.gmra.mxu1 %v68_v56  ;;  %528 = vmatprep.mubr.f32.mxu0 %v72_v57  ;;  %v148_v56 = vld [vmem:[%s2602_s0 + $0x448] sm:$0xff] }
  0x70   :  { %793 = vmatprep.mubr.f32.mxu1 %v74_v58  ;;  %v152_v57 = vld [vmem:[%s2602_s0 + $0x468] sm:$0xff]  ;;  %v154_v58 = vld [vmem:[%s2602_s0 + $0x478] sm:$0xff] }
  0x72   :  { %529 = vmatmul.mubr.f32.gmra.mxu0 %v71_v59  ;;  %v151_v59 = vld [vmem:[%s2602_s0 + $0x460] sm:$0xff] }
  0x73   :  { %794 = vmatmul.mubr.f32.gmra.mxu1 %v73_v60  ;;  %533 = vmatprep.mubr.f32.mxu0 %v77_v61  ;;  %v153_v60 = vld [vmem:[%s2602_s0 + $0x470] sm:$0xff] }
  0x74   :  { %798 = vmatprep.mubr.f32.mxu1 %v79_v62  ;;  %v157_v61 = vld [vmem:[%s2602_s0 + $0x490] sm:$0xff]  ;;  %v159_v62 = vld [vmem:[%s2602_s0 + $0x4a0] sm:$0xff] }
  0x76   :  { %534 = vmatmul.mubr.f32.gmra.mxu0 %v76_v63  ;;  %v156_v63 = vld [vmem:[%s2602_s0 + $0x488] sm:$0xff] }
  0x77   :  { %799 = vmatmul.mubr.f32.gmra.mxu1 %v78_v1  ;;  %538 = vmatprep.mubr.f32.mxu0 %v82_v2  ;;  %v158_v1 = vld [vmem:[%s2602_s0 + $0x498] sm:$0xff] }
  0x78   :  { %803 = vmatprep.mubr.f32.mxu1 %v84_v3  ;;  %v162_v2 = vld [vmem:[%s2602_s0 + $0x4b8] sm:$0xff]  ;;  %v164_v3 = vld [vmem:[%s2602_s0 + $0x4c8] sm:$0xff] }
  0x7a   :  { %539 = vmatmul.mubr.f32.gmra.mxu0 %v81_v4  ;;  %v161_v4 = vld [vmem:[%s2602_s0 + $0x4b0] sm:$0xff] }
  0x7b   :  { %804 = vmatmul.mubr.f32.gmra.mxu1 %v83_v5  ;;  %543 = vmatprep.mubr.f32.mxu0 %v87_v6  ;;  %v163_v5 = vld [vmem:[%s2602_s0 + $0x4c0] sm:$0xff] }
  0x7c   :  { %808 = vmatprep.mubr.f32.mxu1 %v89_v0  ;;  %v167_v6 = vld [vmem:[%s2602_s0 + $0x4e0] sm:$0xff]  ;;  %v169_v0 = vld [vmem:[%s2602_s0 + $0x4f0] sm:$0xff] }
  0x7e   :  { %544 = vmatmul.mubr.f32.gmra.mxu0 %v86_v7  ;;  %v166_v7 = vld [vmem:[%s2602_s0 + $0x4d8] sm:$0xff] }
  0x7f   :  { %809 = vmatmul.mubr.f32.gmra.mxu1 %v88_v8  ;;  %548 = vmatprep.mubr.f32.mxu0 %v92_v9  ;;  %v168_v8 = vld [vmem:[%s2602_s0 + $0x4e8] sm:$0xff] }
  0x80   :  { %813 = vmatprep.mubr.f32.mxu1 %v94_v10  ;;  %v172_v9 = vld [vmem:[%s2602_s0 + $0x508] sm:$0xff]  ;;  %v174_v10 = vld [vmem:[%s2602_s0 + $0x518] sm:$0xff] }
  0x82   :  { %549 = vmatmul.mubr.f32.gmra.mxu0 %v91_v11  ;;  %v171_v11 = vld [vmem:[%s2602_s0 + $0x500] sm:$0xff] }
  0x83   :  { %814 = vmatmul.mubr.f32.gmra.mxu1 %v93_v12  ;;  %553 = vmatprep.mubr.f32.mxu0 %v97_v13  ;;  %v173_v12 = vld [vmem:[%s2602_s0 + $0x510] sm:$0xff] }
  0x84   :  { %818 = vmatprep.mubr.f32.mxu1 %v99_v14  ;;  %v177_v13 = vld [vmem:[%s2602_s0 + $0x530] sm:$0xff]  ;;  %v179_v14 = vld [vmem:[%s2602_s0 + $0x540] sm:$0xff] }
  0x86   :  { %554 = vmatmul.mubr.f32.gmra.mxu0 %v96_v15  ;;  %v176_v15 = vld [vmem:[%s2602_s0 + $0x528] sm:$0xff] }
  0x87   :  { %819 = vmatmul.mubr.f32.gmra.mxu1 %v98_v16  ;;  %558 = vmatprep.mubr.f32.mxu0 %v102_v17  ;;  %v178_v16 = vld [vmem:[%s2602_s0 + $0x538] sm:$0xff] }
  0x88   :  { %823 = vmatprep.mubr.f32.mxu1 %v104_v18  ;;  %v182_v17 = vld [vmem:[%s2602_s0 + $0x558] sm:$0xff]  ;;  %v184_v18 = vld [vmem:[%s2602_s0 + $0x568] sm:$0xff] }
  0x8a   :  { %559 = vmatmul.mubr.f32.gmra.mxu0 %v101_v19  ;;  %v181_v19 = vld [vmem:[%s2602_s0 + $0x550] sm:$0xff] }
  0x8b   :  { %824 = vmatmul.mubr.f32.gmra.mxu1 %v103_v20  ;;  %563 = vmatprep.mubr.f32.mxu0 %v107_v21  ;;  %v183_v20 = vld [vmem:[%s2602_s0 + $0x560] sm:$0xff] }
  0x8c   :  { %828 = vmatprep.mubr.f32.mxu1 %v109_v22  ;;  %v187_v21 = vld [vmem:[%s2602_s0 + $0x580] sm:$0xff]  ;;  %v189_v22 = vld [vmem:[%s2602_s0 + $0x590] sm:$0xff] }
  0x8e   :  { %564 = vmatmul.mubr.f32.gmra.mxu0 %v106_v23  ;;  %v186_v23 = vld [vmem:[%s2602_s0 + $0x578] sm:$0xff] }
  0x8f   :  { %829 = vmatmul.mubr.f32.gmra.mxu1 %v108_v24  ;;  %568 = vmatprep.mubr.f32.mxu0 %v112_v25  ;;  %v188_v24 = vld [vmem:[%s2602_s0 + $0x588] sm:$0xff] }
  0x90   :  { %833 = vmatprep.mubr.f32.mxu1 %v114_v26  ;;  %v192_v25 = vld [vmem:[%s2602_s0 + $0x5a8] sm:$0xff]  ;;  %v194_v26 = vld [vmem:[%s2602_s0 + $0x5b8] sm:$0xff] }
  0x92   :  { %569 = vmatmul.mubr.f32.gmra.mxu0 %v111_v27  ;;  %v191_v27 = vld [vmem:[%s2602_s0 + $0x5a0] sm:$0xff] }
  0x93   :  { %834 = vmatmul.mubr.f32.gmra.mxu1 %v113_v28  ;;  %573 = vmatprep.mubr.f32.mxu0 %v117_v29  ;;  %v193_v28 = vld [vmem:[%s2602_s0 + $0x5b0] sm:$0xff] }
  0x94   :  { %838 = vmatprep.mubr.f32.mxu1 %v119_v30  ;;  %v197_v29 = vld [vmem:[%s2602_s0 + $0x5d0] sm:$0xff]  ;;  %v199_v30 = vld [vmem:[%s2602_s0 + $0x5e0] sm:$0xff] }
  0x96   :  { %574 = vmatmul.mubr.f32.gmra.mxu0 %v116_v31  ;;  %v196_v31 = vld [vmem:[%s2602_s0 + $0x5c8] sm:$0xff] }
  0x97   :  { %839 = vmatmul.mubr.f32.gmra.mxu1 %v118_v32  ;;  %578 = vmatprep.mubr.f32.mxu0 %v122_v33  ;;  %v198_v32 = vld [vmem:[%s2602_s0 + $0x5d8] sm:$0xff] }
  0x98   :  { %843 = vmatprep.mubr.f32.mxu1 %v124_v34  ;;  %v202_v33 = vld [vmem:[%s2602_s0 + $0x5f8] sm:$0xff]  ;;  %v204_v34 = vld [vmem:[%s2602_s0 + $0x608] sm:$0xff] }
  0x9a   :  { %579 = vmatmul.mubr.f32.gmra.mxu0 %v121_v35  ;;  %v201_v35 = vld [vmem:[%s2602_s0 + $0x5f0] sm:$0xff] }
  0x9b   :  { %844 = vmatmul.mubr.f32.gmra.mxu1 %v123_v36  ;;  %583 = vmatprep.mubr.f32.mxu0 %v127_v37  ;;  %v203_v36 = vld [vmem:[%s2602_s0 + $0x600] sm:$0xff] }
  0x9c   :  { %848 = vmatprep.mubr.f32.mxu1 %v129_v38  ;;  %v207_v37 = vld [vmem:[%s2602_s0 + $0x620] sm:$0xff]  ;;  %v209_v38 = vld [vmem:[%s2602_s0 + $0x630] sm:$0xff] }
  0x9e   :  { %584 = vmatmul.mubr.f32.gmra.mxu0 %v126_v39  ;;  %v206_v39 = vld [vmem:[%s2602_s0 + $0x618] sm:$0xff] }
  0x9f   :  { %849 = vmatmul.mubr.f32.gmra.mxu1 %v128_v40  ;;  %588 = vmatprep.mubr.f32.mxu0 %v132_v41  ;;  %v208_v40 = vld [vmem:[%s2602_s0 + $0x628] sm:$0xff]  ;;  %v15_v41 = vld [vmem:[%s2602_s0 + $0x20] sm:$0xff] }
  0xa0   :  { %853 = vmatprep.mubr.f32.mxu1 %v134_v42  ;;  %v115_v42 = vld [vmem:[%s2602_s0 + $0x340] sm:$0xff] }
  0xa2   :  { %589 = vmatmul.mubr.f32.gmra.mxu0 %v131_v43  ;;  %v20_v43 = vld [vmem:[%s2602_s0 + $0x48] sm:$0xff] }
  0xa3   :  { %854 = vmatmul.mubr.f32.gmra.mxu1 %v133_v44  ;;  %593 = vmatprep.mubr.f32.mxu0 %v137_v45  ;;  %v120_v44 = vld [vmem:[%s2602_s0 + $0x368] sm:$0xff]  ;;  %v25_v45 = vld [vmem:[%s2602_s0 + $0x70] sm:$0xff] }
  0xa4   :  { %858 = vmatprep.mubr.f32.mxu1 %v139_v46  ;;  %v125_v46 = vld [vmem:[%s2602_s0 + $0x390] sm:$0xff] }
  0xa6   :  { %594 = vmatmul.mubr.f32.gmra.mxu0 %v136_v47  ;;  %v30_v47 = vld [vmem:[%s2602_s0 + $0x98] sm:$0xff] }
  0xa7   :  { %859 = vmatmul.mubr.f32.gmra.mxu1 %v138_v48  ;;  %598 = vmatprep.mubr.f32.mxu0 %v142_v49  ;;  %v130_v48 = vld [vmem:[%s2602_s0 + $0x3b8] sm:$0xff]  ;;  %v35_v49 = vld [vmem:[%s2602_s0 + $0xc0] sm:$0xff] }
  0xa8   :  { %863 = vmatprep.mubr.f32.mxu1 %v144_v50  ;;  %v135_v50 = vld [vmem:[%s2602_s0 + $0x3e0] sm:$0xff] }
  0xaa   :  { %599 = vmatmul.mubr.f32.gmra.mxu0 %v141_v51  ;;  %v40_v51 = vld [vmem:[%s2602_s0 + $0xe8] sm:$0xff] }
  0xab   :  { %864 = vmatmul.mubr.f32.gmra.mxu1 %v143_v52  ;;  %603 = vmatprep.mubr.f32.mxu0 %v147_v53  ;;  %v140_v52 = vld [vmem:[%s2602_s0 + $0x408] sm:$0xff]  ;;  %v45_v53 = vld [vmem:[%s2602_s0 + $0x110] sm:$0xff] }
  0xac   :  { %868 = vmatprep.mubr.f32.mxu1 %v149_v54  ;;  %v145_v54 = vld [vmem:[%s2602_s0 + $0x430] sm:$0xff] }
  0xae   :  { %604 = vmatmul.mubr.f32.gmra.mxu0 %v146_v55  ;;  %v50_v55 = vld [vmem:[%s2602_s0 + $0x138] sm:$0xff] }
  0xaf   :  { %869 = vmatmul.mubr.f32.gmra.mxu1 %v148_v56  ;;  %608 = vmatprep.mubr.f32.mxu0 %v152_v57  ;;  %v150_v56 = vld [vmem:[%s2602_s0 + $0x458] sm:$0xff]  ;;  %v55_v57 = vld [vmem:[%s2602_s0 + $0x160] sm:$0xff] }
  0xb0   :  { %873 = vmatprep.mubr.f32.mxu1 %v154_v58  ;;  %v155_v58 = vld [vmem:[%s2602_s0 + $0x480] sm:$0xff] }
  0xb2   :  { %609 = vmatmul.mubr.f32.gmra.mxu0 %v151_v59  ;;  %v60_v59 = vld [vmem:[%s2602_s0 + $0x188] sm:$0xff] }
  0xb3   :  { %874 = vmatmul.mubr.f32.gmra.mxu1 %v153_v60  ;;  %613 = vmatprep.mubr.f32.mxu0 %v157_v61  ;;  %v160_v60 = vld [vmem:[%s2602_s0 + $0x4a8] sm:$0xff]  ;;  %v65_v61 = vld [vmem:[%s2602_s0 + $0x1b0] sm:$0xff] }
  0xb4   :  { %878 = vmatprep.mubr.f32.mxu1 %v159_v62  ;;  %v165_v62 = vld [vmem:[%s2602_s0 + $0x4d0] sm:$0xff] }
  0xb6   :  { %614 = vmatmul.mubr.f32.gmra.mxu0 %v156_v63  ;;  %v70_v63 = vld [vmem:[%s2602_s0 + $0x1d8] sm:$0xff] }
  0xb7   :  { %879 = vmatmul.mubr.f32.gmra.mxu1 %v158_v1  ;;  %618 = vmatprep.mubr.f32.mxu0 %v162_v2  ;;  %v170_v1 = vld [vmem:[%s2602_s0 + $0x4f8] sm:$0xff]  ;;  %v75_v2 = vld [vmem:[%s2602_s0 + $0x200] sm:$0xff] }
  0xb8   :  { %883 = vmatprep.mubr.f32.mxu1 %v164_v3  ;;  %v175_v3 = vld [vmem:[%s2602_s0 + $0x520] sm:$0xff] }
  0xba   :  { %619 = vmatmul.mubr.f32.gmra.mxu0 %v161_v4  ;;  %v80_v4 = vld [vmem:[%s2602_s0 + $0x228] sm:$0xff] }
  0xbb   :  { %884 = vmatmul.mubr.f32.gmra.mxu1 %v163_v5  ;;  %623 = vmatprep.mubr.f32.mxu0 %v167_v6  ;;  %v180_v5 = vld [vmem:[%s2602_s0 + $0x548] sm:$0xff]  ;;  %v85_v6 = vld [vmem:[%s2602_s0 + $0x250] sm:$0xff] }
  0xbc   :  { %888 = vmatprep.mubr.f32.mxu1 %v169_v0  ;;  %v185_v0 = vld [vmem:[%s2602_s0 + $0x570] sm:$0xff] }
  0xbe   :  { %624 = vmatmul.mubr.f32.gmra.mxu0 %v166_v7  ;;  %v90_v7 = vld [vmem:[%s2602_s0 + $0x278] sm:$0xff] }
  0xbf   :  { %889 = vmatmul.mubr.f32.gmra.mxu1 %v168_v8  ;;  %628 = vmatprep.mubr.f32.mxu0 %v172_v9  ;;  %v190_v8 = vld [vmem:[%s2602_s0 + $0x598] sm:$0xff]  ;;  %v95_v9 = vld [vmem:[%s2602_s0 + $0x2a0] sm:$0xff] }
  0xc0   :  { %893 = vmatprep.mubr.f32.mxu1 %v174_v10  ;;  %v195_v10 = vld [vmem:[%s2602_s0 + $0x5c0] sm:$0xff] }
  0xc2   :  { %629 = vmatmul.mubr.f32.gmra.mxu0 %v171_v11  ;;  %v100_v11 = vld [vmem:[%s2602_s0 + $0x2c8] sm:$0xff] }
  0xc3   :  { %894 = vmatmul.mubr.f32.gmra.mxu1 %v173_v12  ;;  %633 = vmatprep.mubr.f32.mxu0 %v177_v13  ;;  %v200_v12 = vld [vmem:[%s2602_s0 + $0x5e8] sm:$0xff]  ;;  %v105_v13 = vld [vmem:[%s2602_s0 + $0x2f0] sm:$0xff] }
  0xc4   :  { %898 = vmatprep.mubr.f32.mxu1 %v179_v14  ;;  %v205_v14 = vld [vmem:[%s2602_s0 + $0x610] sm:$0xff] }
  0xc6   :  { %634 = vmatmul.mubr.f32.gmra.mxu0 %v176_v15 }
  0xc7   :  { %899 = vmatmul.mubr.f32.gmra.mxu1 %v178_v16  ;;  %638 = vmatprep.mubr.f32.mxu0 %v182_v17 }
  0xc8   :  { %903 = vmatprep.mubr.f32.mxu1 %v184_v18  ;;  %v110_v18 = vld [vmem:[%s2602_s0 + $0x318] sm:$0xff] }
  0xca   :  { %639 = vmatmul.mubr.f32.gmra.mxu0 %v181_v19  ;;  %v210_v19 = vld [vmem:[%s2602_s0 + $0x638] sm:$0xff] }
  0xcb   :  { %904 = vmatmul.mubr.f32.gmra.mxu1 %v183_v20  ;;  %643 = vmatprep.mubr.f32.mxu0 %v187_v21 }
  0xcc   :  { %908 = vmatprep.mubr.f32.mxu1 %v189_v22 }
  0xce   :  { %644 = vmatmul.mubr.f32.gmra.mxu0 %v186_v23 }
  0xcf   :  { %909 = vmatmul.mubr.f32.gmra.mxu1 %v188_v24  ;;  %648 = vmatprep.mubr.f32.mxu0 %v192_v25 }
  0xd0   :  { %913 = vmatprep.mubr.f32.mxu1 %v194_v26 }
  0xd2   :  { %649 = vmatmul.mubr.f32.gmra.mxu0 %v191_v27 }
  0xd3   :  { %914 = vmatmul.mubr.f32.gmra.mxu1 %v193_v28  ;;  %653 = vmatprep.mubr.f32.mxu0 %v197_v29 }
  0xd4   :  { %918 = vmatprep.mubr.f32.mxu1 %v199_v30 }
  0xd6   :  { %654 = vmatmul.mubr.f32.gmra.mxu0 %v196_v31 }
  0xd7   :  { %919 = vmatmul.mubr.f32.gmra.mxu1 %v198_v32  ;;  %658 = vmatprep.mubr.f32.mxu0 %v202_v33 }
  0xd8   :  { %923 = vmatprep.mubr.f32.mxu1 %v204_v34 }
  0xda   :  { %659 = vmatmul.mubr.f32.gmra.mxu0 %v201_v35 }
  0xdb   :  { %924 = vmatmul.mubr.f32.gmra.mxu1 %v203_v36  ;;  %663 = vmatprep.mubr.f32.mxu0 %v207_v37 }
  0xdc   :  { %928 = vmatprep.mubr.f32.mxu1 %v209_v38 }
  0xde   :  { %664 = vmatmul.mubr.f32.gmra.mxu0 %v206_v39 }
  0xdf   :  { %929 = vmatmul.mubr.f32.gmra.mxu1 %v208_v40  ;;  %1387 = vmatprep.mubr.msk.f32.mxu0 %vm283_vm0, %v15_v41 }
  0xe0   :  { %1417 = vmatprep.mubr.msk.f32.mxu1 %vm283_vm0, %v115_v42 }
  0xe2   :  { %1388 = vmatmul.mubr.msk.f32.vlgmr.msra.gmra.mxu0 %vm283_vm0, %v20_v43 }
  0xe3   :  { %1418 = vmatmul.mubr.msk.f32.vlgmr.msra.gmra.mxu1 %vm283_vm0, %v120_v44  ;;  %1390 = vmatprep.mubr.msk.f32.mxu0 %vm283_vm0, %v25_v45 }
  0xe4   :  { %1420 = vmatprep.mubr.msk.f32.mxu1 %vm283_vm0, %v125_v46 }
  0xe6   :  { %1391 = vmatmul.mubr.msk.f32.gmra.mxu0 %vm283_vm0, %v30_v47 }
  0xe7   :  { %1421 = vmatmul.mubr.msk.f32.gmra.mxu1 %vm283_vm0, %v130_v48  ;;  %1393 = vmatprep.mubr.msk.f32.mxu0 %vm283_vm0, %v35_v49 }
  0xe8   :  { %1423 = vmatprep.mubr.msk.f32.mxu1 %vm283_vm0, %v135_v50 }
  0xea   :  { %1394 = vmatmul.mubr.msk.f32.gmra.mxu0 %vm283_vm0, %v40_v51 }
  0xeb   :  { %1424 = vmatmul.mubr.msk.f32.gmra.mxu1 %vm283_vm0, %v140_v52  ;;  %1396 = vmatprep.mubr.msk.f32.mxu0 %vm283_vm0, %v45_v53 }
  0xec   :  { %1426 = vmatprep.mubr.msk.f32.mxu1 %vm283_vm0, %v145_v54 }
  0xee   :  { %1397 = vmatmul.mubr.msk.f32.gmra.mxu0 %vm283_vm0, %v50_v55 }
  0xef   :  { %1427 = vmatmul.mubr.msk.f32.gmra.mxu1 %vm283_vm0, %v150_v56  ;;  %1399 = vmatprep.mubr.msk.f32.mxu0 %vm283_vm0, %v55_v57 }
  0xf0   :  { %1429 = vmatprep.mubr.msk.f32.mxu1 %vm283_vm0, %v155_v58 }
  0xf2   :  { %1400 = vmatmul.mubr.msk.f32.gmra.mxu0 %vm283_vm0, %v60_v59 }
  0xf3   :  { %1430 = vmatmul.mubr.msk.f32.gmra.mxu1 %vm283_vm0, %v160_v60  ;;  %1402 = vmatprep.mubr.msk.f32.mxu0 %vm283_vm0, %v65_v61 }
  0xf4   :  { %1432 = vmatprep.mubr.msk.f32.mxu1 %vm283_vm0, %v165_v62 }
  0xf6   :  { %1403 = vmatmul.mubr.msk.f32.gmra.mxu0 %vm283_vm0, %v70_v63 }
  0xf7   :  { %1433 = vmatmul.mubr.msk.f32.gmra.mxu1 %vm283_vm0, %v170_v1  ;;  %1405 = vmatprep.mubr.msk.f32.mxu0 %vm283_vm0, %v75_v2 }
  0xf8   :  { %1435 = vmatprep.mubr.msk.f32.mxu1 %vm283_vm0, %v175_v3 }
  0xfa   :  { %1406 = vmatmul.mubr.msk.f32.gmra.mxu0 %vm283_vm0, %v80_v4 }
  0xfb   :  { %1436 = vmatmul.mubr.msk.f32.gmra.mxu1 %vm283_vm0, %v180_v5  ;;  %1408 = vmatprep.mubr.msk.f32.mxu0 %vm283_vm0, %v85_v6 }
  0xfc   :  { %1438 = vmatprep.mubr.msk.f32.mxu1 %vm283_vm0, %v185_v0 }
  0xfe   :  { %1409 = vmatmul.mubr.msk.f32.gmra.mxu0 %vm283_vm0, %v90_v7 }
  0xff   :  { %1439 = vmatmul.mubr.msk.f32.gmra.mxu1 %vm283_vm0, %v190_v8  ;;  %1411 = vmatprep.mubr.msk.f32.mxu0 %vm283_vm0, %v95_v9 }
 0x100   :  { %1441 = vmatprep.mubr.msk.f32.mxu1 %vm283_vm0, %v195_v10 }
 0x102   :  { %v470_v15 = vpop.f32.mrf.mxu0  ;;  %1412 = vmatmul.mubr.msk.f32.gmra.mxu0 %vm283_vm0, %v100_v11 }
 0x103   :  { %v735_v16 = vpop.f32.mrf.mxu1  ;;  %1442 = vmatmul.mubr.msk.f32.gmra.mxu1 %vm283_vm0, %v200_v12  ;;  %1414 = vmatprep.mubr.msk.f32.mxu0 %vm283_vm0, %v105_v13 }
 0x104   :  { %v2390_v17 = vadd.f32 %v735_v16, %v470_v15  ;;  %1444 = vmatprep.mubr.msk.f32.mxu1 %vm283_vm0, %v205_v14  ;;  %v472_v20 = vpop.f32.mrf.mxu0 }
 0x105   :  { %v737_v21 = vpop.f32.mrf.mxu1 }
 0x106   :  { %v475_v22 = vpop.f32.mrf.mxu0  ;;  %1415 = vmatmul.mubr.msk.f32.gmra.mxu0 %vm283_vm0, %v110_v18 }
 0x107   :  { %v740_v23 = vpop.f32.mrf.mxu1  ;;  %1445 = vmatmul.mubr.msk.f32.gmra.mxu1 %vm283_vm0, %v210_v19 }
 0x108   :  { %v2402_v24 = vadd.f32 %v740_v23, %v475_v22  ;;  %v477_v25 = vpop.f32.mrf.mxu0 }
 0x109   :  { %v742_v26 = vpop.f32.mrf.mxu1 }
 0x10a   :  { %v480_v27 = vpop.f32.mrf.mxu0 }
 0x10b   :  { %v745_v28 = vpop.f32.mrf.mxu1 }
 0x10c   :  { %v2404_v29 = vadd.f32 %v745_v28, %v480_v27  ;;  %v482_v30 = vpop.f32.mrf.mxu0 }
 0x10d   :  { %v747_v31 = vpop.f32.mrf.mxu1 }
 0x10e   :  { %v485_v32 = vpop.f32.mrf.mxu0 }
 0x10f   :  { %v750_v33 = vpop.f32.mrf.mxu1 }
 0x110   :  { %v2406_v34 = vadd.f32 %v750_v33, %v485_v32  ;;  %v487_v35 = vpop.f32.mrf.mxu0 }
 0x111   :  { %v752_v36 = vpop.f32.mrf.mxu1 }
 0x112   :  { %v490_v37 = vpop.f32.mrf.mxu0 }
 0x113   :  { %v755_v38 = vpop.f32.mrf.mxu1 }
 0x114   :  { %v2408_v39 = vadd.f32 %v755_v38, %v490_v37  ;;  %v492_v40 = vpop.f32.mrf.mxu0 }
 0x115   :  { %v757_v41 = vpop.f32.mrf.mxu1 }
 0x116   :  { %v495_v42 = vpop.f32.mrf.mxu0 }
 0x117   :  { %v760_v43 = vpop.f32.mrf.mxu1 }
 0x118   :  { %v2410_v44 = vadd.f32 %v760_v43, %v495_v42  ;;  %v497_v45 = vpop.f32.mrf.mxu0 }
 0x119   :  { %v762_v46 = vpop.f32.mrf.mxu1 }
 0x11a   :  { %v500_v47 = vpop.f32.mrf.mxu0 }
 0x11b   :  { %v765_v48 = vpop.f32.mrf.mxu1 }
 0x11c   :  { %v2412_v49 = vadd.f32 %v765_v48, %v500_v47  ;;  %v502_v50 = vpop.f32.mrf.mxu0 }
 0x11d   :  { %v767_v51 = vpop.f32.mrf.mxu1 }
 0x11e   :  { %v505_v52 = vpop.f32.mrf.mxu0 }
 0x11f   :  { %v770_v53 = vpop.f32.mrf.mxu1 }
 0x120   :  { %v2414_v54 = vadd.f32 %v770_v53, %v505_v52  ;;  %v507_v55 = vpop.f32.mrf.mxu0 }
 0x121   :  { %v772_v56 = vpop.f32.mrf.mxu1 }
 0x122   :  { %v510_v57 = vpop.f32.mrf.mxu0 }
 0x123   :  { %v775_v58 = vpop.f32.mrf.mxu1 }
 0x124   :  { %v2416_v59 = vadd.f32 %v775_v58, %v510_v57  ;;  %v512_v60 = vpop.f32.mrf.mxu0 }
 0x125   :  { %v777_v61 = vpop.f32.mrf.mxu1 }
 0x126   :  { %v515_v62 = vpop.f32.mrf.mxu0 }
 0x127   :  { %v780_v63 = vpop.f32.mrf.mxu1 }
 0x128   :  { %v2418_v1 = vadd.f32 %v780_v63, %v515_v62  ;;  %v517_v2 = vpop.f32.mrf.mxu0 }
 0x129   :  { %v782_v3 = vpop.f32.mrf.mxu1 }
 0x12a   :  { %v520_v4 = vpop.f32.mrf.mxu0 }
 0x12b   :  { %v785_v5 = vpop.f32.mrf.mxu1 }
 0x12c   :  { %v2420_v6 = vadd.f32 %v785_v5, %v520_v4  ;;  %v522_v0 = vpop.f32.mrf.mxu0 }
 0x12d   :  { %v787_v7 = vpop.f32.mrf.mxu1 }
 0x12e   :  { %v525_v8 = vpop.f32.mrf.mxu0 }
 0x12f   :  { %v790_v9 = vpop.f32.mrf.mxu1 }
 0x130   :  { %v2422_v10 = vadd.f32 %v790_v9, %v525_v8  ;;  %v527_v11 = vpop.f32.mrf.mxu0 }
 0x131   :  { %v792_v12 = vpop.f32.mrf.mxu1 }
 0x132   :  { %v530_v13 = vpop.f32.mrf.mxu0 }
 0x133   :  { %v795_v14 = vpop.f32.mrf.mxu1 }
 0x134   :  { %v2424_v15 = vadd.f32 %v795_v14, %v530_v13  ;;  %v532_v16 = vpop.f32.mrf.mxu0 }
 0x135   :  { %v797_v18 = vpop.f32.mrf.mxu1 }
 0x136   :  { %v535_v19 = vpop.f32.mrf.mxu0 }
 0x137   :  { %v800_v20 = vpop.f32.mrf.mxu1 }
 0x138   :  { %v2426_v21 = vadd.f32 %v800_v20, %v535_v19  ;;  %v537_v22 = vpop.f32.mrf.mxu0 }
 0x139   :  { %v802_v23 = vpop.f32.mrf.mxu1 }
 0x13a   :  { %v540_v25 = vpop.f32.mrf.mxu0 }
 0x13b   :  { %v805_v26 = vpop.f32.mrf.mxu1 }
 0x13c   :  { %v2428_v27 = vadd.f32 %v805_v26, %v540_v25  ;;  %v542_v28 = vpop.f32.mrf.mxu0 }
 0x13d   :  { %v807_v30 = vpop.f32.mrf.mxu1 }
 0x13e   :  { %2604 = vst [vmem:[#allocation2_spill] sm:$0xff] %v2428_v27  ;;  %v545_v31 = vpop.f32.mrf.mxu0 }
 0x13f   :  { %v810_v32 = vpop.f32.mrf.mxu1 }
 0x140   :  { %v2430_v33 = vadd.f32 %v810_v32, %v545_v31  ;;  %v547_v35 = vpop.f32.mrf.mxu0 }
 0x141   :  { %v812_v36 = vpop.f32.mrf.mxu1 }
 0x142   :  { %v550_v37 = vpop.f32.mrf.mxu0 }
 0x143   :  { %v815_v38 = vpop.f32.mrf.mxu1 }
 0x144   :  { %v2432_v40 = vadd.f32 %v815_v38, %v550_v37  ;;  %v552_v41 = vpop.f32.mrf.mxu0 }
 0x145   :  { %v817_v42 = vpop.f32.mrf.mxu1 }
 0x146   :  { %2605 = vst [vmem:[#allocation3_spill] sm:$0xff] %v2432_v40  ;;  %v555_v43 = vpop.f32.mrf.mxu0 }
 0x147   :  { %v820_v45 = vpop.f32.mrf.mxu1 }
 0x148   :  { %v2434_v46 = vadd.f32 %v820_v45, %v555_v43  ;;  %v557_v47 = vpop.f32.mrf.mxu0 }
 0x149   :  { %v822_v48 = vpop.f32.mrf.mxu1 }
 0x14a   :  { %2606 = vst [vmem:[#allocation4_spill] sm:$0xff] %v2434_v46  ;;  %v560_v50 = vpop.f32.mrf.mxu0 }
 0x14b   :  { %v825_v51 = vpop.f32.mrf.mxu1 }
 0x14c   :  { %v2436_v52 = vadd.f32 %v825_v51, %v560_v50  ;;  %v562_v53 = vpop.f32.mrf.mxu0 }
 0x14d   :  { %v827_v55 = vpop.f32.mrf.mxu1 }
 0x14e   :  { %2607 = vst [vmem:[#allocation5_spill] sm:$0xff] %v2436_v52  ;;  %v565_v56 = vpop.f32.mrf.mxu0 }
 0x14f   :  { %v830_v57 = vpop.f32.mrf.mxu1 }
 0x150   :  { %v2438_v58 = vadd.f32 %v830_v57, %v565_v56  ;;  %v567_v60 = vpop.f32.mrf.mxu0 }
 0x151   :  { %v832_v61 = vpop.f32.mrf.mxu1 }
 0x152   :  { %2608 = vst [vmem:[#allocation6_spill] sm:$0xff] %v2438_v58  ;;  %v570_v62 = vpop.f32.mrf.mxu0 }
 0x153   :  { %v835_v63 = vpop.f32.mrf.mxu1 }
 0x154   :  { %v2440_v2 = vadd.f32 %v835_v63, %v570_v62  ;;  %v572_v3 = vpop.f32.mrf.mxu0 }
 0x155   :  { %v837_v4 = vpop.f32.mrf.mxu1 }
 0x156   :  { %v575_v5 = vpop.f32.mrf.mxu0 }
 0x157   :  { %v840_v0 = vpop.f32.mrf.mxu1 }
 0x158   :  { %v2442_v7 = vadd.f32 %v840_v0, %v575_v5  ;;  %v577_v8 = vpop.f32.mrf.mxu0 }
 0x159   :  { %v842_v9 = vpop.f32.mrf.mxu1 }
 0x15a   :  { %v580_v11 = vpop.f32.mrf.mxu0 }
 0x15b   :  { %v845_v12 = vpop.f32.mrf.mxu1 }
 0x15c   :  { %v2444_v13 = vadd.f32 %v845_v12, %v580_v11  ;;  %v582_v14 = vpop.f32.mrf.mxu0 }
 0x15d   :  { %v847_v16 = vpop.f32.mrf.mxu1 }
 0x15e   :  { %v585_v18 = vpop.f32.mrf.mxu0 }
 0x15f   :  { %v850_v19 = vpop.f32.mrf.mxu1 }
 0x160   :  { %v2446_v20 = vadd.f32 %v850_v19, %v585_v18  ;;  %v587_v22 = vpop.f32.mrf.mxu0 }
 0x161   :  { %v852_v23 = vpop.f32.mrf.mxu1 }
 0x162   :  { %v590_v25 = vpop.f32.mrf.mxu0 }
 0x163   :  { %v855_v26 = vpop.f32.mrf.mxu1 }
 0x164   :  { %v2448_v28 = vadd.f32 %v855_v26, %v590_v25  ;;  %v592_v30 = vpop.f32.mrf.mxu0 }
 0x165   :  { %v857_v31 = vpop.f32.mrf.mxu1 }
 0x166   :  { %v595_v32 = vpop.f32.mrf.mxu0 }
 0x167   :  { %v860_v35 = vpop.f32.mrf.mxu1 }
 0x168   :  { %v2450_v36 = vadd.f32 %v860_v35, %v595_v32  ;;  %v597_v37 = vpop.f32.mrf.mxu0 }
 0x169   :  { %v862_v38 = vpop.f32.mrf.mxu1 }
 0x16a   :  { %v600_v41 = vpop.f32.mrf.mxu0 }
 0x16b   :  { %v865_v42 = vpop.f32.mrf.mxu1 }
 0x16c   :  { %v2452_v43 = vadd.f32 %v865_v42, %v600_v41  ;;  %v602_v45 = vpop.f32.mrf.mxu0 }
 0x16d   :  { %v867_v47 = vpop.f32.mrf.mxu1 }
 0x16e   :  { %v605_v48 = vpop.f32.mrf.mxu0 }
 0x16f   :  { %v870_v50 = vpop.f32.mrf.mxu1 }
 0x170   :  { %v2454_v51 = vadd.f32 %v870_v50, %v605_v48  ;;  %v607_v53 = vpop.f32.mrf.mxu0 }
 0x171   :  { %v872_v55 = vpop.f32.mrf.mxu1 }
 0x172   :  { %v610_v56 = vpop.f32.mrf.mxu0 }
 0x173   :  { %v875_v57 = vpop.f32.mrf.mxu1 }
 0x174   :  { %v2456_v60 = vadd.f32 %v875_v57, %v610_v56  ;;  %v612_v61 = vpop.f32.mrf.mxu0 }
 0x175   :  { %v877_v62 = vpop.f32.mrf.mxu1 }
 0x176   :  { %v615_v63 = vpop.f32.mrf.mxu0 }
 0x177   :  { %v880_v3 = vpop.f32.mrf.mxu1 }
 0x178   :  { %v2458_v4 = vadd.f32 %v880_v3, %v615_v63  ;;  %v617_v5 = vpop.f32.mrf.mxu0 }
 0x179   :  { %v882_v0 = vpop.f32.mrf.mxu1 }
 0x17a   :  { %v620_v8 = vpop.f32.mrf.mxu0 }
 0x17b   :  { %v885_v9 = vpop.f32.mrf.mxu1 }
 0x17c   :  { %v2460_v11 = vadd.f32 %v885_v9, %v620_v8  ;;  %v622_v12 = vpop.f32.mrf.mxu0 }
 0x17d   :  { %v887_v14 = vpop.f32.mrf.mxu1 }
 0x17e   :  { %v625_v16 = vpop.f32.mrf.mxu0 }
 0x17f   :  { %v890_v18 = vpop.f32.mrf.mxu1 }
 0x180   :  { %v2462_v19 = vadd.f32 %v890_v18, %v625_v16  ;;  %v627_v22 = vpop.f32.mrf.mxu0 }
 0x181   :  { %v892_v23 = vpop.f32.mrf.mxu1 }
 0x182   :  { %v2464_v25 = vpop.f32.mrf.mxu0 }
 0x183   :  { %v2466_v26 = vpop.f32.mrf.mxu1 }
 0x184   :  { %v632_v30 = vpop.f32.mrf.mxu0 }
 0x185   :  { %v897_v31 = vpop.f32.mrf.mxu1 }
 0x186   :  { %v635_v32 = vpop.f32.mrf.mxu0 }
 0x187   :  { %v900_v35 = vpop.f32.mrf.mxu1 }
 0x188   :  { %v2468_v37 = vadd.f32 %v900_v35, %v635_v32  ;;  %v637_v38 = vpop.f32.mrf.mxu0 }
 0x189   :  { %v902_v41 = vpop.f32.mrf.mxu1 }
 0x18a   :  { %2609 = vst [vmem:[#allocation7_spill] sm:$0xff] %v2468_v37  ;;  %v2470_v42 = vpop.f32.mrf.mxu0 }
 0x18b   :  { %v2472_v45 = vpop.f32.mrf.mxu1 }
 0x18c   :  { %v642_v47 = vpop.f32.mrf.mxu0 }
 0x18d   :  { %v907_v48 = vpop.f32.mrf.mxu1 }
 0x18e   :  { %v2474_v50 = vpop.f32.mrf.mxu0 }
 0x18f   :  { %v2476_v53 = vpop.f32.mrf.mxu1 }
 0x190   :  { %v647_v55 = vpop.f32.mrf.mxu0 }
 0x191   :  { %v912_v56 = vpop.f32.mrf.mxu1 }
 0x192   :  { %v2478_v57 = vpop.f32.mrf.mxu0 }
 0x193   :  { %v2480_v61 = vpop.f32.mrf.mxu1 }
 0x194   :  { %v652_v62 = vpop.f32.mrf.mxu0 }
 0x195   :  { %v917_v63 = vpop.f32.mrf.mxu1 }
 0x196   :  { %v2482_v3 = vpop.f32.mrf.mxu0 }
 0x197   :  { %v2484_v5 = vpop.f32.mrf.mxu1 }
 0x198   :  { %v657_v0 = vpop.f32.mrf.mxu0 }
 0x199   :  { %v922_v8 = vpop.f32.mrf.mxu1 }
 0x19a   :  { %v2486_v9 = vpop.f32.mrf.mxu0 }
 0x19b   :  { %v2488_v12 = vpop.f32.mrf.mxu1 }
 0x19c   :  { %v662_v14 = vpop.f32.mrf.mxu0 }
 0x19d   :  { %v927_v16 = vpop.f32.mrf.mxu1 }
 0x19e   :  { %v2490_v18 = vpop.f32.mrf.mxu0 }
 0x19f   :  { %v2492_v22 = vpop.f32.mrf.mxu1 }
 0x1a0   :  { %v667_v23 = vpop.f32.mrf.mxu0 }
 0x1a1   :  { %v932_v30 = vpop.f32.mrf.mxu1 }
 0x1a2   :  { %v1389_v31 = vpop.f32.mrf.mxu0 }
 0x1a3   :  { %v1419_v32 = vpop.f32.mrf.mxu1  ;;  %v1006_v8 = vadd.f32 %v1389_v31, %v2402_v24 }
 0x1a4   :  { %v1000_v35 = vpop.f32.mrf.mxu0  ;;  %v1106_v14 = vadd.f32 %v1419_v32, %v2442_v7 }
 0x1a5   :  { %v1100_v38 = vpop.f32.mrf.mxu1  ;;  %v1001_v56 = vadd.f32 %v1000_v35, %v2390_v17  ;;  %v1200_v37 = vmax.f32 %v1006_v8, 0.0 }
 0x1a6   :  { %v1392_v41 = vpop.f32.mrf.mxu0  ;;  %v1101_v62 = vadd.f32 %v1100_v38, %v2440_v2  ;;  %v1220_v24 = vmax.f32 %v1106_v14, 0.0 }
 0x1a7   :  { %v1422_v47 = vpop.f32.mrf.mxu1  ;;  %v1199_v58 = vmax.f32 %v1001_v56, 0.0 }
 0x1a8   :  { %v1010_v48 = vpop.f32.mrf.mxu0  ;;  %v1219_v40 = vmax.f32 %v1101_v62, 0.0 }
 0x1a9   :  { %v1110_v55 = vpop.f32.mrf.mxu1  ;;  %v1011_v17 = vadd.f32 %v1010_v48, %v2404_v29  ;;  %v1116_v48 = vadd.f32 %v1422_v47, %v2446_v20 }
 0x1aa   :  { %v1395_v63 = vpop.f32.mrf.mxu0  ;;  %v1111_v2 = vadd.f32 %v1110_v55, %v2444_v13  ;;  %v1016_v13 = vadd.f32 %v1392_v41, %v2406_v34 }
 0x1ab   :  { %v1425_v0 = vpop.f32.mrf.mxu1  ;;  %v1026_v16 = vadd.f32 %v1395_v63, %v2410_v44 }
 0x1ac   :  { %v1126_v23 = vadd.f32 %v1425_v0, %v2450_v36  ;;  %v1020_v30 = vpop.f32.mrf.mxu0 }
 0x1ad   :  { %v1120_v52 = vpop.f32.mrf.mxu1  ;;  %v1204_v46 = vmax.f32 %v1026_v16, 0.0  ;;  %v1021_v44 = vadd.f32 %v1020_v30, %v2408_v39 }
 0x1ae   :  { %v1224_v27 = vmax.f32 %v1126_v23, 0.0  ;;  %v1398_v35 = vpop.f32.mrf.mxu0  ;;  %v1121_v36 = vadd.f32 %v1120_v52, %v2448_v28 }
 0x1af   :  { %v1428_v38 = vpop.f32.mrf.mxu1  ;;  %v2502_v31 = vmax.f32 %v1199_v58, %v1204_v46  ;;  %v1036_v32 = vadd.f32 %v1398_v35, %v2414_v54  ;;  %v1203_v8 = vmax.f32 %v1021_v44, 0.0  ;;  %v1222_v44 = vmax.f32 %v1116_v48, 0.0 }
 0x1b0   :  { %v2504_v7 = vmax.f32 %v1219_v40, %v1224_v27  ;;  %v1136_v56 = vadd.f32 %v1428_v38, %v2454_v51  ;;  %v1030_v62 = vpop.f32.mrf.mxu0  ;;  %v1201_v27 = vmax.f32 %v1011_v17, 0.0  ;;  %v1221_v40 = vmax.f32 %v1111_v2, 0.0 }
 0x1b1   :  { %v1130_v29 = vpop.f32.mrf.mxu1  ;;  %v1031_v55 = vadd.f32 %v1030_v62, %v2412_v49  ;;  %v1206_v58 = vmax.f32 %v1036_v32, 0.0  ;;  %v1223_v34 = vmax.f32 %v1121_v36, 0.0  ;;  %v1202_v38 = vmax.f32 %v1016_v13, 0.0 }
 0x1b2   :  { %v1131_v46 = vadd.f32 %v1130_v29, %v2452_v43  ;;  %v1226_v39 = vmax.f32 %v1136_v56, 0.0  ;;  %v1401_v63 = vpop.f32.mrf.mxu0 }
 0x1b3   :  { %v1431_v52 = vpop.f32.mrf.mxu1  ;;  %v1205_v28 = vmax.f32 %v1031_v55, 0.0  ;;  %v1046_v51 = vadd.f32 %v1401_v63, %v2418_v1  ;;  %v2516_v41 = vmax.f32 %v1201_v27, %v1206_v58  ;;  %v896_v63 = vadd.f32 %v2466_v26, %v2464_v25 }
 0x1b4   :  { %v1225_v54 = vmax.f32 %v1131_v46, 0.0  ;;  %v1146_v0 = vadd.f32 %v1431_v52, %v2458_v4  ;;  %v2518_v20 = vmax.f32 %v1221_v40, %v1226_v39  ;;  %v1040_v49 = vpop.f32.mrf.mxu0  ;;  %v911_v46 = vadd.f32 %v2476_v53, %v2474_v50 }
 0x1b5   :  { %v1140_v43 = vpop.f32.mrf.mxu1  ;;  %v2520_v47 = vmax.f32 %v1200_v37, %v1205_v28  ;;  %v1208_v16 = vmax.f32 %v1046_v51, 0.0  ;;  %v1041_v30 = vadd.f32 %v1040_v49, %v2416_v59  ;;  %v906_v52 = vadd.f32 %v2472_v45, %v2470_v42 }
 0x1b6   :  { %v2522_v14 = vmax.f32 %v1220_v24, %v1225_v54  ;;  %v1228_v23 = vmax.f32 %v1146_v0, 0.0  ;;  %v1141_v1 = vadd.f32 %v1140_v43, %v2456_v60  ;;  %v1404_v17 = vpop.f32.mrf.mxu0  ;;  %v2612_v43 = vld [vmem:[#allocation4_spill] sm:$0xff] }
 0x1b7   :  { %v1434_v4 = vpop.f32.mrf.mxu1  ;;  %v2526_v2 = vmax.f32 %v1203_v8, %v1208_v16  ;;  %v1207_v36 = vmax.f32 %v1041_v30, 0.0  ;;  %v1056_v48 = vadd.f32 %v1404_v17, %v2422_v10  ;;  %v926_v10 = vadd.f32 %v2488_v12, %v2486_v9 }
 0x1b8   :  { %v2528_v35 = vmax.f32 %v1223_v34, %v1228_v23  ;;  %v1227_v32 = vmax.f32 %v1141_v1, 0.0  ;;  %v1050_v37 = vpop.f32.mrf.mxu0  ;;  %v1156_v40 = vadd.f32 %v1434_v4, %v2462_v19  ;;  %v931_v19 = vadd.f32 %v2492_v22, %v2490_v18  ;;  %v2611_v18 = vld [vmem:[#allocation2_spill] sm:$0xff]  ;;  %v2613_v4 = vld [vmem:[#allocation3_spill] sm:$0xff] }
 0x1b9   :  { %v1150_v56 = vpop.f32.mrf.mxu1  ;;  %v2530_v24 = vmax.f32 %v1202_v38, %v1207_v36  ;;  %v1051_v27 = vadd.f32 %v1050_v37, %v2420_v6  ;;  %v916_v6 = vadd.f32 %v2480_v61, %v2478_v57 }
 0x1ba   :  { %v2532_v62 = vmax.f32 %v1222_v44, %v1227_v32  ;;  %v1407_v29 = vpop.f32.mrf.mxu0  ;;  %v1151_v13 = vadd.f32 %v1150_v56, %v2460_v11  ;;  %v921_v11 = vadd.f32 %v2484_v5, %v2482_v3  ;;  %v1230_v51 = vmax.f32 %v1156_v40, 0.0  ;;  %v2610_v5 = vld [vmem:[#allocation7_spill] sm:$0xff] }
 0x1bb   :  { %v1437_v59 = vpop.f32.mrf.mxu1  ;;  %v1209_v26 = vmax.f32 %v1051_v27, 0.0  ;;  %v1066_v3 = vadd.f32 %v1407_v29, %v2426_v21 }
 0x1bc   :  { %v1060_v55 = vpop.f32.mrf.mxu0  ;;  %v1229_v53 = vmax.f32 %v1151_v13, 0.0  ;;  %v1166_v9 = vadd.f32 %v1437_v59, %v2610_v5 }
 0x1bd   :  { %v1160_v60 = vpop.f32.mrf.mxu1  ;;  %v1061_v0 = vadd.f32 %v1060_v55, %v2424_v15 }
 0x1be   :  { %v1410_v58 = vpop.f32.mrf.mxu0  ;;  %v1161_v57 = vadd.f32 %v1160_v60, %v896_v63 }
 0x1bf   :  { %v1440_v39 = vpop.f32.mrf.mxu1  ;;  %v1076_v28 = vadd.f32 %v1410_v58, %v2430_v33  ;;  %v1210_v33 = vmax.f32 %v1056_v48, 0.0  ;;  %v1211_v21 = vmax.f32 %v1061_v0, 0.0  ;;  %v1232_v0 = vmax.f32 %v1166_v9, 0.0 }
 0x1c0   :  { %v1176_v54 = vadd.f32 %v1440_v39, %v911_v46  ;;  %v1070_v50 = vpop.f32.mrf.mxu0  ;;  %v1231_v36 = vmax.f32 %v1161_v57, 0.0 }
 0x1c1   :  { %v1170_v25 = vpop.f32.mrf.mxu1  ;;  %v1214_v42 = vmax.f32 %v1076_v28, 0.0  ;;  %v1071_v22 = vadd.f32 %v1070_v50, %v2611_v18 }
 0x1c2   :  { %v1234_v45 = vmax.f32 %v1176_v54, 0.0  ;;  %v1413_v61 = vpop.f32.mrf.mxu0  ;;  %v1171_v49 = vadd.f32 %v1170_v25, %v906_v52 }
 0x1c3   :  { %v1443_v8 = vpop.f32.mrf.mxu1  ;;  %v1249_v12 = vmax.f32 %v1209_v26, %v1214_v42  ;;  %v1086_v16 = vadd.f32 %v1413_v61, %v2612_v43  ;;  %v1213_v46 = vmax.f32 %v1071_v22, 0.0 }
 0x1c4   :  { %v1254_v34 = vmax.f32 %v1229_v53, %v1234_v45  ;;  %v1186_v23 = vadd.f32 %v1443_v8, %v921_v11  ;;  %v1080_v30 = vpop.f32.mrf.mxu0  ;;  %v1233_v27 = vmax.f32 %v1171_v49, 0.0  ;;  %v2615_v11 = vld [vmem:[#allocation5_spill] sm:$0xff]  ;;  %v1212_v45 = vmax.f32 %v1066_v3, 0.0 }
 0x1c5   :  { %v1180_v1 = vpop.f32.mrf.mxu1  ;;  %v1259_v17 = vmax.f32 %v2502_v31, %v1249_v12  ;;  %v1081_v38 = vadd.f32 %v1080_v30, %v2613_v4  ;;  %v1216_v32 = vmax.f32 %v1086_v16, 0.0 }
 0x1c6   :  { %v1264_v15 = vmax.f32 %v2504_v7, %v1254_v34  ;;  %v1181_v44 = vadd.f32 %v1180_v1, %v916_v6  ;;  %v1236_v37 = vmax.f32 %v1186_v23, 0.0  ;;  %v1416_v56 = vpop.f32.mrf.mxu0  ;;  %v2614_v7 = vld [vmem:[#allocation6_spill] sm:$0xff] }
 0x1c7   :  { %v1446_v29 = vpop.f32.mrf.mxu1  ;;  %1269 = vst [vmem:[%s2603_s2] sm:$0xff] %v1259_v17  ;;  %v1215_v31 = vmax.f32 %v1081_v38, 0.0  ;;  %v1096_v55 = vadd.f32 %v1416_v56, %v2614_v7  ;;  %v1251_v13 = vmax.f32 %v1211_v21, %v1216_v32 }
 0x1c8   :  { %1274 = vst [vmem:[%s2603_s2 + $0x28] sm:$0xff] %v1264_v15  ;;  %v1235_v59 = vmax.f32 %v1181_v44, 0.0  ;;  %v1196_v60 = vadd.f32 %v1446_v29, %v931_v19  ;;  %v1256_v48 = vmax.f32 %v1231_v36, %v1236_v37  ;;  %v1090_v40 = vpop.f32.mrf.mxu0 }
 0x1c9   :  { %v1190_v58 = vpop.f32.mrf.mxu1  ;;  %v1250_v39 = vmax.f32 %v1210_v33, %v1215_v31  ;;  %v1218_v52 = vmax.f32 %v1096_v55, 0.0  ;;  %v1261_v54 = vmax.f32 %v2516_v41, %v1251_v13  ;;  %v1091_v50 = vadd.f32 %v1090_v40, %v2615_v11 }
 0x1ca   :  { %v1255_v63 = vmax.f32 %v1230_v51, %v1235_v59  ;;  %v1238_v28 = vmax.f32 %v1196_v60, 0.0  ;;  %v1266_v6 = vmax.f32 %v2518_v20, %v1256_v48  ;;  %v1191_v25 = vadd.f32 %v1190_v58, %v926_v10 }
 0x1cb   :  { %v1260_v26 = vmax.f32 %v2520_v47, %v1250_v39  ;;  %v1253_v53 = vmax.f32 %v1213_v46, %v1218_v52  ;;  %1271 = vst [vmem:[%s2603_s2 + $0x10] sm:$0xff] %v1261_v54  ;;  %v1217_v41 = vmax.f32 %v1091_v50, 0.0 }
 0x1cc   :  { %v1265_v19 = vmax.f32 %v2522_v14, %v1255_v63  ;;  %v1258_v42 = vmax.f32 %v1233_v27, %v1238_v28  ;;  %1276 = vst [vmem:[%s2603_s2 + $0x38] sm:$0xff] %v1266_v6  ;;  %v1237_v20 = vmax.f32 %v1191_v25, 0.0 }
 0x1cd   :  { %1270 = vst [vmem:[%s2603_s2 + $0x8] sm:$0xff] %v1260_v26  ;;  %v1263_v47 = vmax.f32 %v2526_v2, %v1253_v53  ;;  %v1252_v10 = vmax.f32 %v1212_v45, %v1217_v41 }
 0x1ce   :  { %1275 = vst [vmem:[%s2603_s2 + $0x30] sm:$0xff] %v1265_v19  ;;  %v1268_v14 = vmax.f32 %v2528_v35, %v1258_v42  ;;  %v1257_v33 = vmax.f32 %v1232_v0, %v1237_v20 }
 0x1cf   :  { %1273 = vst [vmem:[%s2603_s2 + $0x20] sm:$0xff] %v1263_v47  ;;  %v1262_v51 = vmax.f32 %v2530_v24, %v1252_v10 }
 0x1d0   :  { %1278 = vst [vmem:[%s2603_s2 + $0x48] sm:$0xff] %v1268_v14  ;;  %v1267_v57 = vmax.f32 %v2532_v62, %v1257_v33 }
 0x1d1   :  { %1272 = vst [vmem:[%s2603_s2 + $0x18] sm:$0xff] %v1262_v51 }
 0x1d2   :  { %1277 = vst [vmem:[%s2603_s2 + $0x40] sm:$0xff] %v1267_v57 }

// kernel: baseline_forward.5
= control target key start
LH: loop header
LB: loop body
LE: loop exit
PB: predicated region body
PF: predicated region fallthrough
CT: control target
= control target key end

     0   :  { %v2488_v0 = vmov 0.0   ;;  %vm1644_vm0 = vcmask 523264   ;;  %vm2489_vm1 = vmmov 0   ;;  %s4569_s1 = inlined_call_operand.vmem [shape: f32[1152,64], index: 1, kind: input, shape index: {}]   ;;  %s4570_s0 = inlined_call_operand.vmem [shape: f32[4,8,8,1152], index: 0, kind: input, shape index: {}]   ;;  %s4571_s2 = inlined_call_operand.vmem [shape: f32[4,64,256], index: 2, kind: input, shape index: {}]   ;;  %s4572_s4 = inlined_call_operand.vmem [shape: f32[256,64], index: 4, kind: input, shape index: {}]   ;;  %s4573_s8 = inlined_call_operand.vmem [shape: f32[8,8,64], index: 8, kind: output, shape index: {0}]   ;;  %s4574_s6 = inlined_call_operand.vmem [shape: f32[64,128], index: 6, kind: input, shape index: {}]   ;;  %s4575_s3 = inlined_call_operand.vmem [shape: f32[1,256], index: 3, kind: input, shape index: {}]   ;;  %s4576_s5 = inlined_call_operand.vmem [shape: f32[1,64], index: 5, kind: input, shape index: {}]   ;;  %s4577_s7 = inlined_call_operand.vmem [shape: f32[1,128], index: 7, kind: input, shape index: {}]   ;;  %s4578_s9 = inlined_call_operand.vmem [shape: f32[8,128], index: 9, kind: output, shape index: {1}]  }
   0x1   :  { %463 = vmatprep.subr.mxu0 %v2488_v0  ;;  %v334_v1 = vld [vmem:[%s4569_s1 + $0x78] sm:$0xff]  ;;  %688 = vmatprep.subr.mxu1 %v2488_v0  ;;  %v333_v3 = vld [vmem:[%s4569_s1 + $0x70] sm:$0xff]  ;;  %v332_v5 = vld [vmem:[%s4569_s1 + $0x68] sm:$0xff] }
   0x2   :  { %v366_v2 = vld [vmem:[%s4569_s1 + $0x178] sm:$0xff]  ;;  %464 = vmatpush1.msra.mxu0 %v334_v1  ;;  %v365_v4 = vld [vmem:[%s4569_s1 + $0x170] sm:$0xff]  ;;  %v364_v6 = vld [vmem:[%s4569_s1 + $0x168] sm:$0xff] }
   0x3   :  { %689 = vmatpush1.msra.mxu1 %v366_v2  ;;  %465 = vmatprep.subr.mxu0 %v2488_v0  ;;  %v331_v7 = vld [vmem:[%s4569_s1 + $0x60] sm:$0xff]  ;;  %v330_v9 = vld [vmem:[%s4569_s1 + $0x58] sm:$0xff]  ;;  %v329_v11 = vld [vmem:[%s4569_s1 + $0x50] sm:$0xff] }
   0x4   :  { %690 = vmatprep.subr.mxu1 %v2488_v0  ;;  %466 = vmatpush1.msra.mxu0 %v333_v3  ;;  %v363_v8 = vld [vmem:[%s4569_s1 + $0x160] sm:$0xff]  ;;  %v362_v10 = vld [vmem:[%s4569_s1 + $0x158] sm:$0xff]  ;;  %v361_v12 = vld [vmem:[%s4569_s1 + $0x150] sm:$0xff] }
   0x5   :  { %691 = vmatpush1.msra.mxu1 %v365_v4  ;;  %467 = vmatprep.subr.mxu0 %v2488_v0  ;;  %v328_v13 = vld [vmem:[%s4569_s1 + $0x48] sm:$0xff]  ;;  %v327_v15 = vld [vmem:[%s4569_s1 + $0x40] sm:$0xff]  ;;  %v326_v17 = vld [vmem:[%s4569_s1 + $0x38] sm:$0xff] }
   0x6   :  { %692 = vmatprep.subr.mxu1 %v2488_v0  ;;  %468 = vmatpush1.msra.mxu0 %v332_v5  ;;  %v360_v14 = vld [vmem:[%s4569_s1 + $0x148] sm:$0xff]  ;;  %v359_v16 = vld [vmem:[%s4569_s1 + $0x140] sm:$0xff]  ;;  %v358_v18 = vld [vmem:[%s4569_s1 + $0x138] sm:$0xff] }
   0x7   :  { %693 = vmatpush1.msra.mxu1 %v364_v6  ;;  %469 = vmatprep.subr.mxu0 %v2488_v0  ;;  %v325_v19 = vld [vmem:[%s4569_s1 + $0x30] sm:$0xff]  ;;  %v324_v21 = vld [vmem:[%s4569_s1 + $0x28] sm:$0xff]  ;;  %v323_v23 = vld [vmem:[%s4569_s1 + $0x20] sm:$0xff] }
   0x8   :  { %694 = vmatprep.subr.mxu1 %v2488_v0  ;;  %470 = vmatpush1.msra.mxu0 %v331_v7  ;;  %v357_v20 = vld [vmem:[%s4569_s1 + $0x130] sm:$0xff]  ;;  %v356_v22 = vld [vmem:[%s4569_s1 + $0x128] sm:$0xff]  ;;  %v355_v24 = vld [vmem:[%s4569_s1 + $0x120] sm:$0xff] }
   0x9   :  { %695 = vmatpush1.msra.mxu1 %v363_v8  ;;  %471 = vmatprep.subr.mxu0 %v2488_v0  ;;  %v322_v25 = vld [vmem:[%s4569_s1 + $0x18] sm:$0xff]  ;;  %v321_v27 = vld [vmem:[%s4569_s1 + $0x10] sm:$0xff]  ;;  %v320_v29 = vld [vmem:[%s4569_s1 + $0x8] sm:$0xff] }
   0xa   :  { %696 = vmatprep.subr.mxu1 %v2488_v0  ;;  %472 = vmatpush1.msra.mxu0 %v330_v9  ;;  %v354_v26 = vld [vmem:[%s4569_s1 + $0x118] sm:$0xff]  ;;  %v353_v28 = vld [vmem:[%s4569_s1 + $0x110] sm:$0xff]  ;;  %v352_v30 = vld [vmem:[%s4569_s1 + $0x108] sm:$0xff] }
   0xb   :  { %697 = vmatpush1.msra.mxu1 %v362_v10  ;;  %473 = vmatprep.subr.mxu0 %v2488_v0  ;;  %v319_v31 = vld [vmem:[%s4569_s1] sm:$0xff]  ;;  %v350_v33 = vld [vmem:[%s4569_s1 + $0xf8] sm:$0xff]  ;;  %v349_v35 = vld [vmem:[%s4569_s1 + $0xf0] sm:$0xff] }
   0xc   :  { %698 = vmatprep.subr.mxu1 %v2488_v0  ;;  %474 = vmatpush1.msra.mxu0 %v329_v11  ;;  %v351_v32 = vld [vmem:[%s4569_s1 + $0x100] sm:$0xff]  ;;  %v382_v34 = vld [vmem:[%s4569_s1 + $0x1f8] sm:$0xff]  ;;  %v381_v36 = vld [vmem:[%s4569_s1 + $0x1f0] sm:$0xff] }
   0xd   :  { %699 = vmatpush1.msra.mxu1 %v361_v12  ;;  %475 = vmatprep.subr.mxu0 %v2488_v0  ;;  %v348_v37 = vld [vmem:[%s4569_s1 + $0xe8] sm:$0xff]  ;;  %v347_v39 = vld [vmem:[%s4569_s1 + $0xe0] sm:$0xff]  ;;  %v346_v41 = vld [vmem:[%s4569_s1 + $0xd8] sm:$0xff] }
   0xe   :  { %700 = vmatprep.subr.mxu1 %v2488_v0  ;;  %476 = vmatpush1.msra.mxu0 %v328_v13  ;;  %v380_v38 = vld [vmem:[%s4569_s1 + $0x1e8] sm:$0xff]  ;;  %v379_v40 = vld [vmem:[%s4569_s1 + $0x1e0] sm:$0xff]  ;;  %v378_v42 = vld [vmem:[%s4569_s1 + $0x1d8] sm:$0xff] }
   0xf   :  { %701 = vmatpush1.msra.mxu1 %v360_v14  ;;  %477 = vmatprep.subr.mxu0 %v2488_v0  ;;  %v345_v43 = vld [vmem:[%s4569_s1 + $0xd0] sm:$0xff]  ;;  %v344_v45 = vld [vmem:[%s4569_s1 + $0xc8] sm:$0xff]  ;;  %v343_v47 = vld [vmem:[%s4569_s1 + $0xc0] sm:$0xff] }
  0x10   :  { %702 = vmatprep.subr.mxu1 %v2488_v0  ;;  %478 = vmatpush1.msra.mxu0 %v327_v15  ;;  %v377_v44 = vld [vmem:[%s4569_s1 + $0x1d0] sm:$0xff]  ;;  %v376_v46 = vld [vmem:[%s4569_s1 + $0x1c8] sm:$0xff]  ;;  %v375_v48 = vld [vmem:[%s4569_s1 + $0x1c0] sm:$0xff] }
  0x11   :  { %703 = vmatpush1.msra.mxu1 %v359_v16  ;;  %479 = vmatprep.subr.mxu0 %v2488_v0  ;;  %v342_v49 = vld [vmem:[%s4569_s1 + $0xb8] sm:$0xff]  ;;  %v341_v51 = vld [vmem:[%s4569_s1 + $0xb0] sm:$0xff]  ;;  %v340_v53 = vld [vmem:[%s4569_s1 + $0xa8] sm:$0xff] }
  0x12   :  { %704 = vmatprep.subr.mxu1 %v2488_v0  ;;  %480 = vmatpush1.msra.mxu0 %v326_v17  ;;  %v374_v50 = vld [vmem:[%s4569_s1 + $0x1b8] sm:$0xff]  ;;  %v373_v52 = vld [vmem:[%s4569_s1 + $0x1b0] sm:$0xff]  ;;  %v372_v54 = vld [vmem:[%s4569_s1 + $0x1a8] sm:$0xff] }
  0x13   :  { %705 = vmatpush1.msra.mxu1 %v358_v18  ;;  %481 = vmatprep.subr.mxu0 %v2488_v0  ;;  %v339_v55 = vld [vmem:[%s4569_s1 + $0xa0] sm:$0xff]  ;;  %v338_v57 = vld [vmem:[%s4569_s1 + $0x98] sm:$0xff]  ;;  %v337_v59 = vld [vmem:[%s4569_s1 + $0x90] sm:$0xff] }
  0x14   :  { %706 = vmatprep.subr.mxu1 %v2488_v0  ;;  %482 = vmatpush1.msra.mxu0 %v325_v19  ;;  %v371_v56 = vld [vmem:[%s4569_s1 + $0x1a0] sm:$0xff]  ;;  %v370_v58 = vld [vmem:[%s4569_s1 + $0x198] sm:$0xff]  ;;  %v369_v60 = vld [vmem:[%s4569_s1 + $0x190] sm:$0xff] }
  0x15   :  { %707 = vmatpush1.msra.mxu1 %v357_v20  ;;  %483 = vmatprep.subr.mxu0 %v2488_v0  ;;  %v336_v61 = vld [vmem:[%s4569_s1 + $0x88] sm:$0xff]  ;;  %v335_v1 = vld [vmem:[%s4569_s1 + $0x80] sm:$0xff]  ;;  %v34_v4 = vld [vmem:[%s4570_s0 + $0x18] sm:$0xff] }
  0x16   :  { %708 = vmatprep.subr.mxu1 %v2488_v0  ;;  %484 = vmatpush1.msra.mxu0 %v324_v21  ;;  %v368_v62 = vld [vmem:[%s4569_s1 + $0x188] sm:$0xff]  ;;  %v31_v2 = vld [vmem:[%s4570_s0] sm:$0xff]  ;;  %v33_v5 = vld [vmem:[%s4570_s0 + $0x10] sm:$0xff] }
  0x17   :  { %709 = vmatpush1.msra.mxu1 %v356_v22  ;;  %485 = vmatprep.subr.mxu0 %v2488_v0  ;;  %v32_v63 = vld [vmem:[%s4570_s0 + $0x8] sm:$0xff]  ;;  %v367_v3 = vld [vmem:[%s4569_s1 + $0x180] sm:$0xff]  ;;  %v398_v6 = vld [vmem:[%s4569_s1 + $0x278] sm:$0xff] }
  0x18   :  { %710 = vmatprep.subr.mxu1 %v2488_v0  ;;  %486 = vmatpush1.msra.mxu0 %v323_v23  ;;  %v41_v7 = vld [vmem:[%s4570_s0 + $0x50] sm:$0xff]  ;;  %v43_v8 = vld [vmem:[%s4570_s0 + $0x60] sm:$0xff]  ;;  %v40_v9 = vld [vmem:[%s4570_s0 + $0x48] sm:$0xff] }
  0x19   :  { %711 = vmatpush1.msra.mxu1 %v355_v24  ;;  %487 = vmatprep.subr.mxu0 %v2488_v0  ;;  %v397_v10 = vld [vmem:[%s4569_s1 + $0x270] sm:$0xff]  ;;  %v50_v11 = vld [vmem:[%s4570_s0 + $0x98] sm:$0xff]  ;;  %v52_v13 = vld [vmem:[%s4570_s0 + $0xa8] sm:$0xff] }
  0x1a   :  { %712 = vmatprep.subr.mxu1 %v2488_v0  ;;  %488 = vmatpush1.msra.mxu0 %v322_v25  ;;  %v42_v12 = vld [vmem:[%s4570_s0 + $0x58] sm:$0xff]  ;;  %v396_v14 = vld [vmem:[%s4569_s1 + $0x268] sm:$0xff]  ;;  %v49_v15 = vld [vmem:[%s4570_s0 + $0x90] sm:$0xff] }
  0x1b   :  { %713 = vmatpush1.msra.mxu1 %v354_v26  ;;  %489 = vmatprep.subr.mxu0 %v2488_v0  ;;  %v59_v16 = vld [vmem:[%s4570_s0 + $0xe0] sm:$0xff]  ;;  %v61_v19 = vld [vmem:[%s4570_s0 + $0xf0] sm:$0xff]  ;;  %v394_v20 = vld [vmem:[%s4569_s1 + $0x258] sm:$0xff] }
  0x1c   :  { %714 = vmatprep.subr.mxu1 %v2488_v0  ;;  %490 = vmatpush1.msra.mxu0 %v321_v27  ;;  %v395_v17 = vld [vmem:[%s4569_s1 + $0x260] sm:$0xff]  ;;  %v58_v21 = vld [vmem:[%s4570_s0 + $0xd8] sm:$0xff]  ;;  %v68_v22 = vld [vmem:[%s4570_s0 + $0x128] sm:$0xff] }
  0x1d   :  { %715 = vmatpush1.msra.mxu1 %v353_v28  ;;  %491 = vmatprep.subr.mxu0 %v2488_v0  ;;  %v51_v18 = vld [vmem:[%s4570_s0 + $0xa0] sm:$0xff]  ;;  %v393_v23 = vld [vmem:[%s4569_s1 + $0x250] sm:$0xff]  ;;  %v60_v24 = vld [vmem:[%s4570_s0 + $0xe8] sm:$0xff] }
  0x1e   :  { %716 = vmatprep.subr.mxu1 %v2488_v0  ;;  %492 = vmatpush1.msra.mxu0 %v320_v29  ;;  %v70_v25 = vld [vmem:[%s4570_s0 + $0x138] sm:$0xff]  ;;  %v392_v26 = vld [vmem:[%s4569_s1 + $0x248] sm:$0xff]  ;;  %v67_v27 = vld [vmem:[%s4570_s0 + $0x120] sm:$0xff] }
  0x1f   :  { %717 = vmatpush1.msra.mxu1 %v352_v30  ;;  %493 = vmatprep.subr.mxu0 %v2488_v0  ;;  %v77_v28 = vld [vmem:[%s4570_s0 + $0x170] sm:$0xff]  ;;  %v391_v29 = vld [vmem:[%s4569_s1 + $0x240] sm:$0xff] }
  0x20   :  { %718 = vmatprep.subr.mxu1 %v2488_v0  ;;  %494 = vmatpush1.msra.mxu0 %v319_v31  ;;  %v69_v30 = vld [vmem:[%s4570_s0 + $0x130] sm:$0xff]  ;;  %v79_v31 = vld [vmem:[%s4570_s0 + $0x180] sm:$0xff] }
  0x21   :  { %719 = vmatpush1.msra.mxu1 %v351_v32  ;;  %495 = vmatprep.subr.mxu0 %v2488_v0  ;;  %v390_v32 = vld [vmem:[%s4569_s1 + $0x238] sm:$0xff] }
  0x22   :  { %720 = vmatprep.subr.mxu1 %v2488_v0  ;;  %496 = vmatpush2.msra.mxu0 %v350_v33  ;;  %v76_v33 = vld [vmem:[%s4570_s0 + $0x168] sm:$0xff] }
  0x23   :  { %721 = vmatpush2.msra.mxu1 %v382_v34  ;;  %497 = vmatprep.subr.mxu0 %v2488_v0  ;;  %v86_v34 = vld [vmem:[%s4570_s0 + $0x1b8] sm:$0xff] }
  0x24   :  { %722 = vmatprep.subr.mxu1 %v2488_v0  ;;  %498 = vmatpush2.msra.mxu0 %v349_v35  ;;  %v389_v35 = vld [vmem:[%s4569_s1 + $0x230] sm:$0xff] }
  0x25   :  { %723 = vmatpush2.msra.mxu1 %v381_v36  ;;  %499 = vmatprep.subr.mxu0 %v2488_v0  ;;  %v78_v36 = vld [vmem:[%s4570_s0 + $0x178] sm:$0xff] }
  0x26   :  { %724 = vmatprep.subr.mxu1 %v2488_v0  ;;  %500 = vmatpush2.msra.mxu0 %v348_v37  ;;  %v88_v37 = vld [vmem:[%s4570_s0 + $0x1c8] sm:$0xff] }
  0x27   :  { %725 = vmatpush2.msra.mxu1 %v380_v38  ;;  %501 = vmatprep.subr.mxu0 %v2488_v0  ;;  %v388_v38 = vld [vmem:[%s4569_s1 + $0x228] sm:$0xff] }
  0x28   :  { %726 = vmatprep.subr.mxu1 %v2488_v0  ;;  %502 = vmatpush2.msra.mxu0 %v347_v39  ;;  %v85_v39 = vld [vmem:[%s4570_s0 + $0x1b0] sm:$0xff] }
  0x29   :  { %727 = vmatpush2.msra.mxu1 %v379_v40  ;;  %503 = vmatprep.subr.mxu0 %v2488_v0  ;;  %v95_v40 = vld [vmem:[%s4570_s0 + $0x200] sm:$0xff] }
  0x2a   :  { %728 = vmatprep.subr.mxu1 %v2488_v0  ;;  %504 = vmatpush2.msra.mxu0 %v346_v41  ;;  %v387_v41 = vld [vmem:[%s4569_s1 + $0x220] sm:$0xff] }
  0x2b   :  { %729 = vmatpush2.msra.mxu1 %v378_v42  ;;  %505 = vmatprep.subr.mxu0 %v2488_v0  ;;  %v87_v42 = vld [vmem:[%s4570_s0 + $0x1c0] sm:$0xff] }
  0x2c   :  { %730 = vmatprep.subr.mxu1 %v2488_v0  ;;  %506 = vmatpush2.msra.mxu0 %v345_v43  ;;  %v97_v43 = vld [vmem:[%s4570_s0 + $0x210] sm:$0xff] }
  0x2d   :  { %731 = vmatpush2.msra.mxu1 %v377_v44  ;;  %507 = vmatprep.subr.mxu0 %v2488_v0  ;;  %v386_v44 = vld [vmem:[%s4569_s1 + $0x218] sm:$0xff] }
  0x2e   :  { %732 = vmatprep.subr.mxu1 %v2488_v0  ;;  %508 = vmatpush2.msra.mxu0 %v344_v45  ;;  %v94_v45 = vld [vmem:[%s4570_s0 + $0x1f8] sm:$0xff] }
  0x2f   :  { %733 = vmatpush2.msra.mxu1 %v376_v46  ;;  %509 = vmatprep.subr.mxu0 %v2488_v0  ;;  %v104_v46 = vld [vmem:[%s4570_s0 + $0x248] sm:$0xff] }
  0x30   :  { %734 = vmatprep.subr.mxu1 %v2488_v0  ;;  %510 = vmatpush2.msra.mxu0 %v343_v47  ;;  %v385_v47 = vld [vmem:[%s4569_s1 + $0x210] sm:$0xff] }
  0x31   :  { %735 = vmatpush2.msra.mxu1 %v375_v48  ;;  %511 = vmatprep.subr.mxu0 %v2488_v0  ;;  %v96_v48 = vld [vmem:[%s4570_s0 + $0x208] sm:$0xff] }
  0x32   :  { %736 = vmatprep.subr.mxu1 %v2488_v0  ;;  %512 = vmatpush2.msra.mxu0 %v342_v49  ;;  %v106_v49 = vld [vmem:[%s4570_s0 + $0x258] sm:$0xff] }
  0x33   :  { %737 = vmatpush2.msra.mxu1 %v374_v50  ;;  %513 = vmatprep.subr.mxu0 %v2488_v0  ;;  %v384_v50 = vld [vmem:[%s4569_s1 + $0x208] sm:$0xff] }
  0x34   :  { %738 = vmatprep.subr.mxu1 %v2488_v0  ;;  %514 = vmatpush2.msra.mxu0 %v341_v51  ;;  %v103_v51 = vld [vmem:[%s4570_s0 + $0x240] sm:$0xff] }
  0x35   :  { %739 = vmatpush2.msra.mxu1 %v373_v52  ;;  %515 = vmatprep.subr.mxu0 %v2488_v0  ;;  %v113_v52 = vld [vmem:[%s4570_s0 + $0x290] sm:$0xff] }
  0x36   :  { %740 = vmatprep.subr.mxu1 %v2488_v0  ;;  %516 = vmatpush2.msra.mxu0 %v340_v53  ;;  %v383_v53 = vld [vmem:[%s4569_s1 + $0x200] sm:$0xff] }
  0x37   :  { %741 = vmatpush2.msra.mxu1 %v372_v54  ;;  %517 = vmatprep.subr.mxu0 %v2488_v0  ;;  %v105_v54 = vld [vmem:[%s4570_s0 + $0x250] sm:$0xff] }
  0x38   :  { %742 = vmatprep.subr.mxu1 %v2488_v0  ;;  %518 = vmatpush2.msra.mxu0 %v339_v55  ;;  %v115_v55 = vld [vmem:[%s4570_s0 + $0x2a0] sm:$0xff] }
  0x39   :  { %743 = vmatpush2.msra.mxu1 %v371_v56  ;;  %519 = vmatprep.subr.mxu0 %v2488_v0  ;;  %v414_v56 = vld [vmem:[%s4569_s1 + $0x2f8] sm:$0xff] }
  0x3a   :  { %744 = vmatprep.subr.mxu1 %v2488_v0  ;;  %520 = vmatpush2.msra.mxu0 %v338_v57  ;;  %v112_v57 = vld [vmem:[%s4570_s0 + $0x288] sm:$0xff] }
  0x3b   :  { %745 = vmatpush2.msra.mxu1 %v370_v58  ;;  %521 = vmatprep.subr.mxu0 %v2488_v0  ;;  %v122_v58 = vld [vmem:[%s4570_s0 + $0x2d8] sm:$0xff] }
  0x3c   :  { %746 = vmatprep.subr.mxu1 %v2488_v0  ;;  %522 = vmatpush2.msra.mxu0 %v337_v59  ;;  %v430_v59 = vld [vmem:[%s4569_s1 + $0x378] sm:$0xff] }
  0x3d   :  { %747 = vmatpush2.msra.mxu1 %v369_v60  ;;  %523 = vmatprep.subr.mxu0 %v2488_v0  ;;  %v114_v60 = vld [vmem:[%s4570_s0 + $0x298] sm:$0xff] }
  0x3e   :  { %748 = vmatprep.subr.mxu1 %v2488_v0  ;;  %524 = vmatpush2.msra.mxu0 %v336_v61  ;;  %v124_v61 = vld [vmem:[%s4570_s0 + $0x2e8] sm:$0xff] }
  0x3f   :  { %749 = vmatpush2.msra.mxu1 %v368_v62  ;;  %525 = vmatprep.subr.mxu0 %v2488_v0  ;;  %v121_v62 = vld [vmem:[%s4570_s0 + $0x2d0] sm:$0xff] }
  0x40   :  { %527 = vmatprep.mubr.f32.mxu0 %v32_v63  ;;  %526 = vmatpush2.msra.mxu0 %v335_v1  ;;  %v429_v63 = vld [vmem:[%s4569_s1 + $0x370] sm:$0xff]  ;;  %v131_v1 = vld [vmem:[%s4570_s0 + $0x320] sm:$0xff] }
  0x41   :  { %750 = vmatprep.subr.mxu1 %v2488_v0  ;;  %528 = vmatmul.mubr.f32.vlgmr.msra.gmra.mxu0 %v31_v2  ;;  %v413_v2 = vld [vmem:[%s4569_s1 + $0x2f0] sm:$0xff] }
  0x42   :  { %751 = vmatpush2.msra.mxu1 %v367_v3  ;;  %752 = vmatprep.mubr.f32.mxu1 %v34_v4  ;;  %v123_v3 = vld [vmem:[%s4570_s0 + $0x2e0] sm:$0xff]  ;;  %v133_v4 = vld [vmem:[%s4570_s0 + $0x330] sm:$0xff] }
  0x43   :  { %913 = vmatprep.subr.mxu0 %v2488_v0  ;;  %753 = vmatmul.mubr.f32.vlgmr.msra.gmra.mxu1 %v33_v5  ;;  %v428_v5 = vld [vmem:[%s4569_s1 + $0x368] sm:$0xff] }
  0x44   :  { %914 = vmatpush1.msra.mxu0 %v398_v6  ;;  %532 = vmatprep.mubr.f32.mxu0 %v41_v7  ;;  %v130_v6 = vld [vmem:[%s4570_s0 + $0x318] sm:$0xff]  ;;  %v140_v7 = vld [vmem:[%s4570_s0 + $0x368] sm:$0xff] }
  0x45   :  { %757 = vmatprep.mubr.f32.mxu1 %v43_v8  ;;  %533 = vmatmul.mubr.f32.gmra.mxu0 %v40_v9  ;;  %v132_v8 = vld [vmem:[%s4570_s0 + $0x328] sm:$0xff] }
  0x46   :  { %915 = vmatprep.subr.mxu0 %v2488_v0  ;;  %537 = vmatprep.mubr.f32.mxu0 %v50_v11  ;;  %v412_v9 = vld [vmem:[%s4569_s1 + $0x2e8] sm:$0xff]  ;;  %v427_v11 = vld [vmem:[%s4569_s1 + $0x360] sm:$0xff] }
  0x47   :  { %916 = vmatpush1.msra.mxu0 %v397_v10  ;;  %758 = vmatmul.mubr.f32.gmra.mxu1 %v42_v12  ;;  %v142_v10 = vld [vmem:[%s4570_s0 + $0x378] sm:$0xff]  ;;  %v139_v12 = vld [vmem:[%s4570_s0 + $0x360] sm:$0xff] }
  0x48   :  { %917 = vmatprep.subr.mxu0 %v2488_v0  ;;  %762 = vmatprep.mubr.f32.mxu1 %v52_v13  ;;  %v149_v13 = vld [vmem:[%s4570_s0 + $0x3b0] sm:$0xff] }
  0x49   :  { %918 = vmatpush1.msra.mxu0 %v396_v14  ;;  %1138 = vmatprep.subr.mxu1 %v2488_v0  ;;  %v426_v14 = vld [vmem:[%s4569_s1 + $0x358] sm:$0xff] }
  0x4a   :  { %538 = vmatmul.mubr.f32.gmra.mxu0 %v49_v15  ;;  %919 = vmatprep.subr.mxu0 %v2488_v0  ;;  %v141_v15 = vld [vmem:[%s4570_s0 + $0x370] sm:$0xff] }
  0x4b   :  { %542 = vmatprep.mubr.f32.mxu0 %v59_v16  ;;  %920 = vmatpush1.msra.mxu0 %v395_v17  ;;  %v151_v16 = vld [vmem:[%s4570_s0 + $0x3c0] sm:$0xff]  ;;  %v148_v17 = vld [vmem:[%s4570_s0 + $0x3a8] sm:$0xff] }
  0x4c   :  { %763 = vmatmul.mubr.f32.gmra.mxu1 %v51_v18  ;;  %921 = vmatprep.subr.mxu0 %v2488_v0  ;;  %v425_v18 = vld [vmem:[%s4569_s1 + $0x350] sm:$0xff] }
  0x4d   :  { %767 = vmatprep.mubr.f32.mxu1 %v61_v19  ;;  %922 = vmatpush1.msra.mxu0 %v394_v20  ;;  %v158_v19 = vld [vmem:[%s4570_s0 + $0x3f8] sm:$0xff]  ;;  %v411_v20 = vld [vmem:[%s4569_s1 + $0x2e0] sm:$0xff] }
  0x4e   :  { %543 = vmatmul.mubr.f32.gmra.mxu0 %v58_v21  ;;  %923 = vmatprep.subr.mxu0 %v2488_v0  ;;  %v150_v21 = vld [vmem:[%s4570_s0 + $0x3b8] sm:$0xff] }
  0x4f   :  { %547 = vmatprep.mubr.f32.mxu0 %v68_v22  ;;  %924 = vmatpush1.msra.mxu0 %v393_v23  ;;  %v160_v22 = vld [vmem:[%s4570_s0 + $0x408] sm:$0xff] }
  0x50   :  { %768 = vmatmul.mubr.f32.gmra.mxu1 %v60_v24  ;;  %925 = vmatprep.subr.mxu0 %v2488_v0  ;;  %v424_v23 = vld [vmem:[%s4569_s1 + $0x348] sm:$0xff]  ;;  %v157_v24 = vld [vmem:[%s4570_s0 + $0x3f0] sm:$0xff] }
  0x51   :  { %772 = vmatprep.mubr.f32.mxu1 %v70_v25  ;;  %926 = vmatpush1.msra.mxu0 %v392_v26  ;;  %v167_v25 = vld [vmem:[%s4570_s0 + $0x440] sm:$0xff] }
  0x52   :  { %548 = vmatmul.mubr.f32.gmra.mxu0 %v67_v27  ;;  %927 = vmatprep.subr.mxu0 %v2488_v0  ;;  %v159_v26 = vld [vmem:[%s4570_s0 + $0x400] sm:$0xff]  ;;  %v410_v27 = vld [vmem:[%s4569_s1 + $0x2d8] sm:$0xff] }
  0x53   :  { %552 = vmatprep.mubr.f32.mxu0 %v77_v28  ;;  %928 = vmatpush1.msra.mxu0 %v391_v29  ;;  %v169_v28 = vld [vmem:[%s4570_s0 + $0x450] sm:$0xff]  ;;  %v423_v29 = vld [vmem:[%s4569_s1 + $0x340] sm:$0xff] }
  0x54   :  { %773 = vmatmul.mubr.f32.gmra.mxu1 %v69_v30  ;;  %929 = vmatprep.subr.mxu0 %v2488_v0  ;;  %v166_v30 = vld [vmem:[%s4570_s0 + $0x438] sm:$0xff] }
  0x55   :  { %777 = vmatprep.mubr.f32.mxu1 %v79_v31  ;;  %930 = vmatpush1.msra.mxu0 %v390_v32  ;;  %v176_v31 = vld [vmem:[%s4570_s0 + $0x488] sm:$0xff]  ;;  %v422_v32 = vld [vmem:[%s4569_s1 + $0x338] sm:$0xff] }
  0x56   :  { %553 = vmatmul.mubr.f32.gmra.mxu0 %v76_v33  ;;  %931 = vmatprep.subr.mxu0 %v2488_v0  ;;  %v168_v33 = vld [vmem:[%s4570_s0 + $0x448] sm:$0xff] }
  0x57   :  { %557 = vmatprep.mubr.f32.mxu0 %v86_v34  ;;  %932 = vmatpush1.msra.mxu0 %v389_v35  ;;  %v178_v34 = vld [vmem:[%s4570_s0 + $0x498] sm:$0xff]  ;;  %v175_v35 = vld [vmem:[%s4570_s0 + $0x480] sm:$0xff] }
  0x58   :  { %778 = vmatmul.mubr.f32.gmra.mxu1 %v78_v36  ;;  %933 = vmatprep.subr.mxu0 %v2488_v0  ;;  %v421_v36 = vld [vmem:[%s4569_s1 + $0x330] sm:$0xff] }
  0x59   :  { %782 = vmatprep.mubr.f32.mxu1 %v88_v37  ;;  %934 = vmatpush1.msra.mxu0 %v388_v38  ;;  %v185_v37 = vld [vmem:[%s4570_s0 + $0x4d0] sm:$0xff] }
  0x5a   :  { %558 = vmatmul.mubr.f32.gmra.mxu0 %v85_v39  ;;  %935 = vmatprep.subr.mxu0 %v2488_v0  ;;  %v409_v38 = vld [vmem:[%s4569_s1 + $0x2d0] sm:$0xff] }
  0x5b   :  { %562 = vmatprep.mubr.f32.mxu0 %v95_v40  ;;  %936 = vmatpush1.msra.mxu0 %v387_v41  ;;  %v177_v39 = vld [vmem:[%s4570_s0 + $0x490] sm:$0xff]  ;;  %v187_v40 = vld [vmem:[%s4570_s0 + $0x4e0] sm:$0xff]  ;;  %v420_v41 = vld [vmem:[%s4569_s1 + $0x328] sm:$0xff] }
  0x5c   :  { %783 = vmatmul.mubr.f32.gmra.mxu1 %v87_v42  ;;  %937 = vmatprep.subr.mxu0 %v2488_v0  ;;  %v184_v42 = vld [vmem:[%s4570_s0 + $0x4c8] sm:$0xff] }
  0x5d   :  { %787 = vmatprep.mubr.f32.mxu1 %v97_v43  ;;  %938 = vmatpush1.msra.mxu0 %v386_v44  ;;  %v194_v43 = vld [vmem:[%s4570_s0 + $0x518] sm:$0xff] }
  0x5e   :  { %563 = vmatmul.mubr.f32.gmra.mxu0 %v94_v45  ;;  %939 = vmatprep.subr.mxu0 %v2488_v0  ;;  %v186_v44 = vld [vmem:[%s4570_s0 + $0x4d8] sm:$0xff]  ;;  %v408_v45 = vld [vmem:[%s4569_s1 + $0x2c8] sm:$0xff] }
  0x5f   :  { %567 = vmatprep.mubr.f32.mxu0 %v104_v46  ;;  %940 = vmatpush1.msra.mxu0 %v385_v47  ;;  %v196_v46 = vld [vmem:[%s4570_s0 + $0x528] sm:$0xff]  ;;  %v419_v47 = vld [vmem:[%s4569_s1 + $0x320] sm:$0xff] }
  0x60   :  { %788 = vmatmul.mubr.f32.gmra.mxu1 %v96_v48  ;;  %941 = vmatprep.subr.mxu0 %v2488_v0  ;;  %v193_v48 = vld [vmem:[%s4570_s0 + $0x510] sm:$0xff] }
  0x61   :  { %792 = vmatprep.mubr.f32.mxu1 %v106_v49  ;;  %942 = vmatpush1.msra.mxu0 %v384_v50  ;;  %v203_v49 = vld [vmem:[%s4570_s0 + $0x560] sm:$0xff]  ;;  %v418_v50 = vld [vmem:[%s4569_s1 + $0x318] sm:$0xff] }
  0x62   :  { %568 = vmatmul.mubr.f32.gmra.mxu0 %v103_v51  ;;  %943 = vmatprep.subr.mxu0 %v2488_v0  ;;  %v195_v51 = vld [vmem:[%s4570_s0 + $0x520] sm:$0xff] }
  0x63   :  { %572 = vmatprep.mubr.f32.mxu0 %v113_v52  ;;  %944 = vmatpush1.msra.mxu0 %v383_v53  ;;  %v205_v52 = vld [vmem:[%s4570_s0 + $0x570] sm:$0xff]  ;;  %v202_v53 = vld [vmem:[%s4570_s0 + $0x558] sm:$0xff] }
  0x64   :  { %793 = vmatmul.mubr.f32.gmra.mxu1 %v105_v54  ;;  %945 = vmatprep.subr.mxu0 %v2488_v0  ;;  %v417_v54 = vld [vmem:[%s4569_s1 + $0x310] sm:$0xff] }
  0x65   :  { %797 = vmatprep.mubr.f32.mxu1 %v115_v55  ;;  %946 = vmatpush2.msra.mxu0 %v414_v56  ;;  %v212_v55 = vld [vmem:[%s4570_s0 + $0x5a8] sm:$0xff]  ;;  %v407_v56 = vld [vmem:[%s4569_s1 + $0x2c0] sm:$0xff] }
  0x66   :  { %573 = vmatmul.mubr.f32.gmra.mxu0 %v112_v57  ;;  %1139 = vmatpush1.msra.mxu1 %v430_v59  ;;  %v204_v57 = vld [vmem:[%s4570_s0 + $0x568] sm:$0xff] }
  0x67   :  { %577 = vmatprep.mubr.f32.mxu0 %v122_v58  ;;  %947 = vmatprep.subr.mxu0 %v2488_v0  ;;  %v214_v58 = vld [vmem:[%s4570_s0 + $0x5b8] sm:$0xff]  ;;  %v416_v59 = vld [vmem:[%s4569_s1 + $0x308] sm:$0xff] }
  0x68   :  { %798 = vmatmul.mubr.f32.gmra.mxu1 %v114_v60  ;;  %1140 = vmatprep.subr.mxu1 %v2488_v0  ;;  %v211_v60 = vld [vmem:[%s4570_s0 + $0x5a0] sm:$0xff] }
  0x69   :  { %802 = vmatprep.mubr.f32.mxu1 %v124_v61  ;;  %1141 = vmatpush1.msra.mxu1 %v429_v63  ;;  %v221_v61 = vld [vmem:[%s4570_s0 + $0x5f0] sm:$0xff]  ;;  %v406_v63 = vld [vmem:[%s4569_s1 + $0x2b8] sm:$0xff] }
  0x6a   :  { %578 = vmatmul.mubr.f32.gmra.mxu0 %v121_v62  ;;  %1142 = vmatprep.subr.mxu1 %v2488_v0  ;;  %v213_v62 = vld [vmem:[%s4570_s0 + $0x5b0] sm:$0xff] }
  0x6b   :  { %582 = vmatprep.mubr.f32.mxu0 %v131_v1  ;;  %948 = vmatpush2.msra.mxu0 %v413_v2  ;;  %v223_v1 = vld [vmem:[%s4570_s0 + $0x600] sm:$0xff] }
  0x6c   :  { %803 = vmatmul.mubr.f32.gmra.mxu1 %v123_v3  ;;  %949 = vmatprep.subr.mxu0 %v2488_v0  ;;  %v415_v2 = vld [vmem:[%s4569_s1 + $0x300] sm:$0xff]  ;;  %v220_v3 = vld [vmem:[%s4570_s0 + $0x5e8] sm:$0xff] }
  0x6d   :  { %807 = vmatprep.mubr.f32.mxu1 %v133_v4  ;;  %1143 = vmatpush1.msra.mxu1 %v428_v5  ;;  %v230_v4 = vld [vmem:[%s4570_s0 + $0x638] sm:$0xff] }
  0x6e   :  { %583 = vmatmul.mubr.f32.gmra.mxu0 %v130_v6  ;;  %1144 = vmatprep.subr.mxu1 %v2488_v0  ;;  %v446_v5 = vld [vmem:[%s4569_s1 + $0x3f8] sm:$0xff] }
  0x6f   :  { %587 = vmatprep.mubr.f32.mxu0 %v140_v7  ;;  %950 = vmatpush2.msra.mxu0 %v412_v9  ;;  %v222_v6 = vld [vmem:[%s4570_s0 + $0x5f8] sm:$0xff]  ;;  %v232_v7 = vld [vmem:[%s4570_s0 + $0x648] sm:$0xff]  ;;  %v445_v9 = vld [vmem:[%s4569_s1 + $0x3f0] sm:$0xff] }
  0x70   :  { %808 = vmatmul.mubr.f32.gmra.mxu1 %v132_v8  ;;  %951 = vmatprep.subr.mxu0 %v2488_v0  ;;  %v229_v8 = vld [vmem:[%s4570_s0 + $0x630] sm:$0xff] }
  0x71   :  { %812 = vmatprep.mubr.f32.mxu1 %v142_v10  ;;  %1145 = vmatpush1.msra.mxu1 %v427_v11  ;;  %v239_v10 = vld [vmem:[%s4570_s0 + $0x680] sm:$0xff]  ;;  %v405_v11 = vld [vmem:[%s4569_s1 + $0x2b0] sm:$0xff] }
  0x72   :  { %588 = vmatmul.mubr.f32.gmra.mxu0 %v139_v12  ;;  %1146 = vmatprep.subr.mxu1 %v2488_v0  ;;  %v231_v12 = vld [vmem:[%s4570_s0 + $0x640] sm:$0xff] }
  0x73   :  { %592 = vmatprep.mubr.f32.mxu0 %v149_v13  ;;  %1147 = vmatpush1.msra.mxu1 %v426_v14  ;;  %v241_v13 = vld [vmem:[%s4570_s0 + $0x690] sm:$0xff]  ;;  %v444_v14 = vld [vmem:[%s4569_s1 + $0x3e8] sm:$0xff] }
  0x74   :  { %813 = vmatmul.mubr.f32.gmra.mxu1 %v141_v15  ;;  %1148 = vmatprep.subr.mxu1 %v2488_v0  ;;  %v238_v15 = vld [vmem:[%s4570_s0 + $0x678] sm:$0xff] }
  0x75   :  { %817 = vmatprep.mubr.f32.mxu1 %v151_v16  ;;  %1149 = vmatpush1.msra.mxu1 %v425_v18  ;;  %v248_v16 = vld [vmem:[%s4570_s0 + $0x6c8] sm:$0xff] }
  0x76   :  { %593 = vmatmul.mubr.f32.gmra.mxu0 %v148_v17  ;;  %1150 = vmatprep.subr.mxu1 %v2488_v0  ;;  %v240_v17 = vld [vmem:[%s4570_s0 + $0x688] sm:$0xff] }
  0x77   :  { %597 = vmatprep.mubr.f32.mxu0 %v158_v19  ;;  %952 = vmatpush2.msra.mxu0 %v411_v20  ;;  %v404_v18 = vld [vmem:[%s4569_s1 + $0x2a8] sm:$0xff]  ;;  %v250_v19 = vld [vmem:[%s4570_s0 + $0x6d8] sm:$0xff]  ;;  %v443_v20 = vld [vmem:[%s4569_s1 + $0x3e0] sm:$0xff] }
  0x78   :  { %818 = vmatmul.mubr.f32.gmra.mxu1 %v150_v21  ;;  %953 = vmatprep.subr.mxu0 %v2488_v0  ;;  %v247_v21 = vld [vmem:[%s4570_s0 + $0x6c0] sm:$0xff] }
  0x79   :  { %822 = vmatprep.mubr.f32.mxu1 %v160_v22  ;;  %1151 = vmatpush1.msra.mxu1 %v424_v23  ;;  %v257_v22 = vld [vmem:[%s4570_s0 + $0x710] sm:$0xff]  ;;  %v442_v23 = vld [vmem:[%s4569_s1 + $0x3d8] sm:$0xff] }
  0x7a   :  { %598 = vmatmul.mubr.f32.gmra.mxu0 %v157_v24  ;;  %1152 = vmatprep.subr.mxu1 %v2488_v0  ;;  %v249_v24 = vld [vmem:[%s4570_s0 + $0x6d0] sm:$0xff] }
  0x7b   :  { %602 = vmatprep.mubr.f32.mxu0 %v167_v25  ;;  %954 = vmatpush2.msra.mxu0 %v410_v27  ;;  %v259_v25 = vld [vmem:[%s4570_s0 + $0x720] sm:$0xff]  ;;  %v441_v27 = vld [vmem:[%s4569_s1 + $0x3d0] sm:$0xff] }
  0x7c   :  { %823 = vmatmul.mubr.f32.gmra.mxu1 %v159_v26  ;;  %955 = vmatprep.subr.mxu0 %v2488_v0  ;;  %v256_v26 = vld [vmem:[%s4570_s0 + $0x708] sm:$0xff] }
  0x7d   :  { %827 = vmatprep.mubr.f32.mxu1 %v169_v28  ;;  %1153 = vmatpush1.msra.mxu1 %v423_v29  ;;  %v266_v28 = vld [vmem:[%s4570_s0 + $0x758] sm:$0xff]  ;;  %v403_v29 = vld [vmem:[%s4569_s1 + $0x2a0] sm:$0xff] }
  0x7e   :  { %603 = vmatmul.mubr.f32.gmra.mxu0 %v166_v30  ;;  %1154 = vmatprep.subr.mxu1 %v2488_v0  ;;  %v258_v30 = vld [vmem:[%s4570_s0 + $0x718] sm:$0xff] }
  0x7f   :  { %607 = vmatprep.mubr.f32.mxu0 %v176_v31  ;;  %1155 = vmatpush1.msra.mxu1 %v422_v32  ;;  %v268_v31 = vld [vmem:[%s4570_s0 + $0x768] sm:$0xff] }
  0x80   :  { %828 = vmatmul.mubr.f32.gmra.mxu1 %v168_v33  ;;  %1156 = vmatprep.subr.mxu1 %v2488_v0  ;;  %v440_v32 = vld [vmem:[%s4569_s1 + $0x3c8] sm:$0xff]  ;;  %v265_v33 = vld [vmem:[%s4570_s0 + $0x750] sm:$0xff] }
  0x81   :  { %832 = vmatprep.mubr.f32.mxu1 %v178_v34  ;;  %1157 = vmatpush1.msra.mxu1 %v421_v36  ;;  %v275_v34 = vld [vmem:[%s4570_s0 + $0x7a0] sm:$0xff]  ;;  %v402_v36 = vld [vmem:[%s4569_s1 + $0x298] sm:$0xff] }
  0x82   :  { %608 = vmatmul.mubr.f32.gmra.mxu0 %v175_v35  ;;  %1158 = vmatprep.subr.mxu1 %v2488_v0  ;;  %v267_v35 = vld [vmem:[%s4570_s0 + $0x760] sm:$0xff] }
  0x83   :  { %612 = vmatprep.mubr.f32.mxu0 %v185_v37  ;;  %956 = vmatpush2.msra.mxu0 %v409_v38  ;;  %v277_v37 = vld [vmem:[%s4570_s0 + $0x7b0] sm:$0xff]  ;;  %v439_v38 = vld [vmem:[%s4569_s1 + $0x3c0] sm:$0xff] }
  0x84   :  { %833 = vmatmul.mubr.f32.gmra.mxu1 %v177_v39  ;;  %957 = vmatprep.subr.mxu0 %v2488_v0  ;;  %v274_v39 = vld [vmem:[%s4570_s0 + $0x798] sm:$0xff] }
  0x85   :  { %837 = vmatprep.mubr.f32.mxu1 %v187_v40  ;;  %1159 = vmatpush1.msra.mxu1 %v420_v41  ;;  %v284_v40 = vld [vmem:[%s4570_s0 + $0x7e8] sm:$0xff]  ;;  %v438_v41 = vld [vmem:[%s4569_s1 + $0x3b8] sm:$0xff] }
  0x86   :  { %613 = vmatmul.mubr.f32.gmra.mxu0 %v184_v42  ;;  %1160 = vmatprep.subr.mxu1 %v2488_v0  ;;  %v276_v42 = vld [vmem:[%s4570_s0 + $0x7a8] sm:$0xff] }
  0x87   :  { %617 = vmatprep.mubr.f32.mxu0 %v194_v43  ;;  %958 = vmatpush2.msra.mxu0 %v408_v45  ;;  %v286_v43 = vld [vmem:[%s4570_s0 + $0x7f8] sm:$0xff]  ;;  %v437_v45 = vld [vmem:[%s4569_s1 + $0x3b0] sm:$0xff] }
  0x88   :  { %838 = vmatmul.mubr.f32.gmra.mxu1 %v186_v44  ;;  %959 = vmatprep.subr.mxu0 %v2488_v0  ;;  %v283_v44 = vld [vmem:[%s4570_s0 + $0x7e0] sm:$0xff] }
  0x89   :  { %842 = vmatprep.mubr.f32.mxu1 %v196_v46  ;;  %1161 = vmatpush1.msra.mxu1 %v419_v47  ;;  %v293_v46 = vld [vmem:[%s4570_s0 + $0x830] sm:$0xff] }
  0x8a   :  { %618 = vmatmul.mubr.f32.gmra.mxu0 %v193_v48  ;;  %1162 = vmatprep.subr.mxu1 %v2488_v0  ;;  %v401_v47 = vld [vmem:[%s4569_s1 + $0x290] sm:$0xff] }
  0x8b   :  { %622 = vmatprep.mubr.f32.mxu0 %v203_v49  ;;  %1163 = vmatpush1.msra.mxu1 %v418_v50  ;;  %v285_v48 = vld [vmem:[%s4570_s0 + $0x7f0] sm:$0xff]  ;;  %v295_v49 = vld [vmem:[%s4570_s0 + $0x840] sm:$0xff]  ;;  %v436_v50 = vld [vmem:[%s4569_s1 + $0x3a8] sm:$0xff] }
  0x8c   :  { %843 = vmatmul.mubr.f32.gmra.mxu1 %v195_v51  ;;  %1164 = vmatprep.subr.mxu1 %v2488_v0  ;;  %v292_v51 = vld [vmem:[%s4570_s0 + $0x828] sm:$0xff] }
  0x8d   :  { %847 = vmatprep.mubr.f32.mxu1 %v205_v52  ;;  %1165 = vmatpush1.msra.mxu1 %v417_v54  ;;  %v302_v52 = vld [vmem:[%s4570_s0 + $0x878] sm:$0xff]  ;;  %v400_v54 = vld [vmem:[%s4569_s1 + $0x288] sm:$0xff] }
  0x8e   :  { %623 = vmatmul.mubr.f32.gmra.mxu0 %v202_v53  ;;  %1166 = vmatprep.subr.mxu1 %v2488_v0  ;;  %v294_v53 = vld [vmem:[%s4570_s0 + $0x838] sm:$0xff] }
  0x8f   :  { %627 = vmatprep.mubr.f32.mxu0 %v212_v55  ;;  %960 = vmatpush2.msra.mxu0 %v407_v56  ;;  %v304_v55 = vld [vmem:[%s4570_s0 + $0x888] sm:$0xff]  ;;  %v435_v56 = vld [vmem:[%s4569_s1 + $0x3a0] sm:$0xff] }
  0x90   :  { %848 = vmatmul.mubr.f32.gmra.mxu1 %v204_v57  ;;  %961 = vmatprep.subr.mxu0 %v2488_v0  ;;  %v301_v57 = vld [vmem:[%s4570_s0 + $0x870] sm:$0xff] }
  0x91   :  { %852 = vmatprep.mubr.f32.mxu1 %v214_v58  ;;  %1167 = vmatpush1.msra.mxu1 %v416_v59  ;;  %v311_v58 = vld [vmem:[%s4570_s0 + $0x8c0] sm:$0xff]  ;;  %v434_v59 = vld [vmem:[%s4569_s1 + $0x398] sm:$0xff] }
  0x92   :  { %628 = vmatmul.mubr.f32.gmra.mxu0 %v211_v60  ;;  %1168 = vmatprep.subr.mxu1 %v2488_v0  ;;  %v303_v60 = vld [vmem:[%s4570_s0 + $0x880] sm:$0xff] }
  0x93   :  { %632 = vmatprep.mubr.f32.mxu0 %v221_v61  ;;  %962 = vmatpush2.msra.mxu0 %v406_v63  ;;  %v313_v61 = vld [vmem:[%s4570_s0 + $0x8d0] sm:$0xff] }
  0x94   :  { %853 = vmatmul.mubr.f32.gmra.mxu1 %v213_v62  ;;  %963 = vmatprep.subr.mxu0 %v2488_v0  ;;  %v310_v62 = vld [vmem:[%s4570_s0 + $0x8b8] sm:$0xff]  ;;  %v433_v63 = vld [vmem:[%s4569_s1 + $0x390] sm:$0xff] }
  0x95   :  { %857 = vmatprep.mubr.f32.mxu1 %v223_v1  ;;  %1169 = vmatpush1.msra.mxu1 %v415_v2  ;;  %v399_v1 = vld [vmem:[%s4569_s1 + $0x280] sm:$0xff]  ;;  %v312_v2 = vld [vmem:[%s4570_s0 + $0x8c8] sm:$0xff] }
  0x96   :  { %633 = vmatmul.mubr.f32.gmra.mxu0 %v220_v3  ;;  %1170 = vmatprep.subr.mxu1 %v2488_v0  ;;  %v36_v3 = vld [vmem:[%s4570_s0 + $0x28] sm:$0xff] }
  0x97   :  { %637 = vmatprep.mubr.f32.mxu0 %v230_v4  ;;  %1171 = vmatpush2.msra.mxu1 %v446_v5  ;;  %v432_v4 = vld [vmem:[%s4569_s1 + $0x388] sm:$0xff]  ;;  %v462_v5 = vld [vmem:[%s4569_s1 + $0x478] sm:$0xff] }
  0x98   :  { %858 = vmatmul.mubr.f32.gmra.mxu1 %v222_v6  ;;  %1172 = vmatprep.subr.mxu1 %v2488_v0  ;;  %v35_v6 = vld [vmem:[%s4570_s0 + $0x20] sm:$0xff] }
  0x99   :  { %862 = vmatprep.mubr.f32.mxu1 %v232_v7  ;;  %1173 = vmatpush2.msra.mxu1 %v445_v9  ;;  %v431_v7 = vld [vmem:[%s4569_s1 + $0x380] sm:$0xff]  ;;  %v37_v9 = vld [vmem:[%s4570_s0 + $0x30] sm:$0xff] }
  0x9a   :  { %638 = vmatmul.mubr.f32.gmra.mxu0 %v229_v8  ;;  %1174 = vmatprep.subr.mxu1 %v2488_v0  ;;  %v38_v8 = vld [vmem:[%s4570_s0 + $0x38] sm:$0xff] }
  0x9b   :  { %642 = vmatprep.mubr.f32.mxu0 %v239_v10  ;;  %964 = vmatpush2.msra.mxu0 %v405_v11  ;;  %v45_v10 = vld [vmem:[%s4570_s0 + $0x70] sm:$0xff]  ;;  %v47_v11 = vld [vmem:[%s4570_s0 + $0x80] sm:$0xff] }
  0x9c   :  { %863 = vmatmul.mubr.f32.gmra.mxu1 %v231_v12  ;;  %965 = vmatprep.subr.mxu0 %v2488_v0  ;;  %v44_v12 = vld [vmem:[%s4570_s0 + $0x68] sm:$0xff] }
  0x9d   :  { %867 = vmatprep.mubr.f32.mxu1 %v241_v13  ;;  %1175 = vmatpush2.msra.mxu1 %v444_v14  ;;  %v461_v13 = vld [vmem:[%s4569_s1 + $0x470] sm:$0xff]  ;;  %v54_v14 = vld [vmem:[%s4570_s0 + $0xb8] sm:$0xff] }
  0x9e   :  { %643 = vmatmul.mubr.f32.gmra.mxu0 %v238_v15  ;;  %1176 = vmatprep.subr.mxu1 %v2488_v0  ;;  %v46_v15 = vld [vmem:[%s4570_s0 + $0x78] sm:$0xff] }
  0x9f   :  { %647 = vmatprep.mubr.f32.mxu0 %v248_v16  ;;  %966 = vmatpush2.msra.mxu0 %v404_v18  ;;  %v460_v16 = vld [vmem:[%s4569_s1 + $0x468] sm:$0xff]  ;;  %v53_v18 = vld [vmem:[%s4570_s0 + $0xb0] sm:$0xff] }
  0xa0   :  { %868 = vmatmul.mubr.f32.gmra.mxu1 %v240_v17  ;;  %967 = vmatprep.subr.mxu0 %v2488_v0  ;;  %v56_v17 = vld [vmem:[%s4570_s0 + $0xc8] sm:$0xff] }
  0xa1   :  { %872 = vmatprep.mubr.f32.mxu1 %v250_v19  ;;  %1177 = vmatpush2.msra.mxu1 %v443_v20  ;;  %v459_v19 = vld [vmem:[%s4569_s1 + $0x460] sm:$0xff] }
  0xa2   :  { %648 = vmatmul.mubr.f32.gmra.mxu0 %v247_v21  ;;  %1178 = vmatprep.subr.mxu1 %v2488_v0  ;;  %v63_v20 = vld [vmem:[%s4570_s0 + $0x100] sm:$0xff] }
  0xa3   :  { %652 = vmatprep.mubr.f32.mxu0 %v257_v22  ;;  %1179 = vmatpush2.msra.mxu1 %v442_v23  ;;  %v55_v21 = vld [vmem:[%s4570_s0 + $0xc0] sm:$0xff]  ;;  %v458_v22 = vld [vmem:[%s4569_s1 + $0x458] sm:$0xff]  ;;  %v65_v23 = vld [vmem:[%s4570_s0 + $0x110] sm:$0xff] }
  0xa4   :  { %873 = vmatmul.mubr.f32.gmra.mxu1 %v249_v24  ;;  %1180 = vmatprep.subr.mxu1 %v2488_v0  ;;  %v62_v24 = vld [vmem:[%s4570_s0 + $0xf8] sm:$0xff] }
  0xa5   :  { %877 = vmatprep.mubr.f32.mxu1 %v259_v25  ;;  %1181 = vmatpush2.msra.mxu1 %v441_v27  ;;  %v457_v25 = vld [vmem:[%s4569_s1 + $0x450] sm:$0xff]  ;;  %v64_v27 = vld [vmem:[%s4570_s0 + $0x108] sm:$0xff] }
  0xa6   :  { %653 = vmatmul.mubr.f32.gmra.mxu0 %v256_v26  ;;  %1182 = vmatprep.subr.mxu1 %v2488_v0  ;;  %v72_v26 = vld [vmem:[%s4570_s0 + $0x148] sm:$0xff] }
  0xa7   :  { %657 = vmatprep.mubr.f32.mxu0 %v266_v28  ;;  %968 = vmatpush2.msra.mxu0 %v403_v29  ;;  %v456_v28 = vld [vmem:[%s4569_s1 + $0x448] sm:$0xff]  ;;  %v74_v29 = vld [vmem:[%s4570_s0 + $0x158] sm:$0xff] }
  0xa8   :  { %878 = vmatmul.mubr.f32.gmra.mxu1 %v258_v30  ;;  %969 = vmatprep.subr.mxu0 %v2488_v0  ;;  %v71_v30 = vld [vmem:[%s4570_s0 + $0x140] sm:$0xff] }
  0xa9   :  { %882 = vmatprep.mubr.f32.mxu1 %v268_v31  ;;  %1183 = vmatpush2.msra.mxu1 %v440_v32  ;;  %v455_v31 = vld [vmem:[%s4569_s1 + $0x440] sm:$0xff]  ;;  %v81_v32 = vld [vmem:[%s4570_s0 + $0x190] sm:$0xff] }
  0xaa   :  { %658 = vmatmul.mubr.f32.gmra.mxu0 %v265_v33  ;;  %1184 = vmatprep.subr.mxu1 %v2488_v0  ;;  %v73_v33 = vld [vmem:[%s4570_s0 + $0x150] sm:$0xff] }
  0xab   :  { %662 = vmatprep.mubr.f32.mxu0 %v275_v34  ;;  %970 = vmatpush2.msra.mxu0 %v402_v36  ;;  %v454_v34 = vld [vmem:[%s4569_s1 + $0x438] sm:$0xff]  ;;  %v80_v36 = vld [vmem:[%s4570_s0 + $0x188] sm:$0xff] }
  0xac   :  { %883 = vmatmul.mubr.f32.gmra.mxu1 %v267_v35  ;;  %971 = vmatprep.subr.mxu0 %v2488_v0  ;;  %v83_v35 = vld [vmem:[%s4570_s0 + $0x1a0] sm:$0xff] }
  0xad   :  { %887 = vmatprep.mubr.f32.mxu1 %v277_v37  ;;  %1185 = vmatpush2.msra.mxu1 %v439_v38  ;;  %v453_v37 = vld [vmem:[%s4569_s1 + $0x430] sm:$0xff]  ;;  %v90_v38 = vld [vmem:[%s4570_s0 + $0x1d8] sm:$0xff] }
  0xae   :  { %663 = vmatmul.mubr.f32.gmra.mxu0 %v274_v39  ;;  %1186 = vmatprep.subr.mxu1 %v2488_v0  ;;  %v82_v39 = vld [vmem:[%s4570_s0 + $0x198] sm:$0xff] }
  0xaf   :  { %667 = vmatprep.mubr.f32.mxu0 %v284_v40  ;;  %1187 = vmatpush2.msra.mxu1 %v438_v41  ;;  %v452_v40 = vld [vmem:[%s4569_s1 + $0x428] sm:$0xff] }
  0xb0   :  { %888 = vmatmul.mubr.f32.gmra.mxu1 %v276_v42  ;;  %1188 = vmatprep.subr.mxu1 %v2488_v0  ;;  %v92_v41 = vld [vmem:[%s4570_s0 + $0x1e8] sm:$0xff]  ;;  %v89_v42 = vld [vmem:[%s4570_s0 + $0x1d0] sm:$0xff] }
  0xb1   :  { %892 = vmatprep.mubr.f32.mxu1 %v286_v43  ;;  %1189 = vmatpush2.msra.mxu1 %v437_v45  ;;  %v451_v43 = vld [vmem:[%s4569_s1 + $0x420] sm:$0xff] }
  0xb2   :  { %668 = vmatmul.mubr.f32.gmra.mxu0 %v283_v44  ;;  %1190 = vmatprep.subr.mxu1 %v2488_v0  ;;  %v99_v44 = vld [vmem:[%s4570_s0 + $0x220] sm:$0xff] }
  0xb3   :  { %672 = vmatprep.mubr.f32.mxu0 %v293_v46  ;;  %972 = vmatpush2.msra.mxu0 %v401_v47  ;;  %v91_v45 = vld [vmem:[%s4570_s0 + $0x1e0] sm:$0xff]  ;;  %v450_v46 = vld [vmem:[%s4569_s1 + $0x418] sm:$0xff]  ;;  %v101_v47 = vld [vmem:[%s4570_s0 + $0x230] sm:$0xff] }
  0xb4   :  { %893 = vmatmul.mubr.f32.gmra.mxu1 %v285_v48  ;;  %973 = vmatprep.subr.mxu0 %v2488_v0  ;;  %v98_v48 = vld [vmem:[%s4570_s0 + $0x218] sm:$0xff] }
  0xb5   :  { %897 = vmatprep.mubr.f32.mxu1 %v295_v49  ;;  %1191 = vmatpush2.msra.mxu1 %v436_v50  ;;  %v449_v49 = vld [vmem:[%s4569_s1 + $0x410] sm:$0xff]  ;;  %v108_v50 = vld [vmem:[%s4570_s0 + $0x268] sm:$0xff] }
  0xb6   :  { %673 = vmatmul.mubr.f32.gmra.mxu0 %v292_v51  ;;  %1192 = vmatprep.subr.mxu1 %v2488_v0  ;;  %v100_v51 = vld [vmem:[%s4570_s0 + $0x228] sm:$0xff] }
  0xb7   :  { %677 = vmatprep.mubr.f32.mxu0 %v302_v52  ;;  %974 = vmatpush2.msra.mxu0 %v400_v54  ;;  %v448_v52 = vld [vmem:[%s4569_s1 + $0x408] sm:$0xff]  ;;  %v107_v54 = vld [vmem:[%s4570_s0 + $0x260] sm:$0xff] }
  0xb8   :  { %898 = vmatmul.mubr.f32.gmra.mxu1 %v294_v53  ;;  %975 = vmatprep.subr.mxu0 %v2488_v0  ;;  %v110_v53 = vld [vmem:[%s4570_s0 + $0x278] sm:$0xff] }
  0xb9   :  { %902 = vmatprep.mubr.f32.mxu1 %v304_v55  ;;  %1193 = vmatpush2.msra.mxu1 %v435_v56  ;;  %v447_v55 = vld [vmem:[%s4569_s1 + $0x400] sm:$0xff]  ;;  %v117_v56 = vld [vmem:[%s4570_s0 + $0x2b0] sm:$0xff] }
  0xba   :  { %678 = vmatmul.mubr.f32.gmra.mxu0 %v301_v57  ;;  %1194 = vmatprep.subr.mxu1 %v2488_v0  ;;  %v109_v57 = vld [vmem:[%s4570_s0 + $0x270] sm:$0xff] }
  0xbb   :  { %682 = vmatprep.mubr.f32.mxu0 %v311_v58  ;;  %1195 = vmatpush2.msra.mxu1 %v434_v59  ;;  %v119_v58 = vld [vmem:[%s4570_s0 + $0x2c0] sm:$0xff]  ;;  %v116_v59 = vld [vmem:[%s4570_s0 + $0x2a8] sm:$0xff] }
  0xbc   :  { %903 = vmatmul.mubr.f32.gmra.mxu1 %v303_v60  ;;  %1196 = vmatprep.subr.mxu1 %v2488_v0  ;;  %v126_v60 = vld [vmem:[%s4570_s0 + $0x2f8] sm:$0xff] }
  0xbd   :  { %907 = vmatprep.mubr.f32.mxu1 %v313_v61  ;;  %1197 = vmatpush2.msra.mxu1 %v433_v63  ;;  %v118_v61 = vld [vmem:[%s4570_s0 + $0x2b8] sm:$0xff]  ;;  %v125_v63 = vld [vmem:[%s4570_s0 + $0x2f0] sm:$0xff] }
  0xbe   :  { %683 = vmatmul.mubr.f32.gmra.mxu0 %v310_v62  ;;  %1198 = vmatprep.subr.mxu1 %v2488_v0  ;;  %v128_v62 = vld [vmem:[%s4570_s0 + $0x308] sm:$0xff] }
  0xbf   :  { %976 = vmatpush2.msra.mxu0 %v399_v1  ;;  %977 = vmatprep.mubr.f32.mxu0 %v36_v3  ;;  %v135_v1 = vld [vmem:[%s4570_s0 + $0x340] sm:$0xff]  ;;  %v137_v3 = vld [vmem:[%s4570_s0 + $0x350] sm:$0xff] }
  0xc0   :  { %908 = vmatmul.mubr.f32.gmra.mxu1 %v312_v2  ;;  %2387 = vmatprep.subr.mxu0 %v462_v5  ;;  %v127_v2 = vld [vmem:[%s4570_s0 + $0x300] sm:$0xff] }
  0xc1   :  { %1199 = vmatpush2.msra.mxu1 %v432_v4  ;;  %1202 = vmatprep.mubr.f32.mxu1 %v38_v8  ;;  %v134_v4 = vld [vmem:[%s4570_s0 + $0x338] sm:$0xff]  ;;  %v143_v8 = vld [vmem:[%s4570_s0 + $0x380] sm:$0xff] }
  0xc2   :  { %978 = vmatmul.mubr.f32.vlgmr.msra.gmra.mxu0 %v35_v6  ;;  %1200 = vmatprep.subr.mxu1 %v2488_v0  ;;  %v136_v6 = vld [vmem:[%s4570_s0 + $0x348] sm:$0xff] }
  0xc3   :  { %1201 = vmatpush2.msra.mxu1 %v431_v7  ;;  %2388 = vmatpush3.msra.mxu0 %v462_v5  ;;  %v144_v5 = vld [vmem:[%s4570_s0 + $0x388] sm:$0xff]  ;;  %v146_v7 = vld [vmem:[%s4570_s0 + $0x398] sm:$0xff] }
  0xc4   :  { %1203 = vmatmul.mubr.f32.vlgmr.msra.gmra.mxu1 %v37_v9  ;;  %982 = vmatprep.mubr.f32.mxu0 %v45_v10  ;;  %v153_v9 = vld [vmem:[%s4570_s0 + $0x3d0] sm:$0xff] }
  0xc5   :  { %1207 = vmatprep.mubr.f32.mxu1 %v47_v11  ;;  %2389 = vmatprep.subr.mxu0 %v461_v13  ;;  %v145_v10 = vld [vmem:[%s4570_s0 + $0x390] sm:$0xff]  ;;  %v155_v11 = vld [vmem:[%s4570_s0 + $0x3e0] sm:$0xff] }
  0xc6   :  { %983 = vmatmul.mubr.f32.gmra.mxu0 %v44_v12  ;;  %v152_v12 = vld [vmem:[%s4570_s0 + $0x3c8] sm:$0xff] }
  0xc7   :  { %987 = vmatprep.mubr.f32.mxu0 %v54_v14  ;;  %2390 = vmatpush3.msra.mxu0 %v461_v13  ;;  %v162_v13 = vld [vmem:[%s4570_s0 + $0x418] sm:$0xff] }
  0xc8   :  { %1208 = vmatmul.mubr.f32.gmra.mxu1 %v46_v15  ;;  %2391 = vmatprep.subr.mxu0 %v460_v16  ;;  %v154_v14 = vld [vmem:[%s4570_s0 + $0x3d8] sm:$0xff]  ;;  %v164_v15 = vld [vmem:[%s4570_s0 + $0x428] sm:$0xff] }
  0xc9   :  { %1212 = vmatprep.mubr.f32.mxu1 %v56_v17  ;;  %2392 = vmatpush3.msra.mxu0 %v460_v16  ;;  %v161_v16 = vld [vmem:[%s4570_s0 + $0x410] sm:$0xff]  ;;  %v171_v17 = vld [vmem:[%s4570_s0 + $0x460] sm:$0xff] }
  0xca   :  { %988 = vmatmul.mubr.f32.gmra.mxu0 %v53_v18  ;;  %2393 = vmatprep.subr.mxu0 %v459_v19  ;;  %v163_v18 = vld [vmem:[%s4570_s0 + $0x420] sm:$0xff] }
  0xcb   :  { %992 = vmatprep.mubr.f32.mxu0 %v63_v20  ;;  %2394 = vmatpush3.msra.mxu0 %v459_v19  ;;  %v173_v19 = vld [vmem:[%s4570_s0 + $0x470] sm:$0xff]  ;;  %v170_v20 = vld [vmem:[%s4570_s0 + $0x458] sm:$0xff] }
  0xcc   :  { %1213 = vmatmul.mubr.f32.gmra.mxu1 %v55_v21  ;;  %2395 = vmatprep.subr.mxu0 %v458_v22  ;;  %v180_v21 = vld [vmem:[%s4570_s0 + $0x4a8] sm:$0xff] }
  0xcd   :  { %1217 = vmatprep.mubr.f32.mxu1 %v65_v23  ;;  %2396 = vmatpush3.msra.mxu0 %v458_v22  ;;  %v172_v22 = vld [vmem:[%s4570_s0 + $0x468] sm:$0xff]  ;;  %v182_v23 = vld [vmem:[%s4570_s0 + $0x4b8] sm:$0xff] }
  0xce   :  { %993 = vmatmul.mubr.f32.gmra.mxu0 %v62_v24  ;;  %2397 = vmatprep.subr.mxu0 %v457_v25  ;;  %v179_v24 = vld [vmem:[%s4570_s0 + $0x4a0] sm:$0xff] }
  0xcf   :  { %997 = vmatprep.mubr.f32.mxu0 %v72_v26  ;;  %2398 = vmatpush3.msra.mxu0 %v457_v25  ;;  %v189_v25 = vld [vmem:[%s4570_s0 + $0x4f0] sm:$0xff] }
  0xd0   :  { %1218 = vmatmul.mubr.f32.gmra.mxu1 %v64_v27  ;;  %2399 = vmatprep.subr.mxu0 %v456_v28  ;;  %v181_v26 = vld [vmem:[%s4570_s0 + $0x4b0] sm:$0xff] }
  0xd1   :  { %1222 = vmatprep.mubr.f32.mxu1 %v74_v29  ;;  %2400 = vmatpush3.msra.mxu0 %v456_v28  ;;  %v191_v28 = vld [vmem:[%s4570_s0 + $0x500] sm:$0xff]  ;;  %v188_v29 = vld [vmem:[%s4570_s0 + $0x4e8] sm:$0xff] }
  0xd2   :  { %998 = vmatmul.mubr.f32.gmra.mxu0 %v71_v30  ;;  %2401 = vmatprep.subr.mxu0 %v455_v31 }
  0xd3   :  { %1002 = vmatprep.mubr.f32.mxu0 %v81_v32  ;;  %2402 = vmatpush3.msra.mxu0 %v455_v31  ;;  %v198_v32 = vld [vmem:[%s4570_s0 + $0x538] sm:$0xff] }
  0xd4   :  { %1223 = vmatmul.mubr.f32.gmra.mxu1 %v73_v33  ;;  %2403 = vmatprep.subr.mxu0 %v454_v34 }
  0xd5   :  { %1227 = vmatprep.mubr.f32.mxu1 %v83_v35  ;;  %2404 = vmatpush3.msra.mxu0 %v454_v34  ;;  %v190_v34 = vld [vmem:[%s4570_s0 + $0x4f8] sm:$0xff] }
  0xd6   :  { %1003 = vmatmul.mubr.f32.gmra.mxu0 %v80_v36  ;;  %2405 = vmatprep.subr.mxu0 %v453_v37 }
  0xd7   :  { %1007 = vmatprep.mubr.f32.mxu0 %v90_v38  ;;  %2406 = vmatpush3.msra.mxu0 %v453_v37  ;;  %v200_v37 = vld [vmem:[%s4570_s0 + $0x548] sm:$0xff]  ;;  %v197_v38 = vld [vmem:[%s4570_s0 + $0x530] sm:$0xff] }
  0xd8   :  { %1228 = vmatmul.mubr.f32.gmra.mxu1 %v82_v39  ;;  %2407 = vmatprep.subr.mxu0 %v452_v40 }
  0xd9   :  { %1232 = vmatprep.mubr.f32.mxu1 %v92_v41  ;;  %2408 = vmatpush3.msra.mxu0 %v452_v40  ;;  %v207_v41 = vld [vmem:[%s4570_s0 + $0x580] sm:$0xff] }
  0xda   :  { %1008 = vmatmul.mubr.f32.gmra.mxu0 %v89_v42  ;;  %2409 = vmatprep.subr.mxu0 %v451_v43 }
  0xdb   :  { %1012 = vmatprep.mubr.f32.mxu0 %v99_v44  ;;  %2410 = vmatpush3.msra.mxu0 %v451_v43  ;;  %v199_v43 = vld [vmem:[%s4570_s0 + $0x540] sm:$0xff] }
  0xdc   :  { %1233 = vmatmul.mubr.f32.gmra.mxu1 %v91_v45  ;;  %2411 = vmatprep.subr.mxu0 %v450_v46 }
  0xdd   :  { %1237 = vmatprep.mubr.f32.mxu1 %v101_v47  ;;  %2412 = vmatpush3.msra.mxu0 %v450_v46  ;;  %v209_v46 = vld [vmem:[%s4570_s0 + $0x590] sm:$0xff]  ;;  %v206_v47 = vld [vmem:[%s4570_s0 + $0x578] sm:$0xff] }
  0xde   :  { %1013 = vmatmul.mubr.f32.gmra.mxu0 %v98_v48  ;;  %2413 = vmatprep.subr.mxu0 %v449_v49 }
  0xdf   :  { %1017 = vmatprep.mubr.f32.mxu0 %v108_v50  ;;  %2414 = vmatpush3.msra.mxu0 %v449_v49  ;;  %v216_v50 = vld [vmem:[%s4570_s0 + $0x5c8] sm:$0xff] }
  0xe0   :  { %1238 = vmatmul.mubr.f32.gmra.mxu1 %v100_v51  ;;  %2415 = vmatprep.subr.mxu0 %v448_v52 }
  0xe1   :  { %1242 = vmatprep.mubr.f32.mxu1 %v110_v53  ;;  %2416 = vmatpush3.msra.mxu0 %v448_v52  ;;  %v208_v52 = vld [vmem:[%s4570_s0 + $0x588] sm:$0xff] }
  0xe2   :  { %1018 = vmatmul.mubr.f32.gmra.mxu0 %v107_v54  ;;  %2417 = vmatprep.subr.mxu0 %v447_v55 }
  0xe3   :  { %1022 = vmatprep.mubr.f32.mxu0 %v117_v56  ;;  %2418 = vmatpush3.msra.mxu0 %v447_v55  ;;  %v218_v55 = vld [vmem:[%s4570_s0 + $0x5d8] sm:$0xff]  ;;  %v215_v56 = vld [vmem:[%s4570_s0 + $0x5c0] sm:$0xff] }
  0xe4   :  { %1243 = vmatmul.mubr.f32.gmra.mxu1 %v109_v57 }
  0xe5   :  { %1247 = vmatprep.mubr.f32.mxu1 %v119_v58 }
  0xe6   :  { %1023 = vmatmul.mubr.f32.gmra.mxu0 %v116_v59  ;;  %v225_v59 = vld [vmem:[%s4570_s0 + $0x610] sm:$0xff] }
  0xe7   :  { %1027 = vmatprep.mubr.f32.mxu0 %v126_v60 }
  0xe8   :  { %1248 = vmatmul.mubr.f32.gmra.mxu1 %v118_v61  ;;  %v217_v61 = vld [vmem:[%s4570_s0 + $0x5d0] sm:$0xff] }
  0xe9   :  { %1252 = vmatprep.mubr.f32.mxu1 %v128_v62 }
  0xea   :  { %1028 = vmatmul.mubr.f32.gmra.mxu0 %v125_v63 }
  0xeb   :  { %1032 = vmatprep.mubr.f32.mxu0 %v135_v1  ;;  %v227_v1 = vld [vmem:[%s4570_s0 + $0x620] sm:$0xff] }
  0xec   :  { %1253 = vmatmul.mubr.f32.gmra.mxu1 %v127_v2  ;;  %v224_v2 = vld [vmem:[%s4570_s0 + $0x608] sm:$0xff] }
  0xed   :  { %1257 = vmatprep.mubr.f32.mxu1 %v137_v3 }
  0xee   :  { %1033 = vmatmul.mubr.f32.gmra.mxu0 %v134_v4 }
  0xef   :  { %1037 = vmatprep.mubr.f32.mxu0 %v144_v5  ;;  %v234_v5 = vld [vmem:[%s4570_s0 + $0x658] sm:$0xff] }
  0xf0   :  { %1258 = vmatmul.mubr.f32.gmra.mxu1 %v136_v6 }
  0xf1   :  { %1262 = vmatprep.mubr.f32.mxu1 %v146_v7  ;;  %v226_v7 = vld [vmem:[%s4570_s0 + $0x618] sm:$0xff] }
  0xf2   :  { %1038 = vmatmul.mubr.f32.gmra.mxu0 %v143_v8 }
  0xf3   :  { %1042 = vmatprep.mubr.f32.mxu0 %v153_v9 }
  0xf4   :  { %1263 = vmatmul.mubr.f32.gmra.mxu1 %v145_v10  ;;  %v236_v10 = vld [vmem:[%s4570_s0 + $0x668] sm:$0xff] }
  0xf5   :  { %1267 = vmatprep.mubr.f32.mxu1 %v155_v11  ;;  %v233_v11 = vld [vmem:[%s4570_s0 + $0x650] sm:$0xff] }
  0xf6   :  { %1043 = vmatmul.mubr.f32.gmra.mxu0 %v152_v12 }
  0xf7   :  { %1047 = vmatprep.mubr.f32.mxu0 %v162_v13 }
  0xf8   :  { %1268 = vmatmul.mubr.f32.gmra.mxu1 %v154_v14  ;;  %v243_v14 = vld [vmem:[%s4570_s0 + $0x6a0] sm:$0xff] }
  0xf9   :  { %1272 = vmatprep.mubr.f32.mxu1 %v164_v15 }
  0xfa   :  { %1048 = vmatmul.mubr.f32.gmra.mxu0 %v161_v16  ;;  %v235_v16 = vld [vmem:[%s4570_s0 + $0x660] sm:$0xff] }
  0xfb   :  { %1052 = vmatprep.mubr.f32.mxu0 %v171_v17 }
  0xfc   :  { %1273 = vmatmul.mubr.f32.gmra.mxu1 %v163_v18 }
  0xfd   :  { %1277 = vmatprep.mubr.f32.mxu1 %v173_v19  ;;  %v245_v19 = vld [vmem:[%s4570_s0 + $0x6b0] sm:$0xff] }
  0xfe   :  { %1053 = vmatmul.mubr.f32.gmra.mxu0 %v170_v20  ;;  %v242_v20 = vld [vmem:[%s4570_s0 + $0x698] sm:$0xff] }
  0xff   :  { %1057 = vmatprep.mubr.f32.mxu0 %v180_v21 }
 0x100   :  { %1278 = vmatmul.mubr.f32.gmra.mxu1 %v172_v22 }
 0x101   :  { %1282 = vmatprep.mubr.f32.mxu1 %v182_v23  ;;  %v529_v27 = vpop.f32.mrf.mxu0  ;;  %v252_v23 = vld [vmem:[%s4570_s0 + $0x6e8] sm:$0xff] }
 0x102   :  { %1058 = vmatmul.mubr.f32.gmra.mxu0 %v179_v24 }
 0x103   :  { %1062 = vmatprep.mubr.f32.mxu0 %v189_v25  ;;  %v754_v30 = vpop.f32.mrf.mxu1  ;;  %v531_v31 = vpop.f32.mrf.mxu0  ;;  %v244_v25 = vld [vmem:[%s4570_s0 + $0x6a8] sm:$0xff] }
 0x104   :  { %1283 = vmatmul.mubr.f32.gmra.mxu1 %v181_v26  ;;  %v3700_v33 = vadd.f32 %v754_v30, %v529_v27 }
 0x105   :  { %1287 = vmatprep.mubr.f32.mxu1 %v191_v28  ;;  %v756_v35 = vpop.f32.mrf.mxu1  ;;  %v534_v36 = vpop.f32.mrf.mxu0  ;;  %v254_v28 = vld [vmem:[%s4570_s0 + $0x6f8] sm:$0xff] }
 0x106   :  { %1063 = vmatmul.mubr.f32.gmra.mxu0 %v188_v29  ;;  %v251_v29 = vld [vmem:[%s4570_s0 + $0x6e0] sm:$0xff]  ;;  %v253_v35 = vld [vmem:[%s4570_s0 + $0x6f0] sm:$0xff] }
 0x107   :  { %1067 = vmatprep.mubr.f32.mxu0 %v198_v32  ;;  %v759_v39 = vpop.f32.mrf.mxu1  ;;  %v536_v40 = vpop.f32.mrf.mxu0  ;;  %v261_v32 = vld [vmem:[%s4570_s0 + $0x730] sm:$0xff] }
 0x108   :  { %1288 = vmatmul.mubr.f32.gmra.mxu1 %v190_v34  ;;  %v3714_v42 = vadd.f32 %v759_v39, %v534_v36  ;;  %v260_v39 = vld [vmem:[%s4570_s0 + $0x728] sm:$0xff] }
 0x109   :  { %1292 = vmatprep.mubr.f32.mxu1 %v200_v37  ;;  %v761_v44 = vpop.f32.mrf.mxu1 }
 0x10a   :  { %v539_v45 = vpop.f32.mrf.mxu0  ;;  %1068 = vmatmul.mubr.f32.gmra.mxu0 %v197_v38  ;;  %v263_v38 = vld [vmem:[%s4570_s0 + $0x740] sm:$0xff] }
 0x10b   :  { %1072 = vmatprep.mubr.f32.mxu0 %v207_v41 }
 0x10c   :  { %v764_v48 = vpop.f32.mrf.mxu1  ;;  %v541_v49 = vpop.f32.mrf.mxu0  ;;  %1293 = vmatmul.mubr.f32.gmra.mxu1 %v199_v43  ;;  %v270_v43 = vld [vmem:[%s4570_s0 + $0x778] sm:$0xff] }
 0x10d   :  { %v3728_v51 = vadd.f32 %v764_v48, %v539_v45  ;;  %1297 = vmatprep.mubr.f32.mxu1 %v209_v46  ;;  %v262_v45 = vld [vmem:[%s4570_s0 + $0x738] sm:$0xff]  ;;  %v272_v48 = vld [vmem:[%s4570_s0 + $0x788] sm:$0xff]  ;;  %v269_v49 = vld [vmem:[%s4570_s0 + $0x770] sm:$0xff] }
 0x10e   :  { %v766_v53 = vpop.f32.mrf.mxu1  ;;  %v544_v54 = vpop.f32.mrf.mxu0  ;;  %1073 = vmatmul.mubr.f32.gmra.mxu0 %v206_v47 }
 0x10f   :  { %1077 = vmatprep.mubr.f32.mxu0 %v216_v50  ;;  %v279_v53 = vld [vmem:[%s4570_s0 + $0x7c0] sm:$0xff] }
 0x110   :  { %v769_v57 = vpop.f32.mrf.mxu1  ;;  %v546_v58 = vpop.f32.mrf.mxu0  ;;  %1298 = vmatmul.mubr.f32.gmra.mxu1 %v208_v52 }
 0x111   :  { %v3742_v60 = vadd.f32 %v769_v57, %v544_v54  ;;  %1302 = vmatprep.mubr.f32.mxu1 %v218_v55  ;;  %v271_v55 = vld [vmem:[%s4570_s0 + $0x780] sm:$0xff]  ;;  %v281_v58 = vld [vmem:[%s4570_s0 + $0x7d0] sm:$0xff] }
 0x112   :  { %v771_v62 = vpop.f32.mrf.mxu1  ;;  %v549_v63 = vpop.f32.mrf.mxu0  ;;  %1078 = vmatmul.mubr.f32.gmra.mxu0 %v215_v56 }
 0x113   :  { %1082 = vmatprep.mubr.f32.mxu0 %v225_v59  ;;  %v278_v59 = vld [vmem:[%s4570_s0 + $0x7b8] sm:$0xff] }
 0x114   :  { %v774_v3 = vpop.f32.mrf.mxu1  ;;  %v551_v4 = vpop.f32.mrf.mxu0  ;;  %1303 = vmatmul.mubr.f32.gmra.mxu1 %v217_v61 }
 0x115   :  { %v3756_v6 = vadd.f32 %v774_v3, %v549_v63  ;;  %1307 = vmatprep.mubr.f32.mxu1 %v227_v1  ;;  %v288_v63 = vld [vmem:[%s4570_s0 + $0x808] sm:$0xff] }
 0x116   :  { %v776_v8 = vpop.f32.mrf.mxu1  ;;  %v554_v9 = vpop.f32.mrf.mxu0  ;;  %1083 = vmatmul.mubr.f32.gmra.mxu0 %v224_v2  ;;  %v280_v2 = vld [vmem:[%s4570_s0 + $0x7c8] sm:$0xff] }
 0x117   :  { %1087 = vmatprep.mubr.f32.mxu0 %v234_v5  ;;  %v290_v5 = vld [vmem:[%s4570_s0 + $0x818] sm:$0xff] }
 0x118   :  { %v779_v12 = vpop.f32.mrf.mxu1  ;;  %v556_v13 = vpop.f32.mrf.mxu0  ;;  %1308 = vmatmul.mubr.f32.gmra.mxu1 %v226_v7  ;;  %v287_v7 = vld [vmem:[%s4570_s0 + $0x800] sm:$0xff] }
 0x119   :  { %v3770_v15 = vadd.f32 %v779_v12, %v554_v9  ;;  %1312 = vmatprep.mubr.f32.mxu1 %v236_v10  ;;  %v297_v10 = vld [vmem:[%s4570_s0 + $0x850] sm:$0xff] }
 0x11a   :  { %v781_v17 = vpop.f32.mrf.mxu1  ;;  %v559_v18 = vpop.f32.mrf.mxu0  ;;  %1088 = vmatmul.mubr.f32.gmra.mxu0 %v233_v11  ;;  %v289_v12 = vld [vmem:[%s4570_s0 + $0x810] sm:$0xff] }
 0x11b   :  { %1092 = vmatprep.mubr.f32.mxu0 %v243_v14  ;;  %v296_v17 = vld [vmem:[%s4570_s0 + $0x848] sm:$0xff] }
 0x11c   :  { %v784_v21 = vpop.f32.mrf.mxu1  ;;  %v561_v22 = vpop.f32.mrf.mxu0  ;;  %1313 = vmatmul.mubr.f32.gmra.mxu1 %v235_v16  ;;  %v299_v16 = vld [vmem:[%s4570_s0 + $0x860] sm:$0xff] }
 0x11d   :  { %v3784_v24 = vadd.f32 %v784_v21, %v559_v18  ;;  %1317 = vmatprep.mubr.f32.mxu1 %v245_v19  ;;  %v298_v22 = vld [vmem:[%s4570_s0 + $0x858] sm:$0xff] }
 0x11e   :  { %v786_v26 = vpop.f32.mrf.mxu1  ;;  %v564_v27 = vpop.f32.mrf.mxu0  ;;  %1093 = vmatmul.mubr.f32.gmra.mxu0 %v242_v20  ;;  %v306_v20 = vld [vmem:[%s4570_s0 + $0x898] sm:$0xff] }
 0x11f   :  { %1097 = vmatprep.mubr.f32.mxu0 %v252_v23  ;;  %v308_v26 = vld [vmem:[%s4570_s0 + $0x8a8] sm:$0xff] }
 0x120   :  { %v789_v30 = vpop.f32.mrf.mxu1  ;;  %v566_v31 = vpop.f32.mrf.mxu0  ;;  %1318 = vmatmul.mubr.f32.gmra.mxu1 %v244_v25 }
 0x121   :  { %v3798_v34 = vadd.f32 %v789_v30, %v564_v27  ;;  %1322 = vmatprep.mubr.f32.mxu1 %v254_v28  ;;  %v305_v27 = vld [vmem:[%s4570_s0 + $0x890] sm:$0xff]  ;;  %v315_v30 = vld [vmem:[%s4570_s0 + $0x8e0] sm:$0xff] }
 0x122   :  { %v791_v36 = vpop.f32.mrf.mxu1  ;;  %v569_v37 = vpop.f32.mrf.mxu0  ;;  %1098 = vmatmul.mubr.f32.gmra.mxu0 %v251_v29 }
 0x123   :  { %1102 = vmatprep.mubr.f32.mxu0 %v261_v32  ;;  %v307_v32 = vld [vmem:[%s4570_s0 + $0x8a0] sm:$0xff] }
 0x124   :  { %v794_v40 = vpop.f32.mrf.mxu1  ;;  %v571_v41 = vpop.f32.mrf.mxu0  ;;  %1323 = vmatmul.mubr.f32.gmra.mxu1 %v253_v35 }
 0x125   :  { %v3812_v44 = vadd.f32 %v794_v40, %v569_v37  ;;  %1327 = vmatprep.mubr.f32.mxu1 %v263_v38  ;;  %v317_v37 = vld [vmem:[%s4570_s0 + $0x8f0] sm:$0xff]  ;;  %v314_v38 = vld [vmem:[%s4570_s0 + $0x8d8] sm:$0xff]  ;;  %v39_v41 = vld [vmem:[%s4570_s0 + $0x40] sm:$0xff] }
 0x126   :  { %v796_v46 = vpop.f32.mrf.mxu1  ;;  %v574_v47 = vpop.f32.mrf.mxu0  ;;  %1103 = vmatmul.mubr.f32.gmra.mxu0 %v260_v39 }
 0x127   :  { %1107 = vmatprep.mubr.f32.mxu0 %v270_v43  ;;  %v2255_v43 = vld [vmem:[%s4571_s2 + $0xf8] sm:$0xff]  ;;  %v316_v46 = vld [vmem:[%s4570_s0 + $0x8e8] sm:$0xff] }
 0x128   :  { %v799_v50 = vpop.f32.mrf.mxu1  ;;  %v576_v52 = vpop.f32.mrf.mxu0  ;;  %1328 = vmatmul.mubr.f32.gmra.mxu1 %v262_v45  ;;  %1705 = vmatprep.subr.mxu1 %v2255_v43 }
 0x129   :  { %v3826_v54 = vadd.f32 %v799_v50, %v574_v47  ;;  %1332 = vmatprep.mubr.f32.mxu1 %v272_v48  ;;  %v2254_v47 = vld [vmem:[%s4571_s2 + $0xf0] sm:$0xff]  ;;  %v48_v50 = vld [vmem:[%s4570_s0 + $0x88] sm:$0xff] }
 0x12a   :  { %v801_v56 = vpop.f32.mrf.mxu1  ;;  %v579_v57 = vpop.f32.mrf.mxu0  ;;  %1108 = vmatmul.mubr.f32.gmra.mxu0 %v269_v49  ;;  %1706 = vmatpush1.msra.mxu1 %v2254_v47 }
 0x12b   :  { %1112 = vmatprep.mubr.f32.mxu0 %v279_v53 }
 0x12c   :  { %v804_v61 = vpop.f32.mrf.mxu1  ;;  %v581_v62 = vpop.f32.mrf.mxu0  ;;  %1333 = vmatmul.mubr.f32.gmra.mxu1 %v271_v55  ;;  %v57_v55 = vld [vmem:[%s4570_s0 + $0xd0] sm:$0xff] }
 0x12d   :  { %v3840_v1 = vadd.f32 %v804_v61, %v579_v57  ;;  %1337 = vmatprep.mubr.f32.mxu1 %v281_v58 }
 0x12e   :  { %v806_v3 = vpop.f32.mrf.mxu1  ;;  %v584_v4 = vpop.f32.mrf.mxu0  ;;  %1113 = vmatmul.mubr.f32.gmra.mxu0 %v278_v59  ;;  %v66_v59 = vld [vmem:[%s4570_s0 + $0x118] sm:$0xff] }
 0x12f   :  { %1117 = vmatprep.mubr.f32.mxu0 %v288_v63  ;;  %v75_v63 = vld [vmem:[%s4570_s0 + $0x160] sm:$0xff] }
 0x130   :  { %v809_v8 = vpop.f32.mrf.mxu1  ;;  %v586_v9 = vpop.f32.mrf.mxu0  ;;  %1338 = vmatmul.mubr.f32.gmra.mxu1 %v280_v2 }
 0x131   :  { %v3854_v11 = vadd.f32 %v809_v8, %v584_v4  ;;  %1342 = vmatprep.mubr.f32.mxu1 %v290_v5  ;;  %v84_v5 = vld [vmem:[%s4570_s0 + $0x1a8] sm:$0xff]  ;;  %v93_v9 = vld [vmem:[%s4570_s0 + $0x1f0] sm:$0xff] }
 0x132   :  { %v811_v13 = vpop.f32.mrf.mxu1  ;;  %v589_v14 = vpop.f32.mrf.mxu0  ;;  %1118 = vmatmul.mubr.f32.gmra.mxu0 %v287_v7 }
 0x133   :  { %1122 = vmatprep.mubr.f32.mxu0 %v297_v10 }
 0x134   :  { %v814_v18 = vpop.f32.mrf.mxu1  ;;  %v591_v19 = vpop.f32.mrf.mxu0  ;;  %1343 = vmatmul.mubr.f32.gmra.mxu1 %v289_v12 }
 0x135   :  { %v3868_v21 = vadd.f32 %v814_v18, %v589_v14  ;;  %1347 = vmatprep.mubr.f32.mxu1 %v299_v16  ;;  %v102_v14 = vld [vmem:[%s4570_s0 + $0x238] sm:$0xff]  ;;  %v2253_v16 = vld [vmem:[%s4571_s2 + $0xe8] sm:$0xff]  ;;  %v111_v19 = vld [vmem:[%s4570_s0 + $0x280] sm:$0xff] }
 0x136   :  { %v816_v23 = vpop.f32.mrf.mxu1  ;;  %v594_v25 = vpop.f32.mrf.mxu0  ;;  %1123 = vmatmul.mubr.f32.gmra.mxu0 %v296_v17  ;;  %1707 = vmatprep.subr.mxu1 %v2253_v16  ;;  %v210_v16 = vld [vmem:[%s4570_s0 + $0x598] sm:$0xff] }
 0x137   :  { %1127 = vmatprep.mubr.f32.mxu0 %v306_v20 }
 0x138   :  { %v819_v28 = vpop.f32.mrf.mxu1  ;;  %v596_v29 = vpop.f32.mrf.mxu0  ;;  %1348 = vmatmul.mubr.f32.gmra.mxu1 %v298_v22  ;;  %v2252_v22 = vld [vmem:[%s4571_s2 + $0xe0] sm:$0xff] }
 0x139   :  { %v3882_v31 = vadd.f32 %v819_v28, %v594_v25  ;;  %1352 = vmatprep.mubr.f32.mxu1 %v308_v26  ;;  %1708 = vmatpush1.msra.mxu1 %v2252_v22  ;;  %v120_v26 = vld [vmem:[%s4570_s0 + $0x2c8] sm:$0xff]  ;;  %v129_v29 = vld [vmem:[%s4570_s0 + $0x310] sm:$0xff] }
 0x13a   :  { %v821_v35 = vpop.f32.mrf.mxu1  ;;  %v599_v36 = vpop.f32.mrf.mxu0  ;;  %1128 = vmatmul.mubr.f32.gmra.mxu0 %v305_v27 }
 0x13b   :  { %1132 = vmatprep.mubr.f32.mxu0 %v315_v30 }
 0x13c   :  { %v824_v39 = vpop.f32.mrf.mxu1  ;;  %v601_v40 = vpop.f32.mrf.mxu0  ;;  %1353 = vmatmul.mubr.f32.gmra.mxu1 %v307_v32 }
 0x13d   :  { %v3899_v45 = vadd.f32 %v824_v39, %v599_v36  ;;  %1357 = vmatprep.mubr.f32.mxu1 %v317_v37  ;;  %v138_v36 = vld [vmem:[%s4570_s0 + $0x358] sm:$0xff]  ;;  %v147_v39 = vld [vmem:[%s4570_s0 + $0x3a0] sm:$0xff] }
 0x13e   :  { %v826_v48 = vpop.f32.mrf.mxu1  ;;  %v604_v49 = vpop.f32.mrf.mxu0  ;;  %1133 = vmatmul.mubr.f32.gmra.mxu0 %v314_v38 }
 0x13f   :  { %2419 = vmatprep.mubr.f32.mxu0 %v39_v41 }
 0x140   :  { %v829_v52 = vpop.f32.mrf.mxu1  ;;  %v606_v53 = vpop.f32.mrf.mxu0  ;;  %1358 = vmatmul.mubr.f32.gmra.mxu1 %v316_v46  ;;  %v156_v46 = vld [vmem:[%s4570_s0 + $0x3e8] sm:$0xff] }
 0x141   :  { %v3913_v56 = vadd.f32 %v829_v52, %v604_v49  ;;  %1753 = vmatprep.mubr.f32.mxu1 %v2488_v0  ;;  %v165_v49 = vld [vmem:[%s4570_s0 + $0x430] sm:$0xff] }
 0x142   :  { %v831_v57 = vpop.f32.mrf.mxu1  ;;  %v609_v58 = vpop.f32.mrf.mxu0  ;;  %2420 = vmatmul.mubr.f32.vlgmr.msra.gmra.mxu0 %v48_v50 }
 0x143   :  { %2422 = vmatprep.mubr.f32.mxu0 %v57_v55  ;;  %v174_v55 = vld [vmem:[%s4570_s0 + $0x478] sm:$0xff] }
 0x144   :  { %v834_v61 = vpop.f32.mrf.mxu1  ;;  %v611_v62 = vpop.f32.mrf.mxu0  ;;  %v2251_v57 = vld [vmem:[%s4571_s2 + $0xd8] sm:$0xff] }
 0x145   :  { %v3922_v2 = vadd.f32 %v834_v61, %v609_v58  ;;  %v183_v61 = vld [vmem:[%s4570_s0 + $0x4c0] sm:$0xff]  ;;  %1709 = vmatprep.subr.mxu1 %v2251_v57  ;;  %v273_v57 = vld [vmem:[%s4570_s0 + $0x790] sm:$0xff] }
 0x146   :  { %v836_v3 = vpop.f32.mrf.mxu1  ;;  %v614_v4 = vpop.f32.mrf.mxu0  ;;  %2423 = vmatmul.mubr.f32.gmra.mxu0 %v66_v59 }
 0x147   :  { %2425 = vmatprep.mubr.f32.mxu0 %v75_v63  ;;  %v2250_v63 = vld [vmem:[%s4571_s2 + $0xd0] sm:$0xff] }
 0x148   :  { %v839_v7 = vpop.f32.mrf.mxu1  ;;  %v616_v8 = vpop.f32.mrf.mxu0  ;;  %1710 = vmatpush1.msra.mxu1 %v2250_v63  ;;  %v282_v63 = vld [vmem:[%s4570_s0 + $0x7d8] sm:$0xff] }
 0x149   :  { %v3930_v10 = vadd.f32 %v839_v7, %v614_v4 }
 0x14a   :  { %v841_v12 = vpop.f32.mrf.mxu1  ;;  %v619_v13 = vpop.f32.mrf.mxu0  ;;  %2426 = vmatmul.mubr.f32.gmra.mxu0 %v84_v5  ;;  %v192_v5 = vld [vmem:[%s4570_s0 + $0x508] sm:$0xff] }
 0x14b   :  { %2428 = vmatprep.mubr.f32.mxu0 %v93_v9  ;;  %v201_v9 = vld [vmem:[%s4570_s0 + $0x550] sm:$0xff] }
 0x14c   :  { %v844_v17 = vpop.f32.mrf.mxu1  ;;  %v621_v18 = vpop.f32.mrf.mxu0 }
 0x14d   :  { %v3941_v20 = vadd.f32 %v844_v17, %v619_v13 }
 0x14e   :  { %v846_v23 = vpop.f32.mrf.mxu1  ;;  %v624_v25 = vpop.f32.mrf.mxu0  ;;  %2429 = vmatmul.mubr.f32.gmra.mxu0 %v102_v14 }
 0x14f   :  { %2431 = vmatprep.mubr.f32.mxu0 %v111_v19  ;;  %v219_v19 = vld [vmem:[%s4570_s0 + $0x5e0] sm:$0xff] }
 0x150   :  { %v849_v27 = vpop.f32.mrf.mxu1  ;;  %v626_v28 = vpop.f32.mrf.mxu0 }
 0x151   :  { %v3952_v30 = vadd.f32 %v849_v27, %v624_v25 }
 0x152   :  { %v851_v32 = vpop.f32.mrf.mxu1  ;;  %v629_v35 = vpop.f32.mrf.mxu0  ;;  %2432 = vmatmul.mubr.f32.gmra.mxu0 %v120_v26  ;;  %v228_v26 = vld [vmem:[%s4570_s0 + $0x628] sm:$0xff] }
 0x153   :  { %2434 = vmatprep.mubr.f32.mxu0 %v129_v29  ;;  %v237_v29 = vld [vmem:[%s4570_s0 + $0x670] sm:$0xff] }
 0x154   :  { %v854_v37 = vpop.f32.mrf.mxu1  ;;  %v631_v38 = vpop.f32.mrf.mxu0 }
 0x155   :  { %v3960_v40 = vadd.f32 %v854_v37, %v629_v35  ;;  %v246_v37 = vld [vmem:[%s4570_s0 + $0x6b8] sm:$0xff]  ;;  %v2249_v38 = vld [vmem:[%s4571_s2 + $0xc8] sm:$0xff] }
 0x156   :  { %v856_v41 = vpop.f32.mrf.mxu1  ;;  %v634_v43 = vpop.f32.mrf.mxu0  ;;  %2435 = vmatmul.mubr.f32.gmra.mxu0 %v138_v36  ;;  %1711 = vmatprep.subr.mxu1 %v2249_v38 }
 0x157   :  { %2437 = vmatprep.mubr.f32.mxu0 %v147_v39 }
 0x158   :  { %v859_v47 = vpop.f32.mrf.mxu1  ;;  %v636_v48 = vpop.f32.mrf.mxu0 }
 0x159   :  { %v3968_v50 = vadd.f32 %v859_v47, %v634_v43  ;;  %v255_v43 = vld [vmem:[%s4570_s0 + $0x700] sm:$0xff] }
 0x15a   :  { %v861_v52 = vpop.f32.mrf.mxu1  ;;  %v639_v53 = vpop.f32.mrf.mxu0  ;;  %2438 = vmatmul.mubr.f32.gmra.mxu0 %v156_v46  ;;  %v2248_v47 = vld [vmem:[%s4571_s2 + $0xc0] sm:$0xff] }
 0x15b   :  { %2440 = vmatprep.mubr.f32.mxu0 %v165_v49  ;;  %1712 = vmatpush1.msra.mxu1 %v2248_v47  ;;  %v264_v52 = vld [vmem:[%s4570_s0 + $0x748] sm:$0xff] }
 0x15c   :  { %v864_v58 = vpop.f32.mrf.mxu1  ;;  %v641_v59 = vpop.f32.mrf.mxu0 }
 0x15d   :  { %v3979_v62 = vadd.f32 %v864_v58, %v639_v53 }
 0x15e   :  { %v866_v3 = vpop.f32.mrf.mxu1  ;;  %v644_v4 = vpop.f32.mrf.mxu0  ;;  %2441 = vmatmul.mubr.f32.gmra.mxu0 %v174_v55 }
 0x15f   :  { %2443 = vmatprep.mubr.f32.mxu0 %v183_v61 }
 0x160   :  { %v869_v7 = vpop.f32.mrf.mxu1  ;;  %v646_v8 = vpop.f32.mrf.mxu0 }
 0x161   :  { %v3990_v12 = vadd.f32 %v869_v7, %v644_v4 }
 0x162   :  { %v871_v13 = vpop.f32.mrf.mxu1  ;;  %v649_v14 = vpop.f32.mrf.mxu0  ;;  %2444 = vmatmul.mubr.f32.gmra.mxu0 %v192_v5  ;;  %v291_v5 = vld [vmem:[%s4570_s0 + $0x820] sm:$0xff] }
 0x163   :  { %2446 = vmatprep.mubr.f32.mxu0 %v201_v9  ;;  %v300_v13 = vld [vmem:[%s4570_s0 + $0x868] sm:$0xff] }
 0x164   :  { %v874_v17 = vpop.f32.mrf.mxu1  ;;  %v651_v18 = vpop.f32.mrf.mxu0 }
 0x165   :  { %v3998_v22 = vadd.f32 %v874_v17, %v649_v14  ;;  %v309_v17 = vld [vmem:[%s4570_s0 + $0x8b0] sm:$0xff] }
 0x166   :  { %v876_v23 = vpop.f32.mrf.mxu1  ;;  %v654_v25 = vpop.f32.mrf.mxu0  ;;  %2447 = vmatmul.mubr.f32.gmra.mxu0 %v210_v16 }
 0x167   :  { %2449 = vmatprep.mubr.f32.mxu0 %v219_v19 }
 0x168   :  { %v879_v27 = vpop.f32.mrf.mxu1  ;;  %v656_v28 = vpop.f32.mrf.mxu0 }
 0x169   :  { %v4006_v32 = vadd.f32 %v879_v27, %v654_v25  ;;  %v318_v25 = vld [vmem:[%s4570_s0 + $0x8f8] sm:$0xff] }
 0x16a   :  { %v881_v35 = vpop.f32.mrf.mxu1  ;;  %v659_v36 = vpop.f32.mrf.mxu0  ;;  %2450 = vmatmul.mubr.f32.gmra.mxu0 %v228_v26  ;;  %v2247_v26 = vld [vmem:[%s4571_s2 + $0xb8] sm:$0xff] }
 0x16b   :  { %2452 = vmatprep.mubr.f32.mxu0 %v237_v29  ;;  %1713 = vmatprep.subr.mxu1 %v2247_v26  ;;  %v2246_v35 = vld [vmem:[%s4571_s2 + $0xb0] sm:$0xff] }
 0x16c   :  { %v884_v39 = vpop.f32.mrf.mxu1  ;;  %v661_v41 = vpop.f32.mrf.mxu0  ;;  %1714 = vmatpush1.msra.mxu1 %v2246_v35 }
 0x16d   :  { %v4017_v46 = vadd.f32 %v884_v39, %v659_v36 }
 0x16e   :  { %v886_v48 = vpop.f32.mrf.mxu1  ;;  %v664_v49 = vpop.f32.mrf.mxu0  ;;  %2453 = vmatmul.mubr.f32.gmra.mxu0 %v246_v37 }
 0x16f   :  { %2455 = vmatprep.mubr.f32.mxu0 %v255_v43 }
 0x170   :  { %v889_v53 = vpop.f32.mrf.mxu1  ;;  %v666_v55 = vpop.f32.mrf.mxu0 }
 0x171   :  { %v4028_v58 = vadd.f32 %v889_v53, %v664_v49 }
 0x172   :  { %v891_v59 = vpop.f32.mrf.mxu1  ;;  %v669_v61 = vpop.f32.mrf.mxu0  ;;  %2456 = vmatmul.mubr.f32.gmra.mxu0 %v264_v52 }
 0x173   :  { %2458 = vmatprep.mubr.f32.mxu0 %v273_v57 }
 0x174   :  { %v894_v3 = vpop.f32.mrf.mxu1  ;;  %v671_v4 = vpop.f32.mrf.mxu0 }
 0x175   :  { %v4036_v7 = vadd.f32 %v894_v3, %v669_v61 }
 0x176   :  { %v896_v8 = vpop.f32.mrf.mxu1  ;;  %v674_v9 = vpop.f32.mrf.mxu0  ;;  %2459 = vmatmul.mubr.f32.gmra.mxu0 %v282_v63 }
 0x177   :  { %2461 = vmatprep.mubr.f32.mxu0 %v291_v5 }
 0x178   :  { %v899_v14 = vpop.f32.mrf.mxu1  ;;  %v676_v16 = vpop.f32.mrf.mxu0 }
 0x179   :  { %v4044_v18 = vadd.f32 %v899_v14, %v674_v9 }
 0x17a   :  { %v901_v19 = vpop.f32.mrf.mxu1  ;;  %v679_v23 = vpop.f32.mrf.mxu0  ;;  %2462 = vmatmul.mubr.f32.gmra.mxu0 %v300_v13 }
 0x17b   :  { %2464 = vmatprep.mubr.f32.mxu0 %v309_v17  ;;  %v2244_v19 = vld [vmem:[%s4571_s2 + $0xa0] sm:$0xff] }
 0x17c   :  { %v904_v27 = vpop.f32.mrf.mxu1  ;;  %v681_v28 = vpop.f32.mrf.mxu0 }
 0x17d   :  { %v4052_v29 = vadd.f32 %v904_v27, %v679_v23 }
 0x17e   :  { %v906_v36 = vpop.f32.mrf.mxu1  ;;  %v684_v37 = vpop.f32.mrf.mxu0  ;;  %2465 = vmatmul.mubr.f32.gmra.mxu0 %v318_v25 }
 0x180   :  { %v909_v38 = vpop.f32.mrf.mxu1  ;;  %v686_v39 = vpop.f32.mrf.mxu0 }
 0x181   :  { %v4057_v41 = vadd.f32 %v909_v38, %v684_v37 }
 0x182   :  { %v911_v43 = vpop.f32.mrf.mxu1  ;;  %v979_v47 = vpop.f32.mrf.mxu0 }
 0x183   :  { %v980_v48 = vadd.f32 %v979_v47, %v3700_v33  ;;  %v2245_v33 = vld [vmem:[%s4571_s2 + $0xa8] sm:$0xff] }
 0x184   :  { %v981_v49 = vpop.f32.mrf.mxu0  ;;  %v1204_v52 = vpop.f32.mrf.mxu1  ;;  %1715 = vmatprep.subr.mxu1 %v2245_v33 }
 0x185   :  { %v4060_v53 = vadd.f32 %v1204_v52, %v980_v48  ;;  %1716 = vmatpush1.msra.mxu1 %v2244_v19 }
 0x186   :  { %v984_v55 = vpop.f32.mrf.mxu0  ;;  %v1206_v57 = vpop.f32.mrf.mxu1 }
 0x187   :  { %v985_v59 = vadd.f32 %v984_v55, %v3714_v42 }
 0x188   :  { %v986_v61 = vpop.f32.mrf.mxu0  ;;  %v1209_v63 = vpop.f32.mrf.mxu1 }
 0x189   :  { %v4063_v3 = vadd.f32 %v1209_v63, %v985_v59 }
 0x18a   :  { %v989_v4 = vpop.f32.mrf.mxu0  ;;  %v1211_v5 = vpop.f32.mrf.mxu1 }
 0x18b   :  { %v990_v8 = vadd.f32 %v989_v4, %v3728_v51 }
 0x18c   :  { %v991_v9 = vpop.f32.mrf.mxu0  ;;  %v1214_v13 = vpop.f32.mrf.mxu1 }
 0x18d   :  { %v4066_v14 = vadd.f32 %v1214_v13, %v990_v8 }
 0x18e   :  { %v994_v16 = vpop.f32.mrf.mxu0  ;;  %v1216_v17 = vpop.f32.mrf.mxu1 }
 0x18f   :  { %v995_v42 = vadd.f32 %v994_v16, %v3742_v60 }
 0x190   :  { %v996_v23 = vpop.f32.mrf.mxu0  ;;  %v1219_v25 = vpop.f32.mrf.mxu1 }
 0x191   :  { %v4075_v51 = vadd.f32 %v1219_v25, %v995_v42 }
 0x192   :  { %v999_v26 = vpop.f32.mrf.mxu0  ;;  %v1221_v27 = vpop.f32.mrf.mxu1 }
 0x193   :  { %v1000_v28 = vadd.f32 %v999_v26, %v3756_v6 }
 0x194   :  { %v1001_v35 = vpop.f32.mrf.mxu0  ;;  %v1224_v36 = vpop.f32.mrf.mxu1 }
 0x195   :  { %v4078_v37 = vadd.f32 %v1224_v36, %v1000_v28 }
 0x196   :  { %v1004_v38 = vpop.f32.mrf.mxu0  ;;  %v1226_v39 = vpop.f32.mrf.mxu1 }
 0x197   :  { %v1005_v60 = vadd.f32 %v1004_v38, %v3770_v15  ;;  %v2243_v15 = vld [vmem:[%s4571_s2 + $0x98] sm:$0xff] }
 0x198   :  { %v1006_v43 = vpop.f32.mrf.mxu0  ;;  %v1229_v47 = vpop.f32.mrf.mxu1  ;;  %1717 = vmatprep.subr.mxu1 %v2243_v15 }
 0x199   :  { %v4081_v48 = vadd.f32 %v1229_v47, %v1005_v60 }
 0x19a   :  { %v1009_v49 = vpop.f32.mrf.mxu0  ;;  %v1231_v52 = vpop.f32.mrf.mxu1 }
 0x19b   :  { %v1010_v55 = vadd.f32 %v1009_v49, %v3784_v24  ;;  %v2242_v24 = vld [vmem:[%s4571_s2 + $0x90] sm:$0xff]  ;;  %v2240_v52 = vld [vmem:[%s4571_s2 + $0x80] sm:$0xff] }
 0x19c   :  { %v1011_v57 = vpop.f32.mrf.mxu0  ;;  %v1234_v59 = vpop.f32.mrf.mxu1  ;;  %1718 = vmatpush1.msra.mxu1 %v2242_v24 }
 0x19d   :  { %v4084_v61 = vadd.f32 %v1234_v59, %v1010_v55 }
 0x19e   :  { %v1014_v6 = vpop.f32.mrf.mxu0  ;;  %v1236_v63 = vpop.f32.mrf.mxu1 }
 0x19f   :  { %v1015_v4 = vadd.f32 %v1014_v6, %v3798_v34 }
 0x1a0   :  { %v1016_v5 = vpop.f32.mrf.mxu0  ;;  %v1239_v8 = vpop.f32.mrf.mxu1 }
 0x1a1   :  { %v4090_v9 = vadd.f32 %v1239_v8, %v1015_v4 }
 0x1a2   :  { %v1019_v13 = vpop.f32.mrf.mxu0  ;;  %v1241_v33 = vpop.f32.mrf.mxu1 }
 0x1a3   :  { %v1020_v16 = vadd.f32 %v1019_v13, %v3812_v44  ;;  %v2241_v44 = vld [vmem:[%s4571_s2 + $0x88] sm:$0xff] }
 0x1a4   :  { %v1021_v17 = vpop.f32.mrf.mxu0  ;;  %v1244_v34 = vpop.f32.mrf.mxu1  ;;  %1719 = vmatprep.subr.mxu1 %v2241_v44 }
 0x1a5   :  { %v4096_v42 = vadd.f32 %v1244_v34, %v1020_v16  ;;  %1720 = vmatpush1.msra.mxu1 %v2240_v52 }
 0x1a6   :  { %v1024_v19 = vpop.f32.mrf.mxu0  ;;  %v1246_v23 = vpop.f32.mrf.mxu1 }
 0x1a7   :  { %v1025_v25 = vadd.f32 %v1024_v19, %v3826_v54 }
 0x1a8   :  { %v1026_v26 = vpop.f32.mrf.mxu0  ;;  %v1249_v27 = vpop.f32.mrf.mxu1 }
 0x1a9   :  { %v4099_v28 = vadd.f32 %v1249_v27, %v1025_v25 }
 0x1aa   :  { %v1029_v35 = vpop.f32.mrf.mxu0  ;;  %v1251_v36 = vpop.f32.mrf.mxu1 }
 0x1ab   :  { %v1030_v38 = vadd.f32 %v1029_v35, %v3840_v1 }
 0x1ac   :  { %v1031_v39 = vpop.f32.mrf.mxu0  ;;  %v1254_v60 = vpop.f32.mrf.mxu1 }
 0x1ad   :  { %v4102_v43 = vadd.f32 %v1254_v60, %v1030_v38 }
 0x1ae   :  { %v1034_v47 = vpop.f32.mrf.mxu0  ;;  %v1256_v49 = vpop.f32.mrf.mxu1 }
 0x1af   :  { %v1035_v54 = vadd.f32 %v1034_v47, %v3854_v11 }
 0x1b0   :  { %v1036_v55 = vpop.f32.mrf.mxu0  ;;  %v1259_v57 = vpop.f32.mrf.mxu1 }
 0x1b1   :  { %v4111_v1 = vadd.f32 %v1259_v57, %v1035_v54 }
 0x1b2   :  { %v1039_v59 = vpop.f32.mrf.mxu0  ;;  %v1261_v6 = vpop.f32.mrf.mxu1 }
 0x1b3   :  { %v1040_v63 = vadd.f32 %v1039_v59, %v3868_v21  ;;  %v1668_v21 = vld [vmem:[%s4571_s2 + $0x78] sm:$0xff] }
 0x1b4   :  { %v1041_v4 = vpop.f32.mrf.mxu0  ;;  %v1264_v15 = vpop.f32.mrf.mxu1  ;;  %1779 = vmatprep.subr.mxu1 %v1668_v21 }
 0x1b5   :  { %v4114_v5 = vadd.f32 %v1264_v15, %v1040_v63 }
 0x1b6   :  { %v1044_v8 = vpop.f32.mrf.mxu0  ;;  %v1266_v24 = vpop.f32.mrf.mxu1 }
 0x1b7   :  { %v1045_v11 = vadd.f32 %v1044_v8, %v3882_v31 }
 0x1b8   :  { %v1046_v13 = vpop.f32.mrf.mxu0  ;;  %v1269_v33 = vpop.f32.mrf.mxu1 }
 0x1b9   :  { %v4117_v16 = vadd.f32 %v1269_v33, %v1045_v11 }
 0x1ba   :  { %v1049_v17 = vpop.f32.mrf.mxu0  ;;  %v1271_v34 = vpop.f32.mrf.mxu1 }
 0x1bb   :  { %v1050_v19 = vadd.f32 %v1049_v17, %v3899_v45 }
 0x1bc   :  { %v1051_v23 = vpop.f32.mrf.mxu0  ;;  %v1274_v25 = vpop.f32.mrf.mxu1 }
 0x1bd   :  { %v4123_v26 = vadd.f32 %v1274_v25, %v1050_v19 }
 0x1be   :  { %v1054_v27 = vpop.f32.mrf.mxu0  ;;  %v1276_v35 = vpop.f32.mrf.mxu1 }
 0x1bf   :  { %v1055_v31 = vadd.f32 %v1054_v27, %v3913_v56 }
 0x1c0   :  { %v1056_v36 = vpop.f32.mrf.mxu0  ;;  %v1279_v38 = vpop.f32.mrf.mxu1 }
 0x1c1   :  { %v4126_v39 = vadd.f32 %v1279_v38, %v1055_v31 }
 0x1c2   :  { %v1059_v60 = vpop.f32.mrf.mxu0  ;;  %v1281_v44 = vpop.f32.mrf.mxu1 }
 0x1c3   :  { %v1060_v45 = vadd.f32 %v1059_v60, %v3922_v2 }
 0x1c4   :  { %v1061_v47 = vpop.f32.mrf.mxu0  ;;  %v1284_v49 = vpop.f32.mrf.mxu1 }
 0x1c5   :  { %v4129_v54 = vadd.f32 %v1284_v49, %v1060_v45 }
 0x1c6   :  { %v1064_v52 = vpop.f32.mrf.mxu0  ;;  %v1286_v55 = vpop.f32.mrf.mxu1 }
 0x1c7   :  { %v1065_v57 = vadd.f32 %v1064_v52, %v3930_v10 }
 0x1c8   :  { %v1066_v59 = vpop.f32.mrf.mxu0  ;;  %v1289_v6 = vpop.f32.mrf.mxu1 }
 0x1c9   :  { %v4132_v63 = vadd.f32 %v1289_v6, %v1065_v57 }
 0x1ca   :  { %v1069_v56 = vpop.f32.mrf.mxu0  ;;  %v1291_v4 = vpop.f32.mrf.mxu1 }
 0x1cb   :  { %v1070_v15 = vadd.f32 %v1069_v56, %v3941_v20 }
 0x1cc   :  { %v1071_v8 = vpop.f32.mrf.mxu0  ;;  %v1294_v24 = vpop.f32.mrf.mxu1 }
 0x1cd   :  { %v4135_v11 = vadd.f32 %v1294_v24, %v1070_v15 }
 0x1ce   :  { %v1074_v2 = vpop.f32.mrf.mxu0  ;;  %v1296_v13 = vpop.f32.mrf.mxu1 }
 0x1cf   :  { %v1075_v33 = vadd.f32 %v1074_v2, %v3952_v30 }
 0x1d0   :  { %v1076_v17 = vpop.f32.mrf.mxu0  ;;  %v1299_v34 = vpop.f32.mrf.mxu1 }
 0x1d1   :  { %v4138_v19 = vadd.f32 %v1299_v34, %v1075_v33 }
 0x1d2   :  { %v1079_v10 = vpop.f32.mrf.mxu0  ;;  %v1301_v21 = vpop.f32.mrf.mxu1 }
 0x1d3   :  { %v1080_v23 = vadd.f32 %v1079_v10, %v3960_v40 }
 0x1d4   :  { %v1081_v25 = vpop.f32.mrf.mxu0  ;;  %v1304_v27 = vpop.f32.mrf.mxu1 }
 0x1d5   :  { %v4141_v35 = vadd.f32 %v1304_v27, %v1080_v23 }
 0x1d6   :  { %v1084_v20 = vpop.f32.mrf.mxu0  ;;  %v1306_v31 = vpop.f32.mrf.mxu1 }
 0x1d7   :  { %v1085_v36 = vadd.f32 %v1084_v20, %v3968_v50  ;;  %v2049_v31 = vld [vmem:[%s4572_s4 + $0x78] sm:$0xff] }
 0x1d8   :  { %v1086_v38 = vpop.f32.mrf.mxu0  ;;  %v1309_v60 = vpop.f32.mrf.mxu1 }
 0x1d9   :  { %v4144_v44 = vadd.f32 %v1309_v60, %v1085_v36 }
 0x1da   :  { %v1089_v30 = vpop.f32.mrf.mxu0  ;;  %v1311_v45 = vpop.f32.mrf.mxu1 }
 0x1db   :  { %v1090_v47 = vadd.f32 %v1089_v30, %v3979_v62  ;;  %v2063_v30 = vld [vmem:[%s4572_s4 + $0xe8] sm:$0xff] }
 0x1dc   :  { %v1091_v49 = vpop.f32.mrf.mxu0  ;;  %v1314_v52 = vpop.f32.mrf.mxu1 }
 0x1dd   :  { %v4147_v55 = vadd.f32 %v1314_v52, %v1090_v47 }
 0x1de   :  { %v1094_v40 = vpop.f32.mrf.mxu0  ;;  %v1316_v57 = vpop.f32.mrf.mxu1 }
 0x1df   :  { %v1095_v59 = vadd.f32 %v1094_v40, %v3990_v12 }
 0x1e0   :  { %v1096_v6 = vpop.f32.mrf.mxu0  ;;  %v1319_v56 = vpop.f32.mrf.mxu1 }
 0x1e1   :  { %v4150_v4 = vadd.f32 %v1319_v56, %v1095_v59 }
 0x1e2   :  { %v1099_v50 = vpop.f32.mrf.mxu0  ;;  %v1321_v15 = vpop.f32.mrf.mxu1 }
 0x1e3   :  { %v1100_v8 = vadd.f32 %v1099_v50, %v3998_v22  ;;  %v2065_v22 = vld [vmem:[%s4572_s4 + $0xf8] sm:$0xff] }
 0x1e4   :  { %v1101_v24 = vpop.f32.mrf.mxu0  ;;  %v1324_v2 = vpop.f32.mrf.mxu1  ;;  %2343 = vmatprep.subr.mxu0 %v2065_v22 }
 0x1e5   :  { %v4153_v13 = vadd.f32 %v1324_v2, %v1100_v8  ;;  %2344 = vmatpush3.msra.mxu0 %v2049_v31 }
 0x1e6   :  { %v1104_v62 = vpop.f32.mrf.mxu0  ;;  %v1326_v33 = vpop.f32.mrf.mxu1 }
 0x1e7   :  { %v1105_v17 = vadd.f32 %v1104_v62, %v4006_v32  ;;  %v2064_v32 = vld [vmem:[%s4572_s4 + $0xf0] sm:$0xff] }
 0x1e8   :  { %v1106_v34 = vpop.f32.mrf.mxu0  ;;  %v1329_v10 = vpop.f32.mrf.mxu1  ;;  %2345 = vmatprep.subr.mxu0 %v2064_v32 }
 0x1e9   :  { %v4156_v21 = vadd.f32 %v1329_v10, %v1105_v17 }
 0x1ea   :  { %v1109_v12 = vpop.f32.mrf.mxu0  ;;  %v1331_v23 = vpop.f32.mrf.mxu1 }
 0x1eb   :  { %v1110_v25 = vadd.f32 %v1109_v12, %v4017_v46  ;;  %v2048_v46 = vld [vmem:[%s4572_s4 + $0x70] sm:$0xff] }
 0x1ec   :  { %v1111_v27 = vpop.f32.mrf.mxu0  ;;  %v1334_v20 = vpop.f32.mrf.mxu1  ;;  %2346 = vmatpush3.msra.mxu0 %v2048_v46 }
 0x1ed   :  { %v4168_v36 = vadd.f32 %v1334_v20, %v1110_v25  ;;  %2347 = vmatprep.subr.mxu0 %v2063_v30 }
 0x1ee   :  { %v1114_v38 = vpop.f32.mrf.mxu0  ;;  %v1336_v60 = vpop.f32.mrf.mxu1 }
 0x1ef   :  { %v1115_v45 = vadd.f32 %v1114_v38, %v4028_v58 }
 0x1f0   :  { %v1116_v47 = vpop.f32.mrf.mxu0  ;;  %v1339_v49 = vpop.f32.mrf.mxu1 }
 0x1f1   :  { %v4177_v52 = vadd.f32 %v1339_v49, %v1115_v45 }
 0x1f2   :  { %v1119_v40 = vpop.f32.mrf.mxu0  ;;  %v1341_v57 = vpop.f32.mrf.mxu1 }
 0x1f3   :  { %v1120_v59 = vadd.f32 %v1119_v40, %v4036_v7 }
 0x1f4   :  { %v1121_v6 = vpop.f32.mrf.mxu0  ;;  %v1344_v56 = vpop.f32.mrf.mxu1 }
 0x1f5   :  { %v4180_v50 = vadd.f32 %v1344_v56, %v1120_v59 }
 0x1f6   :  { %v1124_v15 = vpop.f32.mrf.mxu0  ;;  %v1346_v8 = vpop.f32.mrf.mxu1 }
 0x1f7   :  { %v1125_v24 = vadd.f32 %v1124_v15, %v4044_v18 }
 0x1f8   :  { %v1126_v58 = vpop.f32.mrf.mxu0  ;;  %v1349_v2 = vpop.f32.mrf.mxu1 }
 0x1f9   :  { %v4183_v62 = vadd.f32 %v1349_v2, %v1125_v24 }
 0x1fa   :  { %v1129_v33 = vpop.f32.mrf.mxu0  ;;  %v1351_v17 = vpop.f32.mrf.mxu1 }
 0x1fb   :  { %v1130_v34 = vadd.f32 %v1129_v33, %v4052_v29 }
 0x1fc   :  { %v1131_v10 = vpop.f32.mrf.mxu0  ;;  %v1354_v12 = vpop.f32.mrf.mxu1 }
 0x1fd   :  { %v4186_v23 = vadd.f32 %v1354_v12, %v1130_v34 }
 0x1fe   :  { %v4188_v7 = vpop.f32.mrf.mxu0  ;;  %v1356_v25 = vpop.f32.mrf.mxu1 }
 0x200   :  { %v1136_v27 = vpop.f32.mrf.mxu0  ;;  %v4190_v20 = vpop.f32.mrf.mxu1 }
 0x202   :  { %v2421_v22 = vpop.f32.mrf.mxu0  ;;  %v1361_v18 = vpop.f32.mrf.mxu1 }
 0x203   :  { %v1435_v29 = vadd.f32 %v2421_v22, %v4063_v3 }
 0x204   :  { %v1429_v31 = vpop.f32.mrf.mxu0 }
 0x205   :  { %v1430_v47 = vadd.f32 %v1429_v31, %v4060_v53  ;;  %v1589_v59 = vmax.f32 %v1435_v29, 0.0 }
 0x206   :  { %v2424_v32 = vpop.f32.mrf.mxu0 }
 0x207   :  { %v1445_v6 = vadd.f32 %v2424_v32, %v4075_v51  ;;  %v1588_v8 = vmax.f32 %v1430_v47, 0.0 }
 0x208   :  { %v1439_v46 = vpop.f32.mrf.mxu0 }
 0x209   :  { %v1440_v58 = vadd.f32 %v1439_v46, %v4066_v14 }
 0x20a   :  { %v2427_v38 = vpop.f32.mrf.mxu0 }
 0x20b   :  { %v1455_v53 = vadd.f32 %v2427_v38, %v4081_v48  ;;  %v1590_v25 = vmax.f32 %v1440_v58, 0.0 }
 0x20c   :  { %v1449_v60 = vpop.f32.mrf.mxu0 }
 0x20d   :  { %v1593_v18 = vmax.f32 %v1455_v53, 0.0 }
 0x20e   :  { %v2430_v30 = vpop.f32.mrf.mxu0 }
 0x20f   :  { %v1465_v48 = vadd.f32 %v2430_v30, %v4090_v9 }
 0x210   :  { %v1459_v45 = vpop.f32.mrf.mxu0 }
 0x212   :  { %v2433_v49 = vpop.f32.mrf.mxu0 }
 0x213   :  { %v1475_v40 = vadd.f32 %v2433_v49, %v4099_v28  ;;  %v1591_v28 = vmax.f32 %v1445_v6, 0.0 }
 0x214   :  { %v1469_v57 = vpop.f32.mrf.mxu0 }
 0x215   :  { %v1597_v56 = vmax.f32 %v1475_v40, 0.0  ;;  %v1470_v15 = vadd.f32 %v1469_v57, %v4096_v42  ;;  %v1450_v42 = vadd.f32 %v1449_v60, %v4078_v37  ;;  %v1460_v37 = vadd.f32 %v1459_v45, %v4084_v61 }
 0x216   :  { %v2436_v24 = vpop.f32.mrf.mxu0 }
 0x217   :  { %v4198_v2 = vmax.f32 %v1589_v59, %v1597_v56  ;;  %v1596_v33 = vmax.f32 %v1470_v15, 0.0  ;;  %v1485_v3 = vadd.f32 %v2436_v24, %v4111_v1  ;;  %v1592_v38 = vmax.f32 %v1450_v42, 0.0 }
 0x218   :  { %v1479_v17 = vpop.f32.mrf.mxu0  ;;  %v1594_v59 = vmax.f32 %v1460_v37, 0.0 }
 0x219   :  { %v4202_v34 = vmax.f32 %v1588_v8, %v1596_v33  ;;  %v1599_v10 = vmax.f32 %v1485_v3, 0.0  ;;  %v1480_v51 = vadd.f32 %v1479_v17, %v4102_v43 }
 0x21a   :  { %v2439_v12 = vpop.f32.mrf.mxu0 }
 0x21b   :  { %v4206_v27 = vmax.f32 %v1591_v28, %v1599_v10  ;;  %v1598_v14 = vmax.f32 %v1480_v51, 0.0  ;;  %v1495_v22 = vadd.f32 %v2439_v12, %v4117_v16  ;;  %v1595_v16 = vmax.f32 %v1465_v48, 0.0 }
 0x21c   :  { %v1489_v1 = vpop.f32.mrf.mxu0 }
 0x21d   :  { %v4210_v31 = vmax.f32 %v1590_v25, %v1598_v14  ;;  %v1601_v32 = vmax.f32 %v1495_v22, 0.0  ;;  %v1490_v46 = vadd.f32 %v1489_v1, %v4114_v5 }
 0x21e   :  { %v2442_v43 = vpop.f32.mrf.mxu0 }
 0x21f   :  { %v4214_v60 = vmax.f32 %v1593_v18, %v1601_v32  ;;  %v1600_v29 = vmax.f32 %v1490_v46, 0.0  ;;  %v1505_v47 = vadd.f32 %v2442_v43, %v4126_v39  ;;  %v1667_v46 = vld [vmem:[%s4571_s2 + $0x70] sm:$0xff] }
 0x220   :  { %v1499_v49 = vpop.f32.mrf.mxu0 }
 0x221   :  { %v4217_v40 = vmax.f32 %v1592_v38, %v1600_v29  ;;  %v1603_v57 = vmax.f32 %v1505_v47, 0.0  ;;  %v1500_v9 = vadd.f32 %v1499_v49, %v4123_v26 }
 0x222   :  { %v2445_v30 = vpop.f32.mrf.mxu0 }
 0x223   :  { %v4220_v6 = vmax.f32 %v1595_v16, %v1603_v57  ;;  %v1602_v5 = vmax.f32 %v1500_v9, 0.0  ;;  %v1515_v33 = vadd.f32 %v2445_v30, %v4132_v63  ;;  %v1663_v57 = vld [vmem:[%s4571_s2 + $0x50] sm:$0xff] }
 0x224   :  { %v1509_v56 = vpop.f32.mrf.mxu0 }
 0x225   :  { %v4222_v15 = vmax.f32 %v1594_v59, %v1602_v5  ;;  %v1510_v53 = vadd.f32 %v1509_v56, %v4129_v54  ;;  %v1605_v10 = vmax.f32 %v1515_v33, 0.0  ;;  %v1135_v54 = vadd.f32 %v4188_v7, %v4057_v41  ;;  %v1666_v41 = vld [vmem:[%s4571_s2 + $0x68] sm:$0xff] }
 0x226   :  { %v2448_v61 = vpop.f32.mrf.mxu0  ;;  %v1662_v5 = vld [vmem:[%s4571_s2 + $0x48] sm:$0xff] }
 0x227   :  { %v1525_v17 = vadd.f32 %v2448_v61, %v4138_v19  ;;  %v1604_v14 = vmax.f32 %v1510_v53, 0.0  ;;  %v1360_v37 = vadd.f32 %v4190_v20, %v1135_v54  ;;  %v1658_v53 = vld [vmem:[%s4571_s2 + $0x28] sm:$0xff]  ;;  %v2268_v54 = vld [vmem:[%s4571_s2 + $0x150] sm:$0xff] }
 0x228   :  { %v1519_v45 = vpop.f32.mrf.mxu0 }
 0x229   :  { %v1520_v12 = vadd.f32 %v1519_v45, %v4135_v11  ;;  %v1607_v1 = vmax.f32 %v1525_v17, 0.0 }
 0x22a   :  { %v2451_v8 = vpop.f32.mrf.mxu0 }
 0x22b   :  { %v1606_v38 = vmax.f32 %v1520_v12, 0.0  ;;  %v1654_v12 = vld [vmem:[%s4571_s2 + $0x8] sm:$0xff] }
 0x22c   :  { %v1529_v24 = vpop.f32.mrf.mxu0 }
 0x22e   :  { %v2454_v39 = vpop.f32.mrf.mxu0 }
 0x22f   :  { %v1545_v47 = vadd.f32 %v2454_v39, %v4150_v4 }
 0x230   :  { %v1539_v58 = vpop.f32.mrf.mxu0 }
 0x231   :  { %v1540_v30 = vadd.f32 %v1539_v58, %v4147_v55  ;;  %v1661_v55 = vld [vmem:[%s4571_s2 + $0x40] sm:$0xff]  ;;  %v1611_v45 = vmax.f32 %v1545_v47, 0.0  ;;  %v2281_v47 = vld [vmem:[%s4571_s2 + $0x1b0] sm:$0xff] }
 0x232   :  { %v2457_v3 = vpop.f32.mrf.mxu0 }
 0x233   :  { %v1555_v26 = vadd.f32 %v2457_v3, %v4156_v21  ;;  %v1535_v21 = vadd.f32 %v2451_v8, %v4144_v44  ;;  %v1659_v3 = vld [vmem:[%s4571_s2 + $0x30] sm:$0xff] }
 0x234   :  { %v1549_v28 = vpop.f32.mrf.mxu0 }
 0x235   :  { %v1613_v51 = vmax.f32 %v1555_v26, 0.0  ;;  %v1550_v42 = vadd.f32 %v1549_v28, %v4153_v13  ;;  %v1609_v29 = vmax.f32 %v1535_v21, 0.0  ;;  %v1610_v26 = vmax.f32 %v1540_v30, 0.0  ;;  %v1657_v28 = vld [vmem:[%s4571_s2 + $0x20] sm:$0xff] }
 0x236   :  { %v2460_v25 = vpop.f32.mrf.mxu0  ;;  %v2266_v21 = vld [vmem:[%s4571_s2 + $0x140] sm:$0xff] }
 0x237   :  { %v1629_v22 = vmax.f32 %v1605_v10, %v1613_v51  ;;  %v1612_v18 = vmax.f32 %v1550_v42, 0.0  ;;  %v1565_v63 = vadd.f32 %v2460_v25, %v4177_v52  ;;  %v1530_v52 = vadd.f32 %v1529_v24, %v4141_v35  ;;  %v1665_v35 = vld [vmem:[%s4571_s2 + $0x60] sm:$0xff]  ;;  %v1660_v24 = vld [vmem:[%s4571_s2 + $0x38] sm:$0xff]  ;;  %v1655_v42 = vld [vmem:[%s4571_s2 + $0x10] sm:$0xff] }
 0x238   :  { %v1559_v19 = vpop.f32.mrf.mxu0  ;;  %v1656_v10 = vld [vmem:[%s4571_s2 + $0x18] sm:$0xff]  ;;  %v2062_v30 = vld [vmem:[%s4572_s4 + $0xe0] sm:$0xff] }
 0x239   :  { %v1637_v48 = vmax.f32 %v4198_v2, %v1629_v22  ;;  %v1628_v32 = vmax.f32 %v1604_v14, %v1612_v18  ;;  %v1615_v13 = vmax.f32 %v1565_v63, 0.0  ;;  %v1560_v11 = vadd.f32 %v1559_v19, %v4168_v36  ;;  %v2273_v14 = vld [vmem:[%s4571_s2 + $0x178] sm:$0xff]  ;;  %v2271_v22 = vld [vmem:[%s4571_s2 + $0x168] sm:$0xff]  ;;  %v2270_v18 = vld [vmem:[%s4571_s2 + $0x160] sm:$0xff] }
 0x23a   :  { %v2463_v43 = vpop.f32.mrf.mxu0  ;;  %v1608_v9 = vmax.f32 %v1530_v52, 0.0  ;;  %v2269_v63 = vld [vmem:[%s4571_s2 + $0x158] sm:$0xff]  ;;  %v2258_v52 = vld [vmem:[%s4571_s2 + $0x100] sm:$0xff] }
 0x23b   :  { %1646 = vst.msk [vmem:[%s4573_s8 + $0x8] sm:$0xff] %vm1644_vm0, %v1637_v48  ;;  %v4248_v44 = vmax.f32 %v4202_v34, %v1628_v32  ;;  %v1631_v36 = vmax.f32 %v1607_v1, %v1615_v13  ;;  %v1614_v7 = vmax.f32 %v1560_v11, 0.0  ;;  %v1575_v2 = vadd.f32 %v2463_v43, %v4183_v62  ;;  %2256 = vmatmul.mubr.msk.f32.vlgmr.msra.gmra.mxu1 %vm1644_vm0, %v1637_v48  ;;  %v1664_v34 = vld [vmem:[%s4571_s2 + $0x58] sm:$0xff]  ;;  %v2267_v1 = vld [vmem:[%s4571_s2 + $0x148] sm:$0xff]  ;;  %v2264_v48 = vld [vmem:[%s4571_s2 + $0x130] sm:$0xff] }
 0x23c   :  { %1780 = vmatpush1.msra.mxu1 %v1667_v46  ;;  %v1569_v49 = vpop.f32.mrf.mxu0  ;;  %1827 = vmatprep.mubr.f32.mxu1 %v2488_v0  ;;  %v2265_v19 = vld [vmem:[%s4571_s2 + $0x138] sm:$0xff]  ;;  %v2263_v32 = vld [vmem:[%s4571_s2 + $0x128] sm:$0xff]  ;;  %v2262_v13 = vld [vmem:[%s4571_s2 + $0x120] sm:$0xff] }
 0x23d   :  { %1645 = vst.msk [vmem:[%s4573_s8] sm:$0xff] %vm1644_vm0, %v4248_v44  ;;  %v4267_v62 = vmax.f32 %v4206_v27, %v1631_v36  ;;  %v1630_v20 = vmax.f32 %v1606_v38, %v1614_v7  ;;  %v1617_v16 = vmax.f32 %v1575_v2, 0.0  ;;  %v1570_v4 = vadd.f32 %v1569_v49, %v4180_v50  ;;  %1781 = vmatprep.subr.mxu1 %v1666_v41  ;;  %v2261_v11 = vld [vmem:[%s4571_s2 + $0x118] sm:$0xff]  ;;  %v2260_v46 = vld [vmem:[%s4571_s2 + $0x110] sm:$0xff]  ;;  %v2259_v38 = vld [vmem:[%s4571_s2 + $0x108] sm:$0xff] }
 0x23e   :  { %1782 = vmatpush1.msra.mxu1 %v1665_v35  ;;  %v2466_v59 = vpop.f32.mrf.mxu0  ;;  %v2290_v43 = vld [vmem:[%s4571_s2 + $0x1f8] sm:$0xff]  ;;  %v2289_v41 = vld [vmem:[%s4571_s2 + $0x1f0] sm:$0xff]  ;;  %v2287_v36 = vld [vmem:[%s4571_s2 + $0x1e0] sm:$0xff] }
 0x23f   :  { %1648 = vst.msk [vmem:[%s4573_s8 + $0x18] sm:$0xff] %vm1644_vm0, %v4267_v62  ;;  %v4283_v50 = vmax.f32 %v4210_v31, %v1630_v20  ;;  %v1633_v27 = vmax.f32 %v1609_v29, %v1617_v16  ;;  %v1616_v56 = vmax.f32 %v1570_v4, 0.0  ;;  %v1585_v61 = vadd.f32 %v2466_v59, %v1360_v37  ;;  %1783 = vmatprep.subr.mxu1 %v1664_v34  ;;  %v2286_v7 = vld [vmem:[%s4571_s2 + $0x1d8] sm:$0xff]  ;;  %v2285_v2 = vld [vmem:[%s4571_s2 + $0x1d0] sm:$0xff]  ;;  %v2284_v35 = vld [vmem:[%s4571_s2 + $0x1c8] sm:$0xff] }
 0x240   :  { %1784 = vmatpush1.msra.mxu1 %v1663_v57  ;;  %v1579_v8 = vpop.f32.mrf.mxu0  ;;  %v2283_v37 = vld [vmem:[%s4571_s2 + $0x1c0] sm:$0xff]  ;;  %v2282_v29 = vld [vmem:[%s4571_s2 + $0x1b8] sm:$0xff]  ;;  %v2280_v49 = vld [vmem:[%s4571_s2 + $0x1a8] sm:$0xff] }
 0x241   :  { %1647 = vst.msk [vmem:[%s4573_s8 + $0x10] sm:$0xff] %vm1644_vm0, %v4283_v50  ;;  %v1641_v31 = vmax.f32 %v4214_v60, %v1633_v27  ;;  %v1632_v39 = vmax.f32 %v1608_v9, %v1616_v56  ;;  %v1619_v58 = vmax.f32 %v1585_v61, 0.0  ;;  %v1580_v33 = vadd.f32 %v1579_v8, %v4186_v23  ;;  %1785 = vmatprep.subr.mxu1 %v1662_v5  ;;  %v2279_v34 = vld [vmem:[%s4571_s2 + $0x1a0] sm:$0xff]  ;;  %v2278_v20 = vld [vmem:[%s4571_s2 + $0x198] sm:$0xff]  ;;  %v2277_v16 = vld [vmem:[%s4571_s2 + $0x190] sm:$0xff] }
 0x242   :  { %1786 = vmatpush1.msra.mxu1 %v1661_v55  ;;  %v2276_v4 = vld [vmem:[%s4571_s2 + $0x188] sm:$0xff]  ;;  %v2275_v57 = vld [vmem:[%s4571_s2 + $0x180] sm:$0xff]  ;;  %v2061_v5 = vld [vmem:[%s4572_s4 + $0xd8] sm:$0xff] }
 0x243   :  { %1650 = vst.msk [vmem:[%s4573_s8 + $0x28] sm:$0xff] %vm1644_vm0, %v1641_v31  ;;  %v1640_v60 = vmax.f32 %v4217_v40, %v1632_v39  ;;  %v1635_v17 = vmax.f32 %v1611_v45, %v1619_v58  ;;  %v1618_v23 = vmax.f32 %v1580_v33, 0.0  ;;  %1787 = vmatprep.subr.mxu1 %v1660_v24  ;;  %v2047_v9 = vld [vmem:[%s4572_s4 + $0x68] sm:$0xff]  ;;  %v2046_v59 = vld [vmem:[%s4572_s4 + $0x60] sm:$0xff]  ;;  %v2044_v27 = vld [vmem:[%s4572_s4 + $0x50] sm:$0xff] }
 0x244   :  { %1788 = vmatpush1.msra.mxu1 %v1659_v3  ;;  %2348 = vmatpush3.msra.mxu0 %v2047_v9  ;;  %v2059_v56 = vld [vmem:[%s4572_s4 + $0xc8] sm:$0xff]  ;;  %v2058_v55 = vld [vmem:[%s4572_s4 + $0xc0] sm:$0xff]  ;;  %v2057_v8 = vld [vmem:[%s4572_s4 + $0xb8] sm:$0xff] }
 0x245   :  { %1649 = vst.msk [vmem:[%s4573_s8 + $0x20] sm:$0xff] %vm1644_vm0, %v1640_v60  ;;  %v1643_v51 = vmax.f32 %v4220_v6, %v1635_v17  ;;  %v1634_v40 = vmax.f32 %v1610_v26, %v1618_v23  ;;  %1789 = vmatprep.subr.mxu1 %v1658_v53  ;;  %v1653_v6 = vld [vmem:[%s4571_s2] sm:$0xff]  ;;  %2349 = vmatprep.subr.mxu0 %v2062_v30  ;;  %v2043_v61 = vld [vmem:[%s4572_s4 + $0x48] sm:$0xff]  ;;  %v2041_v24 = vld [vmem:[%s4572_s4 + $0x38] sm:$0xff] }
 0x246   :  { %1790 = vmatpush1.msra.mxu1 %v1657_v28  ;;  %2350 = vmatpush3.msra.mxu0 %v2046_v59  ;;  %v2042_v45 = vld [vmem:[%s4572_s4 + $0x40] sm:$0xff]  ;;  %v2056_v31 = vld [vmem:[%s4572_s4 + $0xb0] sm:$0xff]  ;;  %v2055_v58 = vld [vmem:[%s4572_s4 + $0xa8] sm:$0xff] }
 0x247   :  { %1652 = vst.msk [vmem:[%s4573_s8 + $0x38] sm:$0xff] %vm1644_vm0, %v1643_v51  ;;  %v1642_v25 = vmax.f32 %v4222_v15, %v1634_v40  ;;  %1791 = vmatprep.subr.mxu1 %v1656_v10  ;;  %v2272_v15 = vld [vmem:[%s4571_s2 + $0x170] sm:$0xff]  ;;  %2351 = vmatprep.subr.mxu0 %v2061_v5  ;;  %v2039_v33 = vld [vmem:[%s4572_s4 + $0x28] sm:$0xff]  ;;  %v2054_v3 = vld [vmem:[%s4572_s4 + $0xa0] sm:$0xff] }
 0x248   :  { %1792 = vmatpush1.msra.mxu1 %v1655_v42  ;;  %v2040_v39 = vld [vmem:[%s4572_s4 + $0x30] sm:$0xff]  ;;  %v2038_v53 = vld [vmem:[%s4572_s4 + $0x20] sm:$0xff]  ;;  %v2053_v26 = vld [vmem:[%s4572_s4 + $0x98] sm:$0xff] }
 0x249   :  { %1651 = vst.msk [vmem:[%s4573_s8 + $0x30] sm:$0xff] %vm1644_vm0, %v1642_v25  ;;  %1793 = vmatprep.subr.mxu1 %v1654_v12  ;;  %v2037_v60 = vld [vmem:[%s4572_s4 + $0x18] sm:$0xff]  ;;  %v2052_v17 = vld [vmem:[%s4572_s4 + $0x90] sm:$0xff]  ;;  %v2051_v28 = vld [vmem:[%s4572_s4 + $0x88] sm:$0xff] }
 0x24a   :  { %1794 = vmatpush1.msra.mxu1 %v1653_v6  ;;  %v2036_v23 = vld [vmem:[%s4572_s4 + $0x10] sm:$0xff]  ;;  %v2035_v10 = vld [vmem:[%s4572_s4 + $0x8] sm:$0xff]  ;;  %v2050_v51 = vld [vmem:[%s4572_s4 + $0x80] sm:$0xff] }
 0x24b   :  { %2257 = vmatmul.mubr.msk.f32.vlgmr.msra.gmra.mxu1 %vm1644_vm0, %v4248_v44  ;;  %1870 = vmatprep.subr.mxu1 %v2273_v14  ;;  %v2288_v44 = vld [vmem:[%s4571_s2 + $0x1e8] sm:$0xff]  ;;  %v2034_v40 = vld [vmem:[%s4572_s4] sm:$0xff]  ;;  %v2150_v42 = vld [vmem:[%s4574_s6 + $0x38] sm:$0xff] }
 0x24c   :  { %1871 = vmatpush1.msra.mxu1 %v2272_v15  ;;  %1918 = vmatprep.mubr.f32.mxu1 %v2488_v0  ;;  %v2149_v12 = vld [vmem:[%s4574_s6 + $0x30] sm:$0xff]  ;;  %v2148_v25 = vld [vmem:[%s4574_s6 + $0x28] sm:$0xff]  ;;  %v2147_v6 = vld [vmem:[%s4574_s6 + $0x20] sm:$0xff] }
 0x24d   :  { %1872 = vmatprep.subr.mxu1 %v2271_v22  ;;  %v2293_v9 = vld [vmem:[%s4577_s7] ss:$0 sm:$0xff] }
 0x24e   :  { %1873 = vmatpush1.msra.mxu1 %v2270_v18  ;;  %v2022_v18 = vlaneseq }
 0x24f   :  { %1874 = vmatprep.subr.mxu1 %v2269_v63 }
 0x250   :  { %1875 = vmatpush1.msra.mxu1 %v2268_v54 }
 0x251   :  { %1876 = vmatprep.subr.mxu1 %v2267_v1  ;;  %v2023_v1 = vshrl.u32 %v2022_v18, 7 }
 0x252   :  { %1877 = vmatpush1.msra.mxu1 %v2266_v21 }
 0x253   :  { %1878 = vmatprep.subr.mxu1 %v2265_v19  ;;  %v2028_v21 = vsub.s32 1, %v2023_v1 }
 0x254   :  { %1879 = vmatpush1.msra.mxu1 %v2264_v48 }
 0x255   :  { %1880 = vmatprep.subr.mxu1 %v2263_v32  ;;  %v2024_v32 = vsub.s32 0, %v2023_v1 }
 0x256   :  { %1881 = vmatpush1.msra.mxu1 %v2262_v13 }
 0x257   :  { %1882 = vmatprep.subr.mxu1 %v2261_v11  ;;  %v2020_v11 = vld [vmem:[%s4575_s3] sm:$0x3] }
 0x258   :  { %1883 = vmatpush1.msra.mxu1 %v2260_v46 }
 0x259   :  { %1884 = vmatprep.subr.mxu1 %v2259_v38 }
 0x25a   :  { %1885 = vmatpush1.msra.mxu1 %v2258_v52 }
 0x25b   :  { %2274 = vmatmul.mubr.msk.f32.vlgmr.msra.gmra.mxu1 %vm1644_vm0, %v4283_v50  ;;  %1963 = vmatprep.subr.mxu1 %v2290_v43  ;;  %v2060_v50 = vld [vmem:[%s4572_s4 + $0xd0] sm:$0xff]  ;;  %v2029_v43 = vrot.slane %v2020_v11, %v2028_v21 }
 0x25c   :  { %1964 = vmatpush1.msra.mxu1 %v2289_v41  ;;  %2011 = vmatprep.mubr.f32.mxu1 %v2488_v0 }
 0x25d   :  { %1965 = vmatprep.subr.mxu1 %v2288_v44  ;;  %v2025_v44 = vrot.slane %v2020_v11, %v2024_v32 }
 0x25e   :  { %1966 = vmatpush1.msra.mxu1 %v2287_v36 }
 0x25f   :  { %1967 = vmatprep.subr.mxu1 %v2286_v7 }
 0x260   :  { %1968 = vmatpush1.msra.mxu1 %v2285_v2 }
 0x261   :  { %1969 = vmatprep.subr.mxu1 %v2284_v35 }
 0x262   :  { %1970 = vmatpush1.msra.mxu1 %v2283_v37  ;;  %v2146_v37 = vld [vmem:[%s4574_s6 + $0x18] sm:$0xff] }
 0x263   :  { %1971 = vmatprep.subr.mxu1 %v2282_v29  ;;  %v2145_v29 = vld [vmem:[%s4574_s6 + $0x10] sm:$0xff] }
 0x264   :  { %1972 = vmatpush1.msra.mxu1 %v2281_v47  ;;  %v2144_v47 = vld [vmem:[%s4574_s6 + $0x8] sm:$0xff] }
 0x265   :  { %1973 = vmatprep.subr.mxu1 %v2280_v49  ;;  %v2143_v49 = vld [vmem:[%s4574_s6] sm:$0xff] }
 0x266   :  { %1974 = vmatpush1.msra.mxu1 %v2279_v34 }
 0x267   :  { %1975 = vmatprep.subr.mxu1 %v2278_v20  ;;  %v2292_v20 = vld [vmem:[%s4576_s5] ss:$0 sm:$0xff] }
 0x268   :  { %1976 = vmatpush1.msra.mxu1 %v2277_v16 }
 0x269   :  { %1977 = vmatprep.subr.mxu1 %v2276_v4 }
 0x26a   :  { %1978 = vmatpush1.msra.mxu1 %v2275_v57 }
 0x26b   :  { %2291 = vmatmul.mubr.msk.f32.vlgmr.msra.gmra.mxu1 %vm1644_vm0, %v4267_v62  ;;  %2467 = vmatprep.subr.mxu1 %v2488_v0  ;;  %v2045_v62 = vld [vmem:[%s4572_s4 + $0x58] sm:$0xff] }
 0x26c   :  { %2352 = vmatpush3.msra.mxu0 %v2045_v62  ;;  %2468 = vmatpush3.msra.mxu1 %v2150_v42 }
 0x26d   :  { %2353 = vmatprep.subr.mxu0 %v2060_v50  ;;  %2469 = vmatprep.subr.mxu1 %v2488_v0 }
 0x26e   :  { %2354 = vmatpush3.msra.mxu0 %v2044_v27  ;;  %2470 = vmatpush3.msra.mxu1 %v2149_v12 }
 0x26f   :  { %2355 = vmatprep.subr.mxu0 %v2059_v56  ;;  %2471 = vmatprep.subr.mxu1 %v2488_v0 }
 0x270   :  { %2356 = vmatpush3.msra.mxu0 %v2043_v61  ;;  %2472 = vmatpush3.msra.mxu1 %v2148_v25 }
 0x271   :  { %2357 = vmatprep.subr.mxu0 %v2058_v55  ;;  %2473 = vmatprep.subr.mxu1 %v2488_v0 }
 0x272   :  { %2358 = vmatpush3.msra.mxu0 %v2042_v45  ;;  %2474 = vmatpush3.msra.mxu1 %v2147_v6 }
 0x273   :  { %2359 = vmatprep.subr.mxu0 %v2057_v8  ;;  %2475 = vmatprep.subr.mxu1 %v2488_v0 }
 0x274   :  { %2360 = vmatpush3.msra.mxu0 %v2041_v24  ;;  %2476 = vmatpush3.msra.mxu1 %v2146_v37 }
 0x275   :  { %2361 = vmatprep.subr.mxu0 %v2056_v31  ;;  %2477 = vmatprep.subr.mxu1 %v2488_v0 }
 0x276   :  { %2362 = vmatpush3.msra.mxu0 %v2040_v39  ;;  %2478 = vmatpush3.msra.mxu1 %v2145_v29 }
 0x277   :  { %2363 = vmatprep.subr.mxu0 %v2055_v58  ;;  %2479 = vmatprep.subr.mxu1 %v2488_v0 }
 0x278   :  { %2364 = vmatpush3.msra.mxu0 %v2039_v33  ;;  %2480 = vmatpush3.msra.mxu1 %v2144_v47 }
 0x279   :  { %2365 = vmatprep.subr.mxu0 %v2054_v3  ;;  %2481 = vmatprep.subr.mxu1 %v2488_v0 }
 0x27a   :  { %2366 = vmatpush3.msra.mxu0 %v2038_v53  ;;  %2483 = vmatprep.mubr.msk.f32.mxu1 %vm2489_vm1, %v2488_v0 }
 0x27b   :  { %2367 = vmatprep.subr.mxu0 %v2053_v26  ;;  %2482 = vmatpush3.msra.mxu1 %v2143_v49 }
 0x27c   :  { %2368 = vmatpush3.msra.mxu0 %v2037_v60 }
 0x27d   :  { %2369 = vmatprep.subr.mxu0 %v2052_v17 }
 0x27e   :  { %2370 = vmatpush3.msra.mxu0 %v2036_v23 }
 0x27f   :  { %2371 = vmatprep.subr.mxu0 %v2051_v28 }
 0x280   :  { %2372 = vmatpush3.msra.mxu0 %v2035_v10 }
 0x281   :  { %2373 = vmatprep.subr.mxu0 %v2050_v51 }
 0x282   :  { %2374 = vmatpush3.msra.mxu0 %v2034_v40 }
 0x2fb   :  { %v1755_v14 = vpop.f32.mrf.mxu1 }
 0x2fd   :  { %v1757_v15 = vpop.f32.mrf.mxu1 }
 0x30b   :  { %v1829_v22 = vpop.f32.mrf.mxu1 }
 0x30c   :  { %v1830_v19 = vadd.f32 %v1829_v22, %v1755_v14 }
 0x30d   :  { %v1831_v63 = vpop.f32.mrf.mxu1 }
 0x30e   :  { %v1832_v13 = vadd.f32 %v1831_v63, %v1757_v15 }
 0x31b   :  { %v1920_v54 = vpop.f32.mrf.mxu1 }
 0x31c   :  { %v1925_v46 = vadd.f32 %v1920_v54, %v1830_v19 }
 0x31d   :  { %v1922_v48 = vpop.f32.mrf.mxu1 }
 0x31e   :  { %v1926_v52 = vadd.f32 %v1922_v48, %v1832_v13 }
 0x32b   :  { %v2013_v38 = vpop.f32.mrf.mxu1 }
 0x32c   :  { %v2018_v41 = vadd.f32 %v2013_v38, %v1925_v46 }
 0x32d   :  { %v2015_v36 = vpop.f32.mrf.mxu1 }
 0x32e   :  { %v2019_v7 = vadd.f32 %v2015_v36, %v1926_v52  ;;  %v2032_v35 = vadd.f32 %v2025_v44, %v2018_v41 }
 0x330   :  { %v2033_v2 = vadd.f32 %v2029_v43, %v2019_v7 }
 0x332   :  { %2137 = vmatprep.mubr.f32.mxu0 %v2033_v2 }
 0x333   :  { %2138 = vmatmul.mubr.f32.vlgmr.msra.gmra.mxu0 %v2032_v35 }
 0x3f3   :  { %v2375_v34 = vpop.f32.mrf.mxu0 }
 0x3f5   :  { %v2376_v16 = vpop.f32.mrf.mxu0 }
 0x3f6   :  { %v2377_v4 = vadd.f32 %v2376_v16, %v2375_v34 }
 0x3f8   :  { %v2140_v57 = vadd.f32 %v2377_v4, %v2292_v20 }
 0x3fa   :  { %2484 = vmatmul.mubr.msk.f32.vlgmr.msra.gmra.mxu1 %vm1644_vm0, %v2140_v57 }
 0x4ba   :  { %v2227_v30 = vpop.f32.mrf.mxu1 }
 0x4bb   :  { %v2228_v59 = vadd.f32 %v2293_v9, %v2227_v30 }
 0x4bc   :  { %v2485_v5 = vpop.f32.mrf.mxu1 }
 0x4bd   :  { %2231 = vst [vmem:[%s4578_s9] sm:$0xff] %v2228_v59 }

</bundles_post_ra>
